<compile_context>
chip_gen: v7x
topology: tpu7x:2x2x1
jax: 0.10.0
libtpu: 0.0.40
codegen_flags: <defaults>
</compile_context>

<pallas_src>
import math

import jax
import jax.numpy as jnp
from jax.experimental import pallas as pl
from jax.experimental.pallas import tpu as pltpu

_DROP_P = 0.3  # Python float -> becomes a literal inside the kernels


# ----------------------------------------------------------------------------
# conv1 kernel: Conv2d(5,5,2,2)+ReLU+MaxPool2d(2) as a lane-dense bf16 matmul.
# ----------------------------------------------------------------------------
def conv_pool_kernel(p_ref, w_ref, b_ref, o_ref):
    # p_ref: (4, K, t) bf16 -- 4 pool-window members, K = Cin*2*2 on sublanes,
    #                          t pooled positions on lanes (lane-dense).
    # w_ref: (Cout, K) bf16, b_ref: (Cout, 1) f32, o_ref: (Cout, t) bf16.
    w = w_ref[...]
    h = jnp.dot(w, p_ref[0], preferred_element_type=jnp.float32)
    for m in range(1, 4):  # static unroll over the 2x2 pool window
        h = jnp.maximum(h, jnp.dot(w, p_ref[m], preferred_element_type=jnp.float32))
    # bias + ReLU commute with the pool max (same bias for every member).
    o_ref[...] = jnp.maximum(h + b_ref[...], 0.0).astype(o_ref.dtype)


def _pick_tile(rows, cap):
    """Largest multiple-of-128 tile <= cap that divides rows."""
    if rows <= cap:
        return rows
    t = (cap // 128) * 128
    while t >= 128:
        if rows % t == 0:
            return t
        t -= 128
    return rows  # fallback: single full block (correct; lane-masked if rows%128)


def _conv1_tile_cap():
    """Per-generation conv1 tile cap (perf only; any divisor of rows works)."""
    try:
        kind = jax.devices()[0].device_kind.lower()
    except Exception:
        return 2048
    # v7x has 2 TensorCores/chip: keep the "parallel" grid at >=2 steps/core.
    if "v7" in kind or "tpu7" in kind.replace(" ", ""):
        return 2048
    return 4096  # single-TC parts: fewer grid steps, VMEM still tiny


def _im2col_pool_groups(x, channels_first_batch):
    """-> ((4, C*4, B*(H//4)*(W//4)) bf16 patches, (B, PH, PW)).

    Pool-member axis = (dh, dw) of the 2x2 max-pool window; feature axis is
    ordered (ci, kh, kw) to match the OIHW weight flatten; columns are (b, ph,
    pw).  The bf16 cast rides the same XLA transpose fusion, so the patch
    tensor materialized in HBM is half-size.
    """
    if channels_first_batch:  # (C, B, H, W) -- the conv kernel's native layout
        C, B, H, W = x.shape
        PH, PW = H // 4, W // 4
        x8 = x.reshape(C, B, PH, 2, 2, PW, 2, 2)
        x8 = x8.transpose(3, 6, 0, 4, 7, 1, 2, 5)   # -> (dh,dw,c,kh,kw,b,ph,pw)
    else:                     # (B, C, H, W) -- external NCHW interface
        B, C, H, W = x.shape
        PH, PW = H // 4, W // 4
        x8 = x.reshape(B, C, PH, 2, 2, PW, 2, 2)
        x8 = x8.transpose(3, 6, 1, 4, 7, 0, 2, 5)   # -> (dh,dw,c,kh,kw,b,ph,pw)
    patches = x8.reshape(4, C * 4, B * PH * PW).astype(jnp.bfloat16)
    return patches, (B, PH, PW)


def conv_block(x, w_oihw, b, *, nchw_input, tile_cap):
    """Conv2d(C,Cout,2,2,0) + ReLU + MaxPool2d(2). Returns (Cout,B,PH,PW) bf16."""
    patches, (B, PH, PW) = _im2col_pool_groups(
        x, channels_first_batch=not nchw_input)
    Cout = w_oihw.shape[0]
    K = patches.shape[1]
    rows = B * PH * PW
    t = _pick_tile(rows, tile_cap)

    w2d = w_oihw.reshape(Cout, K).astype(jnp.bfloat16)  # feature order (ci,kh,kw)
    b2d = b.reshape(Cout, 1).astype(jnp.float32)

    out = pl.pallas_call(
        conv_pool_kernel,
        out_shape=jax.ShapeDtypeStruct((Cout, rows), jnp.bfloat16),
        grid=(rows // t,),
        in_specs=[
            pl.BlockSpec((4, K, t), lambda i: (0, 0, i)),
            pl.BlockSpec((Cout, K), lambda i: (0, 0)),
            pl.BlockSpec((Cout, 1), lambda i: (0, 0)),
        ],
        out_specs=pl.BlockSpec((Cout, t), lambda i: (0, i)),
        compiler_params=pltpu.CompilerParams(dimension_semantics=("parallel",)),
    )(patches, w2d, b2d)

    return out.reshape(Cout, B, PH, PW)  # channel-major; no NCHW round-trip


# ----------------------------------------------------------------------------
# Fused conv2 + MLP kernel: conv2 matmul+pool, fc1(+flatten)/relu/dropout,
# fc2/relu, fc3/fc4 branch, combine, fc5 -- one pallas_call, no grid.
# ----------------------------------------------------------------------------
def conv2_mlp_kernel(p2_ref, y_ref, u_ref, cw_ref, cb_ref,
                     w1_ref, b1_ref, w2_ref, b2_ref,
                     w3_ref, b3_ref, w4_ref, b4_ref,
                     wcx_ref, wcy_ref, bc_ref, w5_ref, b5_ref,
                     o_ref):
    f32, bf16 = jnp.float32, jnp.bfloat16
    B = o_ref.shape[0]

    # ---- conv2 (2x2/s2 conv + ReLU + 2x2 max-pool) as a lane-dense matmul ----
    cw = cw_ref[...]                                             # (5, 20) bf16
    h = jnp.dot(cw, p2_ref[0], preferred_element_type=f32)
    for m in range(1, 4):
        h = jnp.maximum(h, jnp.dot(cw, p2_ref[m], preferred_element_type=f32))
    h = jnp.maximum(h + cb_ref[...], 0.0)                        # (5, B*256) f32

    # ---- fc1 with the torch channel-major flatten rebuilt via aligned concats:
    # xf[b, c*256 + pos] = h[c, b*256 + pos]   (lane slices at multiples of 128)
    nchan = h.shape[0]
    npos = h.shape[1] // B                                       # 256
    xf_rows = []
    for b in range(B):                                           # static (B=2)
        xf_rows.append(jnp.concatenate(
            [h[c:c + 1, b * npos:(b + 1) * npos] for c in range(nchan)], axis=1))
    xf = jnp.concatenate(xf_rows, axis=0).astype(bf16)           # (B, 1280)

    h1 = jnp.maximum(
        jnp.dot(xf, w1_ref[...], preferred_element_type=f32) + b1_ref[...], 0.0)
    # F.dropout(p=0.3, training=True): keep iff u >= p, scale by 1/(1-p).
    h1 = jnp.where(u_ref[...] >= _DROP_P, h1 * (1.0 / (1.0 - _DROP_P)), 0.0)

    h2 = jnp.maximum(
        jnp.dot(h1.astype(bf16), w2_ref[...], preferred_element_type=f32)
        + b2_ref[...], 0.0)                                      # (B, 128)

    # tiny g-branch: lane-starved but free under the w1/w2 weight-load slack.
    g1 = jnp.maximum(jnp.dot(y_ref[...], w3_ref[...], preferred_element_type=f32)
                     + b3_ref[...], 0.0)                         # (B, 16)
    g2 = jnp.maximum(jnp.dot(g1, w4_ref[...], preferred_element_type=f32)
                     + b4_ref[...], 0.0)                         # (B, 4)

    # combine(cat([h2, g2], dim=1)) == h2 @ Wc[:128] + g2 @ Wc[128:] + bc
    comb = jnp.maximum(
        jnp.dot(h2.astype(bf16), wcx_ref[...], preferred_element_type=f32)
        + jnp.dot(g2, wcy_ref[...], preferred_element_type=f32)
        + bc_ref[...], 0.0)                                      # (B, 32)

    out = jnp.dot(comb, w5_ref[...], preferred_element_type=f32) + b5_ref[...]
    o_ref[...] = out.astype(o_ref.dtype)                         # (B, 1)


def conv2_mlp_forward(p2, y, drop_u, p):
    B = y.shape[0]
    vmem = pl.BlockSpec(memory_space=pltpu.MemorySpace.VMEM)
    cw = p["conv2_w"].reshape(p["conv2_w"].shape[0], -1)   # (5, 20) bf16
    cb = p["conv2_b"].reshape(-1, 1)                       # (5, 1)  f32
    out = pl.pallas_call(
        conv2_mlp_kernel,
        out_shape=jax.ShapeDtypeStruct((B, 1), jnp.float32),
        in_specs=[vmem] * 18,
        out_specs=vmem,
    )(p2, y, drop_u, cw, cb,
      p["w1"], p["b1"], p["w2"], p["b2"],
      p["w3"], p["b3"], p["w4"], p["b4"],
      p["wcx"], p["wcy"], p["bc"], p["w5"], p["b5"])
    return out[:, 0]  # squeeze(-1)


# ----------------------------------------------------------------------------
# Full forward + deterministic parameter init + pure-JAX reference.
# ----------------------------------------------------------------------------
def tshn_forward(params, x, y, drop_u):
    # conv1: NCHW f32 in -> (5, B, 64, 64) bf16 channel-major (kernel native).
    h = conv_block(x, params["conv1_w"], params["conv1_b"],
                   nchw_input=True, tile_cap=_conv1_tile_cap())
    # conv2's im2col is tiny (~80 KB bf16); conv2 + the whole MLP tail run in
    # one fused pallas_call, so the (5,B,16,16) activation never hits HBM.
    p2, _ = _im2col_pool_groups(h, channels_first_batch=True)
    return conv2_mlp_forward(p2, y, drop_u, params)  # (B,)


def init_params(key):
    ks = jax.random.split(key, 16)
    bf16 = jnp.bfloat16

    def u(k, shape, fan_in, dtype=jnp.float32):
        s = 1.0 / math.sqrt(fan_in)
        return jax.random.uniform(k, shape, jnp.float32, -s, s).astype(dtype)

    p = {}
    p["conv1_w"] = u(ks[0], (5, 5, 2, 2), 20, bf16)
    p["conv1_b"] = u(ks[1], (5,), 20)
    p["conv2_w"] = u(ks[2], (5, 5, 2, 2), 20, bf16)
    p["conv2_b"] = u(ks[3], (5,), 20)
    # fc1 weight stored (in_features, out) with rows in torch's (c, h, w) order.
    p["w1"] = u(ks[4], (1280, 512), 1280, bf16)
    p["b1"] = u(ks[5], (1, 512), 1280)
    p["w2"] = u(ks[6], (512, 128), 512, bf16)
    p["b2"] = u(ks[7], (1, 128), 512)
    p["w3"] = u(ks[8], (4, 16), 4)
    p["b3"] = u(ks[9], (1, 16), 4)
    p["w4"] = u(ks[10], (16, 4), 16)
    p["b4"] = u(ks[11], (1, 4), 16)
    wc = u(ks[12], (132, 32), 132)
    p["wcx"] = wc[:128].astype(bf16)   # acts on fc2 output (128)
    p["wcy"] = wc[128:]                # acts on fc4 output (4)
    p["bc"] = u(ks[13], (1, 32), 132)
    p["w5"] = u(ks[14], (32, 1), 32)
    p["b5"] = u(ks[15], (1, 1), 32)
    return p


def tshn_reference(p, x, y, drop_u):
    """Pure-JAX reference (lax.conv + reduce_window), mirroring the kernels'
    bf16-input / f32-accumulation numerics."""
    f32, bf16 = jnp.float32, jnp.bfloat16

    def block(h, w, b, out_bf16):
        c = jax.lax.conv_general_dilated(
            h.astype(bf16), w, window_strides=(2, 2), padding="VALID",
            dimension_numbers=("NCHW", "OIHW", "NCHW"),
            preferred_element_type=f32)
        c = jnp.maximum(c + b.reshape(1, -1, 1, 1), 0.0)
        pool = jax.lax.reduce_window(c, -jnp.inf, jax.lax.max,
                                     (1, 1, 2, 2), (1, 1, 2, 2), "VALID")
        return pool.astype(bf16) if out_bf16 else pool

    h = block(x, p["conv1_w"], p["conv1_b"], True)      # (B,5,64,64) bf16
    h = block(h, p["conv2_w"], p["conv2_b"], False)     # (B,5,16,16) f32
    B = x.shape[0]
    xf = h.reshape(B, -1).astype(bf16)                  # channel-major flatten
    h1 = jnp.maximum(
        jnp.dot(xf, p["w1"], preferred_element_type=f32) + p["b1"], 0.0)
    h1 = jnp.where(drop_u >= _DROP_P, h1 * (1.0 / (1.0 - _DROP_P)), 0.0)
    h2 = jnp.maximum(
        jnp.dot(h1.astype(bf16), p["w2"], preferred_element_type=f32)
        + p["b2"], 0.0)
    g1 = jnp.maximum(jnp.dot(y, p["w3"]) + p["b3"], 0.0)
    g2 = jnp.maximum(jnp.dot(g1, p["w4"]) + p["b4"], 0.0)
    comb = jnp.maximum(
        jnp.dot(h2.astype(bf16), p["wcx"], preferred_element_type=f32)
        + jnp.dot(g2, p["wcy"]) + p["bc"], 0.0)
    return (jnp.dot(comb, p["w5"]) + p["b5"])[:, 0]


if __name__ == "__main__":
    key = jax.random.PRNGKey(0)
    kp, kx, ky, kd = jax.random.split(key, 4)

    params = init_params(kp)
    # Spatial 256 is dictated by fc1's in_features = 5*16*16 after two /4 blocks.
    x = jax.random.normal(kx, (2, 5, 256, 256), dtype=jnp.float32)
    y = jax.random.normal(ky, (2, 4), dtype=jnp.float32)
    drop_u = jax.random.uniform(kd, (2, 512), dtype=jnp.float32)

    fwd = jax.jit(tshn_forward)
    out = jax.block_until_ready(fwd(params, x, y, drop_u))
    assert out.shape == (2,), out.shape
    assert bool(jnp.all(jnp.isfinite(out)))

    ref = tshn_reference(params, x, y, drop_u)
    assert bool(jnp.allclose(out, ref, rtol=1e-2, atol=1e-2)), (out, ref)
    print("KERNEL_OK")
</pallas_src>

<mosaic_0001>
module attributes {stable_mosaic.version = 11 : i64} {
  func.func @conv_pool_kernel(%arg0: i32, %arg1: memref<4x20x4096xbf16, #tpu.memory_space<vmem>>, %arg2: memref<5x20xbf16, #tpu.memory_space<vmem>>, %arg3: memref<5x1xf32, #tpu.memory_space<vmem>>, %arg4: memref<5x4096xbf16, #tpu.memory_space<vmem>>) attributes {dimension_semantics = [#tpu.dimension_semantics<parallel>], iteration_bounds = array<i64: 2>, scalar_prefetch = 0 : i64, scratch_operands = 0 : i64, tpu.core_type = #tpu.core_type<tc>, window_params = [{transform_indices = @transform_0, window_bounds = array<i64: 4, 20, 4096>}, {pipeline_mode = #tpu.pipeline_mode<synchronous>, transform_indices = @transform_1, window_bounds = array<i64: 5, 20>}, {pipeline_mode = #tpu.pipeline_mode<synchronous>, transform_indices = @transform_2, window_bounds = array<i64: 5, 1>}, {transform_indices = @transform_3, window_bounds = array<i64: 5, 4096>}]} {
    %c0 = arith.constant 0 : index
    %c0_0 = arith.constant 0 : index
    %0 = vector.load %arg2[%c0, %c0_0] : memref<5x20xbf16, #tpu.memory_space<vmem>>, vector<5x20xbf16>
    %c0_1 = arith.constant 0 : index
    %c0_2 = arith.constant 0 : index
    %c0_3 = arith.constant 0 : index
    %1 = vector.load %arg1[%c0_1, %c0_2, %c0_3] : memref<4x20x4096xbf16, #tpu.memory_space<vmem>>, vector<1x20x4096xbf16>
    %2 = vector.shape_cast %1 : vector<1x20x4096xbf16> to vector<20x4096xbf16>
    %cst = arith.constant dense<0.000000e+00> : vector<5x4096xf32>
    %3 = tpu.matmul %0, %2, %cst {dimension_numbers = #tpu.dot_dimension_numbers<[1], [0], [0], [1], [0, 0, 1, 1], [], []>} : vector<5x20xbf16>, vector<20x4096xbf16>, vector<5x4096xf32> -> vector<5x4096xf32>
    %c1 = arith.constant 1 : index
    %c0_4 = arith.constant 0 : index
    %c0_5 = arith.constant 0 : index
    %4 = vector.load %arg1[%c1, %c0_4, %c0_5] : memref<4x20x4096xbf16, #tpu.memory_space<vmem>>, vector<1x20x4096xbf16>
    %5 = vector.shape_cast %4 : vector<1x20x4096xbf16> to vector<20x4096xbf16>
    %cst_6 = arith.constant dense<0.000000e+00> : vector<5x4096xf32>
    %6 = tpu.matmul %0, %5, %cst_6 {dimension_numbers = #tpu.dot_dimension_numbers<[1], [0], [0], [1], [0, 0, 1, 1], [], []>} : vector<5x20xbf16>, vector<20x4096xbf16>, vector<5x4096xf32> -> vector<5x4096xf32>
    %7 = arith.maximumf %3, %6 : vector<5x4096xf32>
    %c2 = arith.constant 2 : index
    %c0_7 = arith.constant 0 : index
    %c0_8 = arith.constant 0 : index
    %8 = vector.load %arg1[%c2, %c0_7, %c0_8] : memref<4x20x4096xbf16, #tpu.memory_space<vmem>>, vector<1x20x4096xbf16>
    %9 = vector.shape_cast %8 : vector<1x20x4096xbf16> to vector<20x4096xbf16>
    %cst_9 = arith.constant dense<0.000000e+00> : vector<5x4096xf32>
    %10 = tpu.matmul %0, %9, %cst_9 {dimension_numbers = #tpu.dot_dimension_numbers<[1], [0], [0], [1], [0, 0, 1, 1], [], []>} : vector<5x20xbf16>, vector<20x4096xbf16>, vector<5x4096xf32> -> vector<5x4096xf32>
    %11 = arith.maximumf %7, %10 : vector<5x4096xf32>
    %c3 = arith.constant 3 : index
    %c0_10 = arith.constant 0 : index
    %c0_11 = arith.constant 0 : index
    %12 = vector.load %arg1[%c3, %c0_10, %c0_11] : memref<4x20x4096xbf16, #tpu.memory_space<vmem>>, vector<1x20x4096xbf16>
    %13 = vector.shape_cast %12 : vector<1x20x4096xbf16> to vector<20x4096xbf16>
    %cst_12 = arith.constant dense<0.000000e+00> : vector<5x4096xf32>
    %14 = tpu.matmul %0, %13, %cst_12 {dimension_numbers = #tpu.dot_dimension_numbers<[1], [0], [0], [1], [0, 0, 1, 1], [], []>} : vector<5x20xbf16>, vector<20x4096xbf16>, vector<5x4096xf32> -> vector<5x4096xf32>
    %15 = arith.maximumf %11, %14 : vector<5x4096xf32>
    %c0_13 = arith.constant 0 : index
    %c0_14 = arith.constant 0 : index
    %16 = vector.load %arg3[%c0_13, %c0_14] : memref<5x1xf32, #tpu.memory_space<vmem>>, vector<5x1xf32>
    %17 = vector.broadcast %16 : vector<5x1xf32> to vector<5x4096xf32>
    %18 = arith.addf %15, %17 : vector<5x4096xf32>
    %cst_15 = arith.constant 0.000000e+00 : f32
    %19 = vector.broadcast %cst_15 : f32 to vector<5x4096xf32>
    %20 = arith.maximumf %18, %19 : vector<5x4096xf32>
    %21 = arith.truncf %20 : vector<5x4096xf32> to vector<5x4096xbf16>
    %c0_16 = arith.constant 0 : index
    %c0_17 = arith.constant 0 : index
    %22 = vector.load %arg4[%c0_16, %c0_17] : memref<5x4096xbf16, #tpu.memory_space<vmem>>, vector<5x4096xbf16>
    tpu.vector_store %arg4[%c0_16, %c0_17], %21 {strides = array<i32>} : memref<5x4096xbf16, #tpu.memory_space<vmem>>, vector<5x4096xbf16>,
    return
  }
  func.func @transform_0(%arg0: i32) -> (i32, i32, i32) {
    %c0_i32 = arith.constant 0 : i32
    %c0_i32_0 = arith.constant 0 : i32
    %c0_i32_1 = arith.constant 0 : i32
    return %c0_i32, %c0_i32_0, %arg0 : i32, i32, i32
  }
  func.func @transform_1(%arg0: i32) -> (i32, i32) {
    %c0_i32 = arith.constant 0 : i32
    %c0_i32_0 = arith.constant 0 : i32
    %c0_i32_1 = arith.constant 0 : i32
    return %c0_i32, %c0_i32_0 : i32, i32
  }
  func.func @transform_2(%arg0: i32) -> (i32, i32) {
    %c0_i32 = arith.constant 0 : i32
    %c0_i32_0 = arith.constant 0 : i32
    %c0_i32_1 = arith.constant 0 : i32
    return %c0_i32, %c0_i32_0 : i32, i32
  }
  func.func @transform_3(%arg0: i32) -> (i32, i32) {
    %c0_i32 = arith.constant 0 : i32
    %c0_i32_0 = arith.constant 0 : i32
    return %c0_i32, %arg0 : i32, i32
  }
}

module attributes {stable_mosaic.version = 11 : i64} {
  func.func @conv2_mlp_kernel(%arg0: memref<4x20x512xbf16, #tpu.memory_space<vmem>>, %arg1: memref<2x4xf32, #tpu.memory_space<vmem>>, %arg2: memref<2x512xf32, #tpu.memory_space<vmem>>, %arg3: memref<5x20xbf16, #tpu.memory_space<vmem>>, %arg4: memref<5x1xf32, #tpu.memory_space<vmem>>, %arg5: memref<1280x512xbf16, #tpu.memory_space<vmem>>, %arg6: memref<1x512xf32, #tpu.memory_space<vmem>>, %arg7: memref<512x128xbf16, #tpu.memory_space<vmem>>, %arg8: memref<1x128xf32, #tpu.memory_space<vmem>>, %arg9: memref<4x16xf32, #tpu.memory_space<vmem>>, %arg10: memref<1x16xf32, #tpu.memory_space<vmem>>, %arg11: memref<16x4xf32, #tpu.memory_space<vmem>>, %arg12: memref<1x4xf32, #tpu.memory_space<vmem>>, %arg13: memref<128x32xbf16, #tpu.memory_space<vmem>>, %arg14: memref<4x32xf32, #tpu.memory_space<vmem>>, %arg15: memref<1x32xf32, #tpu.memory_space<vmem>>, %arg16: memref<32x1xf32, #tpu.memory_space<vmem>>, %arg17: memref<1x1xf32, #tpu.memory_space<vmem>>, %arg18: memref<2x1xf32, #tpu.memory_space<vmem>>) attributes {dimension_semantics = [], scalar_prefetch = 0 : i64, scratch_operands = 0 : i64, tpu.core_type = #tpu.core_type<tc>} {
    %c0 = arith.constant 0 : index
    %c0_0 = arith.constant 0 : index
    %0 = vector.load %arg3[%c0, %c0_0] : memref<5x20xbf16, #tpu.memory_space<vmem>>, vector<5x20xbf16>
    %c0_1 = arith.constant 0 : index
    %c0_2 = arith.constant 0 : index
    %c0_3 = arith.constant 0 : index
    %1 = vector.load %arg0[%c0_1, %c0_2, %c0_3] : memref<4x20x512xbf16, #tpu.memory_space<vmem>>, vector<1x20x512xbf16>
    %2 = vector.shape_cast %1 : vector<1x20x512xbf16> to vector<20x512xbf16>
    %cst = arith.constant dense<0.000000e+00> : vector<5x512xf32>
    %3 = tpu.matmul %0, %2, %cst {dimension_numbers = #tpu.dot_dimension_numbers<[1], [0], [0], [1], [0, 0, 1, 1], [], []>} : vector<5x20xbf16>, vector<20x512xbf16>, vector<5x512xf32> -> vector<5x512xf32>
    %c1 = arith.constant 1 : index
    %c0_4 = arith.constant 0 : index
    %c0_5 = arith.constant 0 : index
    %4 = vector.load %arg0[%c1, %c0_4, %c0_5] : memref<4x20x512xbf16, #tpu.memory_space<vmem>>, vector<1x20x512xbf16>
    %5 = vector.shape_cast %4 : vector<1x20x512xbf16> to vector<20x512xbf16>
    %cst_6 = arith.constant dense<0.000000e+00> : vector<5x512xf32>
    %6 = tpu.matmul %0, %5, %cst_6 {dimension_numbers = #tpu.dot_dimension_numbers<[1], [0], [0], [1], [0, 0, 1, 1], [], []>} : vector<5x20xbf16>, vector<20x512xbf16>, vector<5x512xf32> -> vector<5x512xf32>
    %7 = arith.maximumf %3, %6 : vector<5x512xf32>
    %c2 = arith.constant 2 : index
    %c0_7 = arith.constant 0 : index
    %c0_8 = arith.constant 0 : index
    %8 = vector.load %arg0[%c2, %c0_7, %c0_8] : memref<4x20x512xbf16, #tpu.memory_space<vmem>>, vector<1x20x512xbf16>
    %9 = vector.shape_cast %8 : vector<1x20x512xbf16> to vector<20x512xbf16>
    %cst_9 = arith.constant dense<0.000000e+00> : vector<5x512xf32>
    %10 = tpu.matmul %0, %9, %cst_9 {dimension_numbers = #tpu.dot_dimension_numbers<[1], [0], [0], [1], [0, 0, 1, 1], [], []>} : vector<5x20xbf16>, vector<20x512xbf16>, vector<5x512xf32> -> vector<5x512xf32>
    %11 = arith.maximumf %7, %10 : vector<5x512xf32>
    %c3 = arith.constant 3 : index
    %c0_10 = arith.constant 0 : index
    %c0_11 = arith.constant 0 : index
    %12 = vector.load %arg0[%c3, %c0_10, %c0_11] : memref<4x20x512xbf16, #tpu.memory_space<vmem>>, vector<1x20x512xbf16>
    %13 = vector.shape_cast %12 : vector<1x20x512xbf16> to vector<20x512xbf16>
    %cst_12 = arith.constant dense<0.000000e+00> : vector<5x512xf32>
    %14 = tpu.matmul %0, %13, %cst_12 {dimension_numbers = #tpu.dot_dimension_numbers<[1], [0], [0], [1], [0, 0, 1, 1], [], []>} : vector<5x20xbf16>, vector<20x512xbf16>, vector<5x512xf32> -> vector<5x512xf32>
    %15 = arith.maximumf %11, %14 : vector<5x512xf32>
    %c0_13 = arith.constant 0 : index
    %c0_14 = arith.constant 0 : index
    %16 = vector.load %arg4[%c0_13, %c0_14] : memref<5x1xf32, #tpu.memory_space<vmem>>, vector<5x1xf32>
    %17 = vector.broadcast %16 : vector<5x1xf32> to vector<5x512xf32>
    %18 = arith.addf %15, %17 : vector<5x512xf32>
    %cst_15 = arith.constant 0.000000e+00 : f32
    %19 = vector.broadcast %cst_15 : f32 to vector<5x512xf32>
    %20 = arith.maximumf %18, %19 : vector<5x512xf32>
    %21 = vector.extract_strided_slice %20 {offsets = [0, 0], sizes = [1, 256], strides = [1, 1]} : vector<5x512xf32> to vector<1x256xf32>
    %22 = vector.extract_strided_slice %20 {offsets = [1, 0], sizes = [1, 256], strides = [1, 1]} : vector<5x512xf32> to vector<1x256xf32>
    %23 = vector.extract_strided_slice %20 {offsets = [2, 0], sizes = [1, 256], strides = [1, 1]} : vector<5x512xf32> to vector<1x256xf32>
    %24 = vector.extract_strided_slice %20 {offsets = [3, 0], sizes = [1, 256], strides = [1, 1]} : vector<5x512xf32> to vector<1x256xf32>
    %25 = vector.extract_strided_slice %20 {offsets = [4, 0], sizes = [1, 256], strides = [1, 1]} : vector<5x512xf32> to vector<1x256xf32>
    %26 = tpu.concatenate %21, %22, %23, %24, %25 in 1 : vector<1x256xf32>, vector<1x256xf32>, vector<1x256xf32>, vector<1x256xf32>, vector<1x256xf32> -> vector<1x1280xf32>
    %27 = vector.extract_strided_slice %20 {offsets = [0, 256], sizes = [1, 256], strides = [1, 1]} : vector<5x512xf32> to vector<1x256xf32>
    %28 = vector.extract_strided_slice %20 {offsets = [1, 256], sizes = [1, 256], strides = [1, 1]} : vector<5x512xf32> to vector<1x256xf32>
    %29 = vector.extract_strided_slice %20 {offsets = [2, 256], sizes = [1, 256], strides = [1, 1]} : vector<5x512xf32> to vector<1x256xf32>
    %30 = vector.extract_strided_slice %20 {offsets = [3, 256], sizes = [1, 256], strides = [1, 1]} : vector<5x512xf32> to vector<1x256xf32>
    %31 = vector.extract_strided_slice %20 {offsets = [4, 256], sizes = [1, 256], strides = [1, 1]} : vector<5x512xf32> to vector<1x256xf32>
    %32 = tpu.concatenate %27, %28, %29, %30, %31 in 1 : vector<1x256xf32>, vector<1x256xf32>, vector<1x256xf32>, vector<1x256xf32>, vector<1x256xf32> -> vector<1x1280xf32>
    %33 = tpu.concatenate %26, %32 in 0 : vector<1x1280xf32>, vector<1x1280xf32> -> vector<2x1280xf32>
    %34 = arith.truncf %33 : vector<2x1280xf32> to vector<2x1280xbf16>
    %c0_16 = arith.constant 0 : index
    %c0_17 = arith.constant 0 : index
    %35 = vector.load %arg5[%c0_16, %c0_17] : memref<1280x512xbf16, #tpu.memory_space<vmem>>, vector<1280x512xbf16>
    %cst_18 = arith.constant dense<0.000000e+00> : vector<2x512xf32>
    %36 = tpu.matmul %34, %35, %cst_18 {dimension_numbers = #tpu.dot_dimension_numbers<[1], [0], [0], [1], [0, 0, 1, 1], [], []>} : vector<2x1280xbf16>, vector<1280x512xbf16>, vector<2x512xf32> -> vector<2x512xf32>
    %c0_19 = arith.constant 0 : index
    %c0_20 = arith.constant 0 : index
    %37 = vector.load %arg6[%c0_19, %c0_20] : memref<1x512xf32, #tpu.memory_space<vmem>>, vector<1x512xf32>
    %38 = vector.broadcast %37 : vector<1x512xf32> to vector<2x512xf32>
    %39 = arith.addf %36, %38 : vector<2x512xf32>
    %cst_21 = arith.constant 0.000000e+00 : f32
    %40 = vector.broadcast %cst_21 : f32 to vector<2x512xf32>
    %41 = arith.maximumf %39, %40 : vector<2x512xf32>
    %c0_22 = arith.constant 0 : index
    %c0_23 = arith.constant 0 : index
    %42 = vector.load %arg2[%c0_22, %c0_23] : memref<2x512xf32, #tpu.memory_space<vmem>>, vector<2x512xf32>
    %cst_24 = arith.constant 3.000000e-01 : f32
    %43 = vector.broadcast %cst_24 : f32 to vector<2x512xf32>
    %44 = arith.cmpf oge, %42, %43 : vector<2x512xf32>
    %cst_25 = arith.constant 1.42857146 : f32
    %45 = vector.broadcast %cst_25 : f32 to vector<2x512xf32>
    %46 = arith.mulf %41, %45 : vector<2x512xf32>
    %cst_26 = arith.constant 0.000000e+00 : f32
    %47 = vector.broadcast %cst_26 : f32 to vector<2x512xf32>
    %48 = arith.select %44, %46, %47 : vector<2x512xi1>, vector<2x512xf32>
    %49 = arith.truncf %48 : vector<2x512xf32> to vector<2x512xbf16>
    %c0_27 = arith.constant 0 : index
    %c0_28 = arith.constant 0 : index
    %50 = vector.load %arg7[%c0_27, %c0_28] : memref<512x128xbf16, #tpu.memory_space<vmem>>, vector<512x128xbf16>
    %cst_29 = arith.constant dense<0.000000e+00> : vector<2x128xf32>
    %51 = tpu.matmul %49, %50, %cst_29 {dimension_numbers = #tpu.dot_dimension_numbers<[1], [0], [0], [1], [0, 0, 1, 1], [], []>} : vector<2x512xbf16>, vector<512x128xbf16>, vector<2x128xf32> -> vector<2x128xf32>
    %c0_30 = arith.constant 0 : index
    %c0_31 = arith.constant 0 : index
    %52 = vector.load %arg8[%c0_30, %c0_31] : memref<1x128xf32, #tpu.memory_space<vmem>>, vector<1x128xf32>
    %53 = vector.broadcast %52 : vector<1x128xf32> to vector<2x128xf32>
    %54 = arith.addf %51, %53 : vector<2x128xf32>
    %cst_32 = arith.constant 0.000000e+00 : f32
    %55 = vector.broadcast %cst_32 : f32 to vector<2x128xf32>
    %56 = arith.maximumf %54, %55 : vector<2x128xf32>
    %c0_33 = arith.constant 0 : index
    %c0_34 = arith.constant 0 : index
    %57 = vector.load %arg1[%c0_33, %c0_34] : memref<2x4xf32, #tpu.memory_space<vmem>>, vector<2x4xf32>
    %c0_35 = arith.constant 0 : index
    %c0_36 = arith.constant 0 : index
    %58 = vector.load %arg9[%c0_35, %c0_36] : memref<4x16xf32, #tpu.memory_space<vmem>>, vector<4x16xf32>
    %cst_37 = arith.constant dense<0.000000e+00> : vector<2x16xf32>
    %59 = tpu.matmul %57, %58, %cst_37 {dimension_numbers = #tpu.dot_dimension_numbers<[1], [0], [0], [1], [0, 0, 1, 1], [], []>} : vector<2x4xf32>, vector<4x16xf32>, vector<2x16xf32> -> vector<2x16xf32>
    %c0_38 = arith.constant 0 : index
    %c0_39 = arith.constant 0 : index
    %60 = vector.load %arg10[%c0_38, %c0_39] : memref<1x16xf32, #tpu.memory_space<vmem>>, vector<1x16xf32>
    %61 = vector.broadcast %60 : vector<1x16xf32> to vector<2x16xf32>
    %62 = arith.addf %59, %61 : vector<2x16xf32>
    %cst_40 = arith.constant 0.000000e+00 : f32
    %63 = vector.broadcast %cst_40 : f32 to vector<2x16xf32>
    %64 = arith.maximumf %62, %63 : vector<2x16xf32>
    %c0_41 = arith.constant 0 : index
    %c0_42 = arith.constant 0 : index
    %65 = vector.load %arg11[%c0_41, %c0_42] : memref<16x4xf32, #tpu.memory_space<vmem>>, vector<16x4xf32>
    %cst_43 = arith.constant dense<0.000000e+00> : vector<2x4xf32>
    %66 = tpu.matmul %64, %65, %cst_43 {dimension_numbers = #tpu.dot_dimension_numbers<[1], [0], [0], [1], [0, 0, 1, 1], [], []>} : vector<2x16xf32>, vector<16x4xf32>, vector<2x4xf32> -> vector<2x4xf32>
    %c0_44 = arith.constant 0 : index
    %c0_45 = arith.constant 0 : index
    %67 = vector.load %arg12[%c0_44, %c0_45] : memref<1x4xf32, #tpu.memory_space<vmem>>, vector<1x4xf32>
    %68 = vector.broadcast %67 : vector<1x4xf32> to vector<2x4xf32>
    %69 = arith.addf %66, %68 : vector<2x4xf32>
    %cst_46 = arith.constant 0.000000e+00 : f32
    %70 = vector.broadcast %cst_46 : f32 to vector<2x4xf32>
    %71 = arith.maximumf %69, %70 : vector<2x4xf32>
    %72 = arith.truncf %56 : vector<2x128xf32> to vector<2x128xbf16>
    %c0_47 = arith.constant 0 : index
    %c0_48 = arith.constant 0 : index
    %73 = vector.load %arg13[%c0_47, %c0_48] : memref<128x32xbf16, #tpu.memory_space<vmem>>, vector<128x32xbf16>
    %cst_49 = arith.constant dense<0.000000e+00> : vector<2x32xf32>
    %74 = tpu.matmul %72, %73, %cst_49 {dimension_numbers = #tpu.dot_dimension_numbers<[1], [0], [0], [1], [0, 0, 1, 1], [], []>} : vector<2x128xbf16>, vector<128x32xbf16>, vector<2x32xf32> -> vector<2x32xf32>
    %c0_50 = arith.constant 0 : index
    %c0_51 = arith.constant 0 : index
    %75 = vector.load %arg14[%c0_50, %c0_51] : memref<4x32xf32, #tpu.memory_space<vmem>>, vector<4x32xf32>
    %cst_52 = arith.constant dense<0.000000e+00> : vector<2x32xf32>
    %76 = tpu.matmul %71, %75, %cst_52 {dimension_numbers = #tpu.dot_dimension_numbers<[1], [0], [0], [1], [0, 0, 1, 1], [], []>} : vector<2x4xf32>, vector<4x32xf32>, vector<2x32xf32> -> vector<2x32xf32>
    %77 = arith.addf %74, %76 : vector<2x32xf32>
    %c0_53 = arith.constant 0 : index
    %c0_54 = arith.constant 0 : index
    %78 = vector.load %arg15[%c0_53, %c0_54] : memref<1x32xf32, #tpu.memory_space<vmem>>, vector<1x32xf32>
    %79 = vector.broadcast %78 : vector<1x32xf32> to vector<2x32xf32>
    %80 = arith.addf %77, %79 : vector<2x32xf32>
    %cst_55 = arith.constant 0.000000e+00 : f32
    %81 = vector.broadcast %cst_55 : f32 to vector<2x32xf32>
    %82 = arith.maximumf %80, %81 : vector<2x32xf32>
    %c0_56 = arith.constant 0 : index
    %c0_57 = arith.constant 0 : index
    %83 = vector.load %arg16[%c0_56, %c0_57] : memref<32x1xf32, #tpu.memory_space<vmem>>, vector<32x1xf32>
    %cst_58 = arith.constant dense<0.000000e+00> : vector<2x1xf32>
    %84 = tpu.matmul %82, %83, %cst_58 {dimension_numbers = #tpu.dot_dimension_numbers<[1], [0], [0], [1], [0, 0, 1, 1], [], []>} : vector<2x32xf32>, vector<32x1xf32>, vector<2x1xf32> -> vector<2x1xf32>
    %c0_59 = arith.constant 0 : index
    %c0_60 = arith.constant 0 : index
    %85 = vector.load %arg17[%c0_59, %c0_60] : memref<1x1xf32, #tpu.memory_space<vmem>>, vector<1x1xf32>
    %86 = vector.broadcast %85 : vector<1x1xf32> to vector<2x1xf32>
    %87 = arith.addf %84, %86 : vector<2x1xf32>
    %c0_61 = arith.constant 0 : index
    %c0_62 = arith.constant 0 : index
    %88 = vector.load %arg18[%c0_61, %c0_62] : memref<2x1xf32, #tpu.memory_space<vmem>>, vector<2x1xf32>
    tpu.vector_store %arg18[%c0_61, %c0_62], %87 {strides = array<i32>} : memref<2x1xf32, #tpu.memory_space<vmem>>, vector<2x1xf32>,
    return
  }
}

</mosaic_0001>

<bundles_post_ra>
// kernel: tshn_forward.2
= control target key start
LH: loop header
LB: loop body
LE: loop exit
PB: predicated region body
PF: predicated region fallthrough
CT: control target
= control target key end

     0   :  { %s5930_s12 = smov 0   ;;  %s5932_s13 = smov 0   ;;  %s7389_s0 = inlined_call_operand.vmem [shape: bf16[4,20,8192], index: 0, kind: input, shape index: {}]   ;;  %s7390_s1 = inlined_call_operand.vmem [shape: bf16[5,20], index: 1, kind: input, shape index: {}]   ;;  %s7391_s2 = inlined_call_operand.vmem [shape: f32[5,1], index: 2, kind: input, shape index: {}]   ;;  %s7392_s3 = inlined_call_operand.vmem [shape: bf16[5,8192], index: 3, kind: output, shape index: {}]  }
   0x1   :  { %s5934_s14 = smov 0  }
   0x2 LB: > { %s5156_s15 = sadd.s32 4294967295, %s5907_s14   ;;  %s5947_s16 = sadd.s32 1, %s5907_s14   ;;  %s5907_s14 = sphi %s5934_s14, %s7467_s14   ;;  %s5903_s13 = sphi %s5932_s13, %s7466_s13   ;;  %s5899_s12 = sphi %s5930_s12, %s7465_s12  }
   0x3   : > { %s17_s17 = ssub.s32 %s5907_s14, %s5947_s16  ;;  %s20_s18 = sadd.s32 1, %s5903_s13 }
   0x4   : > { %p18_p0 = scmp.eq.s32.totalorder %s17_s17, 0  ;;  %p27_p1 = scmp.ne.s32.totalorder %s5903_s13, %s5899_s12 }
   0x5   : > { %p28_p2 = scmp.eq.s32.totalorder %s5907_s14, 0  ;;  %p5159_p4 = scmp.ge.s32.totalorder %s5907_s14, 2 }
   0x6   : > { %s5956_s19 = scalar_select %p18_p0, %s5903_s13, %s20_s18  }
   0x7   : > { %p29_p3 = por %p28_p2, %p27_p1  ;;  %127 = sbr.rel (%p5159_p4) target bundleno = 115 (0x73), region = 24 }
   0xe   : > { %130 = sbr.rel (!%p29_p3) target bundleno = 115 (0x73), region = 28  ;;  %s132_s20 = sand.u32 (%p29_p3), 1, %s5903_s13  }
   0xf   : > { %s5711_s21 = sshll.u32 (%p29_p3), %s5907_s14, 7  ;;  %s5728_s22 = smul.u32 (%p29_p3), 1536, %s132_s20 }
  0x10   : > { %s5964_s25 = scalar_lea.vmem (%p29_p3), %s7389_s0, %s5711_s21 }
  0x11   : > { %v150_v0 = vld [vmem:[%s5964_s25] sm:$0xff] (%p29_p3)  ;;  %v152_v1 = vld [vmem:[%s5964_s25 + $0x8] sm:$0xff] (%p29_p3)  ;;  %v154_v2 = vld [vmem:[%s5964_s25 + $0x10] sm:$0xff] (%p29_p3)  ;;  %s5972_s26 = scalar_lea.vmem (%p29_p3), [#allocation2], %s5728_s22 }
  0x12   : > { %v156_v3 = vld [vmem:[%s5964_s25 + $0x18] sm:$0xff] (%p29_p3)  ;;  %v158_v4 = vld [vmem:[%s5964_s25 + $0x20] sm:$0xff] (%p29_p3)  ;;  %v160_v5 = vld [vmem:[%s5964_s25 + $0x28] sm:$0xff] (%p29_p3)  ;;  %151 = vst [vmem:[%s5972_s26] sm:$0xff] (%p29_p3), %v150_v0 }
  0x13   : > { %153 = vst [vmem:[%s5972_s26 + $0x8] sm:$0xff] (%p29_p3), %v152_v1  ;;  %155 = vst [vmem:[%s5972_s26 + $0x10] sm:$0xff] (%p29_p3), %v154_v2  ;;  %v162_v6 = vld [vmem:[%s5964_s25 + $0x30] sm:$0xff] (%p29_p3)  ;;  %v164_v7 = vld [vmem:[%s5964_s25 + $0x38] sm:$0xff] (%p29_p3) }
  0x14   : > { %157 = vst [vmem:[%s5972_s26 + $0x18] sm:$0xff] (%p29_p3), %v156_v3  ;;  %159 = vst [vmem:[%s5972_s26 + $0x20] sm:$0xff] (%p29_p3), %v158_v4  ;;  %v166_v8 = vld [vmem:[%s5964_s25 + $0x40] sm:$0xff] (%p29_p3)  ;;  %v168_v9 = vld [vmem:[%s5964_s25 + $0x48] sm:$0xff] (%p29_p3) }
  0x15   : > { %161 = vst [vmem:[%s5972_s26 + $0x28] sm:$0xff] %v160_v5  ;;  %163 = vst [vmem:[%s5972_s26 + $0x30] sm:$0xff] %v162_v6  ;;  %v170_v10 = vld [vmem:[%s5964_s25 + $0x50] sm:$0xff]  ;;  %v172_v11 = vld [vmem:[%s5964_s25 + $0x58] sm:$0xff] }
  0x16   : > { %165 = vst [vmem:[%s5972_s26 + $0x38] sm:$0xff] %v164_v7  ;;  %167 = vst [vmem:[%s5972_s26 + $0x40] sm:$0xff] %v166_v8  ;;  %v174_v12 = vld [vmem:[%s5964_s25 + $0x60] sm:$0xff]  ;;  %v176_v13 = vld [vmem:[%s5964_s25 + $0x68] sm:$0xff] }
  0x17   : > { %169 = vst [vmem:[%s5972_s26 + $0x48] sm:$0xff] %v168_v9  ;;  %171 = vst [vmem:[%s5972_s26 + $0x50] sm:$0xff] %v170_v10  ;;  %v178_v14 = vld [vmem:[%s5964_s25 + $0x70] sm:$0xff]  ;;  %v180_v15 = vld [vmem:[%s5964_s25 + $0x78] sm:$0xff] }
  0x18   : > { %173 = vst [vmem:[%s5972_s26 + $0x58] sm:$0xff] %v172_v11  ;;  %175 = vst [vmem:[%s5972_s26 + $0x60] sm:$0xff] %v174_v12  ;;  %v182_v16 = vld [vmem:[%s5964_s25 + $0x100] sm:$0xff]  ;;  %v184_v17 = vld [vmem:[%s5964_s25 + $0x108] sm:$0xff] }
  0x19   : > { %177 = vst [vmem:[%s5972_s26 + $0x68] sm:$0xff] %v176_v13  ;;  %179 = vst [vmem:[%s5972_s26 + $0x70] sm:$0xff] %v178_v14  ;;  %v186_v18 = vld [vmem:[%s5964_s25 + $0x110] sm:$0xff]  ;;  %v188_v19 = vld [vmem:[%s5964_s25 + $0x118] sm:$0xff] }
  0x1a   : > { %181 = vst [vmem:[%s5972_s26 + $0x78] sm:$0xff] %v180_v15  ;;  %183 = vst [vmem:[%s5972_s26 + $0x80] sm:$0xff] %v182_v16  ;;  %v190_v20 = vld [vmem:[%s5964_s25 + $0x120] sm:$0xff]  ;;  %v192_v21 = vld [vmem:[%s5964_s25 + $0x128] sm:$0xff] }
  0x1b   : > { %185 = vst [vmem:[%s5972_s26 + $0x88] sm:$0xff] %v184_v17  ;;  %187 = vst [vmem:[%s5972_s26 + $0x90] sm:$0xff] %v186_v18  ;;  %v194_v22 = vld [vmem:[%s5964_s25 + $0x130] sm:$0xff]  ;;  %v196_v23 = vld [vmem:[%s5964_s25 + $0x138] sm:$0xff] }
  0x1c   : > { %189 = vst [vmem:[%s5972_s26 + $0x98] sm:$0xff] %v188_v19  ;;  %191 = vst [vmem:[%s5972_s26 + $0xa0] sm:$0xff] %v190_v20  ;;  %v198_v24 = vld [vmem:[%s5964_s25 + $0x140] sm:$0xff]  ;;  %v200_v25 = vld [vmem:[%s5964_s25 + $0x148] sm:$0xff] }
  0x1d   : > { %193 = vst [vmem:[%s5972_s26 + $0xa8] sm:$0xff] %v192_v21  ;;  %195 = vst [vmem:[%s5972_s26 + $0xb0] sm:$0xff] %v194_v22  ;;  %v202_v26 = vld [vmem:[%s5964_s25 + $0x150] sm:$0xff]  ;;  %v204_v27 = vld [vmem:[%s5964_s25 + $0x158] sm:$0xff] }
  0x1e   : > { %197 = vst [vmem:[%s5972_s26 + $0xb8] sm:$0xff] %v196_v23  ;;  %199 = vst [vmem:[%s5972_s26 + $0xc0] sm:$0xff] %v198_v24  ;;  %v206_v28 = vld [vmem:[%s5964_s25 + $0x160] sm:$0xff]  ;;  %v208_v29 = vld [vmem:[%s5964_s25 + $0x168] sm:$0xff] }
  0x1f   : > { %201 = vst [vmem:[%s5972_s26 + $0xc8] sm:$0xff] %v200_v25  ;;  %203 = vst [vmem:[%s5972_s26 + $0xd0] sm:$0xff] %v202_v26  ;;  %v210_v30 = vld [vmem:[%s5964_s25 + $0x170] sm:$0xff]  ;;  %v212_v31 = vld [vmem:[%s5964_s25 + $0x178] sm:$0xff] }
  0x20   : > { %205 = vst [vmem:[%s5972_s26 + $0xd8] sm:$0xff] %v204_v27  ;;  %207 = vst [vmem:[%s5972_s26 + $0xe0] sm:$0xff] %v206_v28  ;;  %v214_v32 = vld [vmem:[%s5964_s25 + $0x200] sm:$0xff]  ;;  %v216_v33 = vld [vmem:[%s5964_s25 + $0x208] sm:$0xff] }
  0x21   : > { %209 = vst [vmem:[%s5972_s26 + $0xe8] sm:$0xff] %v208_v29  ;;  %211 = vst [vmem:[%s5972_s26 + $0xf0] sm:$0xff] %v210_v30  ;;  %v218_v34 = vld [vmem:[%s5964_s25 + $0x210] sm:$0xff]  ;;  %v220_v35 = vld [vmem:[%s5964_s25 + $0x218] sm:$0xff] }
  0x22   : > { %213 = vst [vmem:[%s5972_s26 + $0xf8] sm:$0xff] %v212_v31  ;;  %215 = vst [vmem:[%s5972_s26 + $0x100] sm:$0xff] %v214_v32  ;;  %v222_v36 = vld [vmem:[%s5964_s25 + $0x220] sm:$0xff]  ;;  %v224_v37 = vld [vmem:[%s5964_s25 + $0x228] sm:$0xff] }
  0x23   : > { %217 = vst [vmem:[%s5972_s26 + $0x108] sm:$0xff] %v216_v33  ;;  %219 = vst [vmem:[%s5972_s26 + $0x110] sm:$0xff] %v218_v34  ;;  %v226_v38 = vld [vmem:[%s5964_s25 + $0x230] sm:$0xff]  ;;  %v228_v39 = vld [vmem:[%s5964_s25 + $0x238] sm:$0xff] }
  0x24   : > { %221 = vst [vmem:[%s5972_s26 + $0x118] sm:$0xff] %v220_v35  ;;  %223 = vst [vmem:[%s5972_s26 + $0x120] sm:$0xff] %v222_v36  ;;  %v230_v40 = vld [vmem:[%s5964_s25 + $0x240] sm:$0xff]  ;;  %v232_v41 = vld [vmem:[%s5964_s25 + $0x248] sm:$0xff] }
  0x25   : > { %225 = vst [vmem:[%s5972_s26 + $0x128] sm:$0xff] %v224_v37  ;;  %227 = vst [vmem:[%s5972_s26 + $0x130] sm:$0xff] %v226_v38  ;;  %v234_v42 = vld [vmem:[%s5964_s25 + $0x250] sm:$0xff]  ;;  %v236_v43 = vld [vmem:[%s5964_s25 + $0x258] sm:$0xff] }
  0x26   : > { %229 = vst [vmem:[%s5972_s26 + $0x138] sm:$0xff] %v228_v39  ;;  %231 = vst [vmem:[%s5972_s26 + $0x140] sm:$0xff] %v230_v40  ;;  %v238_v44 = vld [vmem:[%s5964_s25 + $0x260] sm:$0xff]  ;;  %v240_v45 = vld [vmem:[%s5964_s25 + $0x268] sm:$0xff] }
  0x27   : > { %233 = vst [vmem:[%s5972_s26 + $0x148] sm:$0xff] %v232_v41  ;;  %235 = vst [vmem:[%s5972_s26 + $0x150] sm:$0xff] %v234_v42  ;;  %v242_v46 = vld [vmem:[%s5964_s25 + $0x270] sm:$0xff]  ;;  %v244_v47 = vld [vmem:[%s5964_s25 + $0x278] sm:$0xff] }
  0x28   : > { %237 = vst [vmem:[%s5972_s26 + $0x158] sm:$0xff] %v236_v43  ;;  %239 = vst [vmem:[%s5972_s26 + $0x160] sm:$0xff] %v238_v44  ;;  %v246_v48 = vld [vmem:[%s5964_s25 + $0x300] sm:$0xff]  ;;  %v248_v49 = vld [vmem:[%s5964_s25 + $0x308] sm:$0xff] }
  0x29   : > { %241 = vst [vmem:[%s5972_s26 + $0x168] sm:$0xff] %v240_v45  ;;  %243 = vst [vmem:[%s5972_s26 + $0x170] sm:$0xff] %v242_v46  ;;  %v250_v50 = vld [vmem:[%s5964_s25 + $0x310] sm:$0xff]  ;;  %v252_v51 = vld [vmem:[%s5964_s25 + $0x318] sm:$0xff] }
  0x2a   : > { %245 = vst [vmem:[%s5972_s26 + $0x178] sm:$0xff] %v244_v47  ;;  %247 = vst [vmem:[%s5972_s26 + $0x180] sm:$0xff] %v246_v48  ;;  %v254_v52 = vld [vmem:[%s5964_s25 + $0x320] sm:$0xff]  ;;  %v256_v53 = vld [vmem:[%s5964_s25 + $0x328] sm:$0xff] }
  0x2b   : > { %249 = vst [vmem:[%s5972_s26 + $0x188] sm:$0xff] %v248_v49  ;;  %251 = vst [vmem:[%s5972_s26 + $0x190] sm:$0xff] %v250_v50  ;;  %v258_v54 = vld [vmem:[%s5964_s25 + $0x330] sm:$0xff]  ;;  %v260_v55 = vld [vmem:[%s5964_s25 + $0x338] sm:$0xff] }
  0x2c   : > { %253 = vst [vmem:[%s5972_s26 + $0x198] sm:$0xff] %v252_v51  ;;  %255 = vst [vmem:[%s5972_s26 + $0x1a0] sm:$0xff] %v254_v52  ;;  %v262_v56 = vld [vmem:[%s5964_s25 + $0x340] sm:$0xff]  ;;  %v264_v57 = vld [vmem:[%s5964_s25 + $0x348] sm:$0xff] }
  0x2d   : > { %257 = vst [vmem:[%s5972_s26 + $0x1a8] sm:$0xff] %v256_v53  ;;  %259 = vst [vmem:[%s5972_s26 + $0x1b0] sm:$0xff] %v258_v54  ;;  %v266_v58 = vld [vmem:[%s5964_s25 + $0x350] sm:$0xff]  ;;  %v268_v59 = vld [vmem:[%s5964_s25 + $0x358] sm:$0xff] }
  0x2e   : > { %261 = vst [vmem:[%s5972_s26 + $0x1b8] sm:$0xff] %v260_v55  ;;  %263 = vst [vmem:[%s5972_s26 + $0x1c0] sm:$0xff] %v262_v56  ;;  %v270_v60 = vld [vmem:[%s5964_s25 + $0x360] sm:$0xff]  ;;  %v272_v61 = vld [vmem:[%s5964_s25 + $0x368] sm:$0xff] }
  0x2f   : > { %265 = vst [vmem:[%s5972_s26 + $0x1c8] sm:$0xff] %v264_v57  ;;  %267 = vst [vmem:[%s5972_s26 + $0x1d0] sm:$0xff] %v266_v58  ;;  %v274_v62 = vld [vmem:[%s5964_s25 + $0x370] sm:$0xff]  ;;  %v276_v63 = vld [vmem:[%s5964_s25 + $0x378] sm:$0xff] }
  0x30   : > { %269 = vst [vmem:[%s5972_s26 + $0x1d8] sm:$0xff] %v268_v59  ;;  %271 = vst [vmem:[%s5972_s26 + $0x1e0] sm:$0xff] %v270_v60  ;;  %v278_v0 = vld [vmem:[%s5964_s25 + $0x400] sm:$0xff]  ;;  %v280_v1 = vld [vmem:[%s5964_s25 + $0x408] sm:$0xff] }
  0x31   : > { %273 = vst [vmem:[%s5972_s26 + $0x1e8] sm:$0xff] %v272_v61  ;;  %275 = vst [vmem:[%s5972_s26 + $0x1f0] sm:$0xff] %v274_v62  ;;  %v282_v2 = vld [vmem:[%s5964_s25 + $0x410] sm:$0xff]  ;;  %v284_v3 = vld [vmem:[%s5964_s25 + $0x418] sm:$0xff] }
  0x32   : > { %277 = vst [vmem:[%s5972_s26 + $0x1f8] sm:$0xff] %v276_v63  ;;  %279 = vst [vmem:[%s5972_s26 + $0x200] sm:$0xff] %v278_v0  ;;  %v286_v4 = vld [vmem:[%s5964_s25 + $0x420] sm:$0xff]  ;;  %v288_v5 = vld [vmem:[%s5964_s25 + $0x428] sm:$0xff] }
  0x33   : > { %281 = vst [vmem:[%s5972_s26 + $0x208] sm:$0xff] %v280_v1  ;;  %283 = vst [vmem:[%s5972_s26 + $0x210] sm:$0xff] %v282_v2  ;;  %v290_v6 = vld [vmem:[%s5964_s25 + $0x430] sm:$0xff]  ;;  %v292_v7 = vld [vmem:[%s5964_s25 + $0x438] sm:$0xff] }
  0x34   : > { %285 = vst [vmem:[%s5972_s26 + $0x218] sm:$0xff] %v284_v3  ;;  %287 = vst [vmem:[%s5972_s26 + $0x220] sm:$0xff] %v286_v4  ;;  %v294_v8 = vld [vmem:[%s5964_s25 + $0x440] sm:$0xff]  ;;  %v296_v9 = vld [vmem:[%s5964_s25 + $0x448] sm:$0xff] }
  0x35   : > { %289 = vst [vmem:[%s5972_s26 + $0x228] sm:$0xff] %v288_v5  ;;  %291 = vst [vmem:[%s5972_s26 + $0x230] sm:$0xff] %v290_v6  ;;  %v298_v10 = vld [vmem:[%s5964_s25 + $0x450] sm:$0xff]  ;;  %v300_v11 = vld [vmem:[%s5964_s25 + $0x458] sm:$0xff] }
  0x36   : > { %293 = vst [vmem:[%s5972_s26 + $0x238] sm:$0xff] %v292_v7  ;;  %295 = vst [vmem:[%s5972_s26 + $0x240] sm:$0xff] %v294_v8  ;;  %v302_v12 = vld [vmem:[%s5964_s25 + $0x460] sm:$0xff]  ;;  %v304_v13 = vld [vmem:[%s5964_s25 + $0x468] sm:$0xff] }
  0x37   : > { %297 = vst [vmem:[%s5972_s26 + $0x248] sm:$0xff] %v296_v9  ;;  %299 = vst [vmem:[%s5972_s26 + $0x250] sm:$0xff] %v298_v10  ;;  %v306_v14 = vld [vmem:[%s5964_s25 + $0x470] sm:$0xff]  ;;  %v308_v15 = vld [vmem:[%s5964_s25 + $0x478] sm:$0xff] }
  0x38   : > { %301 = vst [vmem:[%s5972_s26 + $0x258] sm:$0xff] %v300_v11  ;;  %303 = vst [vmem:[%s5972_s26 + $0x260] sm:$0xff] %v302_v12  ;;  %v310_v16 = vld [vmem:[%s5964_s25 + $0x500] sm:$0xff]  ;;  %v312_v17 = vld [vmem:[%s5964_s25 + $0x508] sm:$0xff] }
  0x39   : > { %305 = vst [vmem:[%s5972_s26 + $0x268] sm:$0xff] %v304_v13  ;;  %307 = vst [vmem:[%s5972_s26 + $0x270] sm:$0xff] %v306_v14  ;;  %v314_v18 = vld [vmem:[%s5964_s25 + $0x510] sm:$0xff]  ;;  %v316_v19 = vld [vmem:[%s5964_s25 + $0x518] sm:$0xff] }
  0x3a   : > { %309 = vst [vmem:[%s5972_s26 + $0x278] sm:$0xff] %v308_v15  ;;  %311 = vst [vmem:[%s5972_s26 + $0x280] sm:$0xff] %v310_v16  ;;  %v318_v20 = vld [vmem:[%s5964_s25 + $0x520] sm:$0xff]  ;;  %v320_v21 = vld [vmem:[%s5964_s25 + $0x528] sm:$0xff] }
  0x3b   : > { %313 = vst [vmem:[%s5972_s26 + $0x288] sm:$0xff] %v312_v17  ;;  %315 = vst [vmem:[%s5972_s26 + $0x290] sm:$0xff] %v314_v18  ;;  %v322_v22 = vld [vmem:[%s5964_s25 + $0x530] sm:$0xff]  ;;  %v324_v23 = vld [vmem:[%s5964_s25 + $0x538] sm:$0xff] }
  0x3c   : > { %317 = vst [vmem:[%s5972_s26 + $0x298] sm:$0xff] %v316_v19  ;;  %319 = vst [vmem:[%s5972_s26 + $0x2a0] sm:$0xff] %v318_v20  ;;  %v326_v24 = vld [vmem:[%s5964_s25 + $0x540] sm:$0xff]  ;;  %v328_v25 = vld [vmem:[%s5964_s25 + $0x548] sm:$0xff] }
  0x3d   : > { %321 = vst [vmem:[%s5972_s26 + $0x2a8] sm:$0xff] %v320_v21  ;;  %323 = vst [vmem:[%s5972_s26 + $0x2b0] sm:$0xff] %v322_v22  ;;  %v330_v26 = vld [vmem:[%s5964_s25 + $0x550] sm:$0xff]  ;;  %v332_v27 = vld [vmem:[%s5964_s25 + $0x558] sm:$0xff] }
  0x3e   : > { %325 = vst [vmem:[%s5972_s26 + $0x2b8] sm:$0xff] %v324_v23  ;;  %327 = vst [vmem:[%s5972_s26 + $0x2c0] sm:$0xff] %v326_v24  ;;  %v334_v28 = vld [vmem:[%s5964_s25 + $0x560] sm:$0xff]  ;;  %v336_v29 = vld [vmem:[%s5964_s25 + $0x568] sm:$0xff] }
  0x3f   : > { %329 = vst [vmem:[%s5972_s26 + $0x2c8] sm:$0xff] %v328_v25  ;;  %331 = vst [vmem:[%s5972_s26 + $0x2d0] sm:$0xff] %v330_v26  ;;  %v338_v30 = vld [vmem:[%s5964_s25 + $0x570] sm:$0xff]  ;;  %v340_v31 = vld [vmem:[%s5964_s25 + $0x578] sm:$0xff] }
  0x40   : > { %333 = vst [vmem:[%s5972_s26 + $0x2d8] sm:$0xff] %v332_v27  ;;  %335 = vst [vmem:[%s5972_s26 + $0x2e0] sm:$0xff] %v334_v28  ;;  %v342_v32 = vld [vmem:[%s5964_s25 + $0x600] sm:$0xff]  ;;  %v344_v33 = vld [vmem:[%s5964_s25 + $0x608] sm:$0xff] }
  0x41   : > { %337 = vst [vmem:[%s5972_s26 + $0x2e8] sm:$0xff] %v336_v29  ;;  %339 = vst [vmem:[%s5972_s26 + $0x2f0] sm:$0xff] %v338_v30  ;;  %v346_v34 = vld [vmem:[%s5964_s25 + $0x610] sm:$0xff]  ;;  %v348_v35 = vld [vmem:[%s5964_s25 + $0x618] sm:$0xff] }
  0x42   : > { %341 = vst [vmem:[%s5972_s26 + $0x2f8] sm:$0xff] %v340_v31  ;;  %343 = vst [vmem:[%s5972_s26 + $0x300] sm:$0xff] %v342_v32  ;;  %v350_v36 = vld [vmem:[%s5964_s25 + $0x620] sm:$0xff]  ;;  %v352_v37 = vld [vmem:[%s5964_s25 + $0x628] sm:$0xff] }
  0x43   : > { %345 = vst [vmem:[%s5972_s26 + $0x308] sm:$0xff] %v344_v33  ;;  %347 = vst [vmem:[%s5972_s26 + $0x310] sm:$0xff] %v346_v34  ;;  %v354_v38 = vld [vmem:[%s5964_s25 + $0x630] sm:$0xff]  ;;  %v356_v39 = vld [vmem:[%s5964_s25 + $0x638] sm:$0xff] }
  0x44   : > { %349 = vst [vmem:[%s5972_s26 + $0x318] sm:$0xff] %v348_v35  ;;  %351 = vst [vmem:[%s5972_s26 + $0x320] sm:$0xff] %v350_v36  ;;  %v358_v40 = vld [vmem:[%s5964_s25 + $0x640] sm:$0xff]  ;;  %v360_v41 = vld [vmem:[%s5964_s25 + $0x648] sm:$0xff] }
  0x45   : > { %353 = vst [vmem:[%s5972_s26 + $0x328] sm:$0xff] %v352_v37  ;;  %355 = vst [vmem:[%s5972_s26 + $0x330] sm:$0xff] %v354_v38  ;;  %v362_v42 = vld [vmem:[%s5964_s25 + $0x650] sm:$0xff]  ;;  %v364_v43 = vld [vmem:[%s5964_s25 + $0x658] sm:$0xff] }
  0x46   : > { %357 = vst [vmem:[%s5972_s26 + $0x338] sm:$0xff] %v356_v39  ;;  %359 = vst [vmem:[%s5972_s26 + $0x340] sm:$0xff] %v358_v40  ;;  %v366_v44 = vld [vmem:[%s5964_s25 + $0x660] sm:$0xff]  ;;  %v368_v45 = vld [vmem:[%s5964_s25 + $0x668] sm:$0xff] }
  0x47   : > { %361 = vst [vmem:[%s5972_s26 + $0x348] sm:$0xff] %v360_v41  ;;  %363 = vst [vmem:[%s5972_s26 + $0x350] sm:$0xff] %v362_v42  ;;  %v370_v46 = vld [vmem:[%s5964_s25 + $0x670] sm:$0xff]  ;;  %v372_v47 = vld [vmem:[%s5964_s25 + $0x678] sm:$0xff] }
  0x48   : > { %365 = vst [vmem:[%s5972_s26 + $0x358] sm:$0xff] %v364_v43  ;;  %367 = vst [vmem:[%s5972_s26 + $0x360] sm:$0xff] %v366_v44  ;;  %v374_v48 = vld [vmem:[%s5964_s25 + $0x700] sm:$0xff]  ;;  %v376_v49 = vld [vmem:[%s5964_s25 + $0x708] sm:$0xff] }
  0x49   : > { %369 = vst [vmem:[%s5972_s26 + $0x368] sm:$0xff] %v368_v45  ;;  %371 = vst [vmem:[%s5972_s26 + $0x370] sm:$0xff] %v370_v46  ;;  %v378_v50 = vld [vmem:[%s5964_s25 + $0x710] sm:$0xff]  ;;  %v380_v51 = vld [vmem:[%s5964_s25 + $0x718] sm:$0xff] }
  0x4a   : > { %373 = vst [vmem:[%s5972_s26 + $0x378] sm:$0xff] %v372_v47  ;;  %375 = vst [vmem:[%s5972_s26 + $0x380] sm:$0xff] %v374_v48  ;;  %v382_v52 = vld [vmem:[%s5964_s25 + $0x720] sm:$0xff]  ;;  %v384_v53 = vld [vmem:[%s5964_s25 + $0x728] sm:$0xff] }
  0x4b   : > { %377 = vst [vmem:[%s5972_s26 + $0x388] sm:$0xff] %v376_v49  ;;  %379 = vst [vmem:[%s5972_s26 + $0x390] sm:$0xff] %v378_v50  ;;  %v386_v54 = vld [vmem:[%s5964_s25 + $0x730] sm:$0xff]  ;;  %v388_v55 = vld [vmem:[%s5964_s25 + $0x738] sm:$0xff] }
  0x4c   : > { %381 = vst [vmem:[%s5972_s26 + $0x398] sm:$0xff] %v380_v51  ;;  %383 = vst [vmem:[%s5972_s26 + $0x3a0] sm:$0xff] %v382_v52  ;;  %v390_v56 = vld [vmem:[%s5964_s25 + $0x740] sm:$0xff]  ;;  %v392_v57 = vld [vmem:[%s5964_s25 + $0x748] sm:$0xff] }
  0x4d   : > { %385 = vst [vmem:[%s5972_s26 + $0x3a8] sm:$0xff] %v384_v53  ;;  %387 = vst [vmem:[%s5972_s26 + $0x3b0] sm:$0xff] %v386_v54  ;;  %v394_v58 = vld [vmem:[%s5964_s25 + $0x750] sm:$0xff]  ;;  %v396_v59 = vld [vmem:[%s5964_s25 + $0x758] sm:$0xff] }
  0x4e   : > { %389 = vst [vmem:[%s5972_s26 + $0x3b8] sm:$0xff] %v388_v55  ;;  %391 = vst [vmem:[%s5972_s26 + $0x3c0] sm:$0xff] %v390_v56  ;;  %v398_v60 = vld [vmem:[%s5964_s25 + $0x760] sm:$0xff]  ;;  %v400_v61 = vld [vmem:[%s5964_s25 + $0x768] sm:$0xff] }
  0x4f   : > { %393 = vst [vmem:[%s5972_s26 + $0x3c8] sm:$0xff] %v392_v57  ;;  %395 = vst [vmem:[%s5972_s26 + $0x3d0] sm:$0xff] %v394_v58  ;;  %v402_v62 = vld [vmem:[%s5964_s25 + $0x770] sm:$0xff]  ;;  %v404_v63 = vld [vmem:[%s5964_s25 + $0x778] sm:$0xff] }
  0x50   : > { %397 = vst [vmem:[%s5972_s26 + $0x3d8] sm:$0xff] %v396_v59  ;;  %399 = vst [vmem:[%s5972_s26 + $0x3e0] sm:$0xff] %v398_v60  ;;  %v406_v0 = vld [vmem:[%s5964_s25 + $0x800] sm:$0xff]  ;;  %v408_v1 = vld [vmem:[%s5964_s25 + $0x808] sm:$0xff] }
  0x51   : > { %401 = vst [vmem:[%s5972_s26 + $0x3e8] sm:$0xff] %v400_v61  ;;  %403 = vst [vmem:[%s5972_s26 + $0x3f0] sm:$0xff] %v402_v62  ;;  %v410_v2 = vld [vmem:[%s5964_s25 + $0x810] sm:$0xff]  ;;  %v412_v3 = vld [vmem:[%s5964_s25 + $0x818] sm:$0xff] }
  0x52   : > { %405 = vst [vmem:[%s5972_s26 + $0x3f8] sm:$0xff] %v404_v63  ;;  %407 = vst [vmem:[%s5972_s26 + $0x400] sm:$0xff] %v406_v0  ;;  %v414_v4 = vld [vmem:[%s5964_s25 + $0x820] sm:$0xff]  ;;  %v416_v5 = vld [vmem:[%s5964_s25 + $0x828] sm:$0xff] }
  0x53   : > { %409 = vst [vmem:[%s5972_s26 + $0x408] sm:$0xff] %v408_v1  ;;  %411 = vst [vmem:[%s5972_s26 + $0x410] sm:$0xff] %v410_v2  ;;  %v418_v6 = vld [vmem:[%s5964_s25 + $0x830] sm:$0xff]  ;;  %v420_v7 = vld [vmem:[%s5964_s25 + $0x838] sm:$0xff] }
  0x54   : > { %413 = vst [vmem:[%s5972_s26 + $0x418] sm:$0xff] %v412_v3  ;;  %415 = vst [vmem:[%s5972_s26 + $0x420] sm:$0xff] %v414_v4  ;;  %v422_v8 = vld [vmem:[%s5964_s25 + $0x840] sm:$0xff]  ;;  %v424_v9 = vld [vmem:[%s5964_s25 + $0x848] sm:$0xff] }
  0x55   : > { %417 = vst [vmem:[%s5972_s26 + $0x428] sm:$0xff] %v416_v5  ;;  %419 = vst [vmem:[%s5972_s26 + $0x430] sm:$0xff] %v418_v6  ;;  %v426_v10 = vld [vmem:[%s5964_s25 + $0x850] sm:$0xff]  ;;  %v428_v11 = vld [vmem:[%s5964_s25 + $0x858] sm:$0xff] }
  0x56   : > { %421 = vst [vmem:[%s5972_s26 + $0x438] sm:$0xff] %v420_v7  ;;  %423 = vst [vmem:[%s5972_s26 + $0x440] sm:$0xff] %v422_v8  ;;  %v430_v12 = vld [vmem:[%s5964_s25 + $0x860] sm:$0xff]  ;;  %v432_v13 = vld [vmem:[%s5964_s25 + $0x868] sm:$0xff] }
  0x57   : > { %425 = vst [vmem:[%s5972_s26 + $0x448] sm:$0xff] %v424_v9  ;;  %427 = vst [vmem:[%s5972_s26 + $0x450] sm:$0xff] %v426_v10  ;;  %v434_v14 = vld [vmem:[%s5964_s25 + $0x870] sm:$0xff]  ;;  %v436_v15 = vld [vmem:[%s5964_s25 + $0x878] sm:$0xff] }
  0x58   : > { %429 = vst [vmem:[%s5972_s26 + $0x458] sm:$0xff] %v428_v11  ;;  %431 = vst [vmem:[%s5972_s26 + $0x460] sm:$0xff] %v430_v12  ;;  %v438_v16 = vld [vmem:[%s5964_s25 + $0x900] sm:$0xff]  ;;  %v440_v17 = vld [vmem:[%s5964_s25 + $0x908] sm:$0xff] }
  0x59   : > { %433 = vst [vmem:[%s5972_s26 + $0x468] sm:$0xff] %v432_v13  ;;  %435 = vst [vmem:[%s5972_s26 + $0x470] sm:$0xff] %v434_v14  ;;  %v442_v18 = vld [vmem:[%s5964_s25 + $0x910] sm:$0xff]  ;;  %v444_v19 = vld [vmem:[%s5964_s25 + $0x918] sm:$0xff] }
  0x5a   : > { %437 = vst [vmem:[%s5972_s26 + $0x478] sm:$0xff] %v436_v15  ;;  %439 = vst [vmem:[%s5972_s26 + $0x480] sm:$0xff] %v438_v16  ;;  %v446_v20 = vld [vmem:[%s5964_s25 + $0x920] sm:$0xff]  ;;  %v448_v21 = vld [vmem:[%s5964_s25 + $0x928] sm:$0xff] }
  0x5b   : > { %441 = vst [vmem:[%s5972_s26 + $0x488] sm:$0xff] %v440_v17  ;;  %443 = vst [vmem:[%s5972_s26 + $0x490] sm:$0xff] %v442_v18  ;;  %v450_v22 = vld [vmem:[%s5964_s25 + $0x930] sm:$0xff]  ;;  %v452_v23 = vld [vmem:[%s5964_s25 + $0x938] sm:$0xff] }
  0x5c   : > { %445 = vst [vmem:[%s5972_s26 + $0x498] sm:$0xff] %v444_v19  ;;  %447 = vst [vmem:[%s5972_s26 + $0x4a0] sm:$0xff] %v446_v20  ;;  %v454_v24 = vld [vmem:[%s5964_s25 + $0x940] sm:$0xff]  ;;  %v456_v25 = vld [vmem:[%s5964_s25 + $0x948] sm:$0xff] }
  0x5d   : > { %449 = vst [vmem:[%s5972_s26 + $0x4a8] sm:$0xff] %v448_v21  ;;  %451 = vst [vmem:[%s5972_s26 + $0x4b0] sm:$0xff] %v450_v22  ;;  %v458_v26 = vld [vmem:[%s5964_s25 + $0x950] sm:$0xff]  ;;  %v460_v27 = vld [vmem:[%s5964_s25 + $0x958] sm:$0xff] }
  0x5e   : > { %453 = vst [vmem:[%s5972_s26 + $0x4b8] sm:$0xff] %v452_v23  ;;  %455 = vst [vmem:[%s5972_s26 + $0x4c0] sm:$0xff] %v454_v24  ;;  %v462_v28 = vld [vmem:[%s5964_s25 + $0x960] sm:$0xff]  ;;  %v464_v29 = vld [vmem:[%s5964_s25 + $0x968] sm:$0xff] }
  0x5f   : > { %457 = vst [vmem:[%s5972_s26 + $0x4c8] sm:$0xff] %v456_v25  ;;  %459 = vst [vmem:[%s5972_s26 + $0x4d0] sm:$0xff] %v458_v26  ;;  %v466_v30 = vld [vmem:[%s5964_s25 + $0x970] sm:$0xff]  ;;  %v468_v31 = vld [vmem:[%s5964_s25 + $0x978] sm:$0xff] }
  0x60   : > { %461 = vst [vmem:[%s5972_s26 + $0x4d8] sm:$0xff] %v460_v27  ;;  %463 = vst [vmem:[%s5972_s26 + $0x4e0] sm:$0xff] %v462_v28  ;;  %v470_v32 = vld [vmem:[%s5964_s25 + $0xa00] sm:$0xff]  ;;  %v472_v33 = vld [vmem:[%s5964_s25 + $0xa08] sm:$0xff] }
  0x61   : > { %465 = vst [vmem:[%s5972_s26 + $0x4e8] sm:$0xff] %v464_v29  ;;  %467 = vst [vmem:[%s5972_s26 + $0x4f0] sm:$0xff] %v466_v30  ;;  %v474_v34 = vld [vmem:[%s5964_s25 + $0xa10] sm:$0xff]  ;;  %v476_v35 = vld [vmem:[%s5964_s25 + $0xa18] sm:$0xff] }
  0x62   : > { %469 = vst [vmem:[%s5972_s26 + $0x4f8] sm:$0xff] %v468_v31  ;;  %471 = vst [vmem:[%s5972_s26 + $0x500] sm:$0xff] %v470_v32  ;;  %v478_v36 = vld [vmem:[%s5964_s25 + $0xa20] sm:$0xff]  ;;  %v480_v37 = vld [vmem:[%s5964_s25 + $0xa28] sm:$0xff] }
  0x63   : > { %473 = vst [vmem:[%s5972_s26 + $0x508] sm:$0xff] %v472_v33  ;;  %475 = vst [vmem:[%s5972_s26 + $0x510] sm:$0xff] %v474_v34  ;;  %v482_v38 = vld [vmem:[%s5964_s25 + $0xa30] sm:$0xff]  ;;  %v484_v39 = vld [vmem:[%s5964_s25 + $0xa38] sm:$0xff] }
  0x64   : > { %477 = vst [vmem:[%s5972_s26 + $0x518] sm:$0xff] %v476_v35  ;;  %479 = vst [vmem:[%s5972_s26 + $0x520] sm:$0xff] %v478_v36  ;;  %v486_v40 = vld [vmem:[%s5964_s25 + $0xa40] sm:$0xff]  ;;  %v488_v41 = vld [vmem:[%s5964_s25 + $0xa48] sm:$0xff] }
  0x65   : > { %481 = vst [vmem:[%s5972_s26 + $0x528] sm:$0xff] %v480_v37  ;;  %483 = vst [vmem:[%s5972_s26 + $0x530] sm:$0xff] %v482_v38  ;;  %v490_v42 = vld [vmem:[%s5964_s25 + $0xa50] sm:$0xff]  ;;  %v492_v43 = vld [vmem:[%s5964_s25 + $0xa58] sm:$0xff] }
  0x66   : > { %485 = vst [vmem:[%s5972_s26 + $0x538] sm:$0xff] %v484_v39  ;;  %487 = vst [vmem:[%s5972_s26 + $0x540] sm:$0xff] %v486_v40  ;;  %v494_v44 = vld [vmem:[%s5964_s25 + $0xa60] sm:$0xff]  ;;  %v496_v45 = vld [vmem:[%s5964_s25 + $0xa68] sm:$0xff] }
  0x67   : > { %489 = vst [vmem:[%s5972_s26 + $0x548] sm:$0xff] %v488_v41  ;;  %491 = vst [vmem:[%s5972_s26 + $0x550] sm:$0xff] %v490_v42  ;;  %v498_v46 = vld [vmem:[%s5964_s25 + $0xa70] sm:$0xff]  ;;  %v500_v47 = vld [vmem:[%s5964_s25 + $0xa78] sm:$0xff] }
  0x68   : > { %493 = vst [vmem:[%s5972_s26 + $0x558] sm:$0xff] %v492_v43  ;;  %495 = vst [vmem:[%s5972_s26 + $0x560] sm:$0xff] %v494_v44  ;;  %v502_v48 = vld [vmem:[%s5964_s25 + $0xb00] sm:$0xff]  ;;  %v504_v49 = vld [vmem:[%s5964_s25 + $0xb08] sm:$0xff] }
  0x69   : > { %497 = vst [vmem:[%s5972_s26 + $0x568] sm:$0xff] %v496_v45  ;;  %499 = vst [vmem:[%s5972_s26 + $0x570] sm:$0xff] %v498_v46  ;;  %v506_v50 = vld [vmem:[%s5964_s25 + $0xb10] sm:$0xff]  ;;  %v508_v51 = vld [vmem:[%s5964_s25 + $0xb18] sm:$0xff] }
  0x6a   : > { %501 = vst [vmem:[%s5972_s26 + $0x578] sm:$0xff] %v500_v47  ;;  %503 = vst [vmem:[%s5972_s26 + $0x580] sm:$0xff] %v502_v48  ;;  %v510_v52 = vld [vmem:[%s5964_s25 + $0xb20] sm:$0xff]  ;;  %v512_v53 = vld [vmem:[%s5964_s25 + $0xb28] sm:$0xff] }
  0x6b   : > { %505 = vst [vmem:[%s5972_s26 + $0x588] sm:$0xff] %v504_v49  ;;  %507 = vst [vmem:[%s5972_s26 + $0x590] sm:$0xff] %v506_v50  ;;  %v514_v54 = vld [vmem:[%s5964_s25 + $0xb30] sm:$0xff]  ;;  %v516_v55 = vld [vmem:[%s5964_s25 + $0xb38] sm:$0xff] }
  0x6c   : > { %509 = vst [vmem:[%s5972_s26 + $0x598] sm:$0xff] %v508_v51  ;;  %511 = vst [vmem:[%s5972_s26 + $0x5a0] sm:$0xff] %v510_v52  ;;  %v518_v56 = vld [vmem:[%s5964_s25 + $0xb40] sm:$0xff]  ;;  %v520_v57 = vld [vmem:[%s5964_s25 + $0xb48] sm:$0xff] }
  0x6d   : > { %513 = vst [vmem:[%s5972_s26 + $0x5a8] sm:$0xff] %v512_v53  ;;  %515 = vst [vmem:[%s5972_s26 + $0x5b0] sm:$0xff] %v514_v54  ;;  %v522_v58 = vld [vmem:[%s5964_s25 + $0xb50] sm:$0xff]  ;;  %v524_v59 = vld [vmem:[%s5964_s25 + $0xb58] sm:$0xff] }
  0x6e   : > { %517 = vst [vmem:[%s5972_s26 + $0x5b8] sm:$0xff] %v516_v55  ;;  %519 = vst [vmem:[%s5972_s26 + $0x5c0] sm:$0xff] %v518_v56  ;;  %v526_v60 = vld [vmem:[%s5964_s25 + $0xb60] sm:$0xff]  ;;  %v528_v61 = vld [vmem:[%s5964_s25 + $0xb68] sm:$0xff] }
  0x6f   : > { %521 = vst [vmem:[%s5972_s26 + $0x5c8] sm:$0xff] %v520_v57  ;;  %523 = vst [vmem:[%s5972_s26 + $0x5d0] sm:$0xff] %v522_v58  ;;  %v530_v62 = vld [vmem:[%s5964_s25 + $0xb70] sm:$0xff]  ;;  %v532_v63 = vld [vmem:[%s5964_s25 + $0xb78] sm:$0xff] }
  0x70   : > { %525 = vst [vmem:[%s5972_s26 + $0x5d8] sm:$0xff] %v524_v59  ;;  %527 = vst [vmem:[%s5972_s26 + $0x5e0] sm:$0xff] %v526_v60 }
  0x71   : > { %529 = vst [vmem:[%s5972_s26 + $0x5e8] sm:$0xff] %v528_v61  ;;  %531 = vst [vmem:[%s5972_s26 + $0x5f0] sm:$0xff] %v530_v62 }
  0x72   : > { %533 = vst [vmem:[%s5972_s26 + $0x5f8] sm:$0xff] %v532_v63 }
  0x73 PF: > { %p5162_p5 = scmp.ge.s32.totalorder %s5907_s14, 1  ;;  %p538_p6 = scmp.lt.s32.totalorder %s5907_s14, 3 }
  0x75   : > { %p539_p7 = pnand %p5162_p5, %p538_p6 }
  0x77   : > { %542 = sbr.rel (%p539_p7) target bundleno = 613 (0x265), region = 51 }
  0x7e   : > { %s545_s27 = sand.u32 1, %s5899_s12   ;;  %v5909_v0 = vmov 0   ;;  %vm869_vm0 = vcmask 1041408   ;;  %v6379_v25 = vld [vmem:[%s7390_s1] sm:$0x7]  ;;  %vm865_vm1 = vcmask 162816  }
  0x7f   : > { %s5729_s28 = smul.u32 1536, %s545_s27  ;;  %998 = vmatprep.mubr.bf16.mxu0 %v5909_v0  ;;  %1039 = vmatprep.mubr.bf16.mxu1 %v5909_v0  ;;  %s5163_s9 = sshll.u32 %s5156_s15, 5  ;;  %vm5039_vm2 = vcmask 1042432   ;;  %vm5040_vm3 = vsmask.f32 2304  ;;  %vm5042_vm4 = vcmask 1046532  }
  0x80   : > { %5755 = vset.pattern.permute.xlu0 %v5909_v0  ;;  %p570_p8 = scmp.lt.s32.totalorder %s5163_s9, 63  ;;  %vm5043_vm5 = vsmask.f32 6400  ;;  %vm5041_vm6 = vmand %vm5039_vm2, %vm5040_vm3 }
  0x81   : > { %s6358_s29 = scalar_lea.vmem [#allocation2], %s5729_s28  ;;  %vm5044_vm7 = vmand %vm5042_vm4, %vm5043_vm5 }
  0x82   : > { %v577_v1 = vld [vmem:[%s6358_s29] sm:$0xff]  ;;  %v578_v3 = vld [vmem:[%s6358_s29 + $0x8] sm:$0xff]  ;;  %v579_v13 = vld [vmem:[%s6358_s29 + $0x10] sm:$0xff]  ;;  %s7469_s9 = smov (!%p570_p8, %s5163_s9), 63 }
  0x83   : > { %v593_v2 = vld [vmem:[%s6358_s29 + $0x80] sm:$0xff]  ;;  %v594_v5 = vld [vmem:[%s6358_s29 + $0x88] sm:$0xff]  ;;  %v595_v14 = vld [vmem:[%s6358_s29 + $0x90] sm:$0xff]  ;;  %s5164_s10 = sshll.u32 %s7469_s9, 2 }
  0x84   : > { %v5166_v4 = vcombine.high %v577_v1, %v593_v2  ;;  %v5165_v6 = vcombine.low %v577_v1, %v593_v2  ;;  %v609_v7 = vld [vmem:[%s6358_s29 + $0x100] sm:$0x33]  ;;  %v610_v8 = vld [vmem:[%s6358_s29 + $0x108] sm:$0x33]  ;;  %v5168_v9 = vcombine.high %v578_v3, %v594_v5  ;;  %v5167_v10 = vcombine.low %v578_v3, %v594_v5  ;;  %v580_v17 = vld [vmem:[%s6358_s29 + $0x18] sm:$0xff]  ;;  %s7249_s14 = scalar_lea.vmem %s7392_s3, %s5164_s10 }
  0x85   : > { %v5198_v11 = vcombine.high %v609_v7, %v609_v7  ;;  %v5200_v12 = vcombine.high %v610_v8, %v610_v8  ;;  %v5197_v15 = vcombine.low %v609_v7, %v609_v7  ;;  %v5199_v16 = vcombine.low %v610_v8, %v610_v8  ;;  %v596_v18 = vld [vmem:[%s6358_s29 + $0x98] sm:$0xff]  ;;  %v611_v23 = vld [vmem:[%s6358_s29 + $0x110] sm:$0x33]  ;;  %v581_v32 = vld [vmem:[%s6358_s29 + $0x20] sm:$0xff] }
  0x86   : > { %966 = vmatprep.subr.bf16.mxu0 %v5166_v4  ;;  %1007 = vmatprep.subr.bf16.mxu1 %v5168_v9  ;;  %v5170_v20 = vcombine.high %v579_v13, %v595_v14  ;;  %v5172_v22 = vcombine.high %v580_v17, %v596_v18  ;;  %v612_v24 = vld [vmem:[%s6358_s29 + $0x118] sm:$0x33]  ;;  %v5169_v26 = vcombine.low %v579_v13, %v595_v14  ;;  %v597_v33 = vld [vmem:[%s6358_s29 + $0xa0] sm:$0xff]  ;;  %v582_v34 = vld [vmem:[%s6358_s29 + $0x28] sm:$0xff] }
  0x87   : > { %967 = vmatpush1.bf16.msra.mxu0 %v5165_v6  ;;  %1008 = vmatpush1.bf16.msra.mxu1 %v5167_v10  ;;  %v871_v19 = vsel %vm869_vm0, %v5197_v15, 0  ;;  %v877_v21 = vsel %vm869_vm0, %v5199_v16, 0  ;;  %v5171_v27 = vcombine.low %v580_v17, %v596_v18  ;;  %v5202_v28 = vcombine.high %v611_v23, %v611_v23  ;;  %v598_v35 = vld [vmem:[%s6358_s29 + $0xa8] sm:$0xff]  ;;  %v613_v40 = vld [vmem:[%s6358_s29 + $0x120] sm:$0x33]  ;;  %v583_v48 = vld [vmem:[%s6358_s29 + $0x30] sm:$0xff] }
  0x88   : > { %5229 = vmatprep.subr.msk.bf16.mxu0 %vm869_vm0, %v5198_v11  ;;  %5231 = vmatprep.subr.msk.bf16.mxu1 %vm869_vm0, %v5200_v12  ;;  %v5201_v29 = vcombine.low %v611_v23, %v611_v23  ;;  %v5204_v30 = vcombine.high %v612_v24, %v612_v24  ;;  %v5203_v31 = vcombine.low %v612_v24, %v612_v24  ;;  %v614_v41 = vld [vmem:[%s6358_s29 + $0x128] sm:$0x33]  ;;  %v599_v49 = vld [vmem:[%s6358_s29 + $0xb0] sm:$0xff]  ;;  %v584_v50 = vld [vmem:[%s6358_s29 + $0x38] sm:$0xff] }
  0x89   : > { %v5174_v37 = vcombine.high %v581_v32, %v597_v33  ;;  %v5176_v39 = vcombine.high %v582_v34, %v598_v35  ;;  %v5173_v42 = vcombine.low %v581_v32, %v597_v33  ;;  %v5175_v43 = vcombine.low %v582_v34, %v598_v35  ;;  %v600_v51 = vld [vmem:[%s6358_s29 + $0xb8] sm:$0xff]  ;;  %v615_v56 = vld [vmem:[%s6358_s29 + $0x130] sm:$0x33]  ;;  %v585_v1 = vld [vmem:[%s6358_s29 + $0x40] sm:$0xff] }
  0x8a   : > { %v883_v36 = vsel %vm869_vm0, %v5201_v29, 0  ;;  %v889_v38 = vsel %vm869_vm0, %v5203_v31, 0  ;;  %v5206_v44 = vcombine.high %v613_v40, %v613_v40  ;;  %v5205_v45 = vcombine.low %v613_v40, %v613_v40  ;;  %v616_v57 = vld [vmem:[%s6358_s29 + $0x138] sm:$0x33]  ;;  %v601_v2 = vld [vmem:[%s6358_s29 + $0xc0] sm:$0xff]  ;;  %v586_v3 = vld [vmem:[%s6358_s29 + $0x48] sm:$0xff] }
  0x8b   : > { %969 = vmatpush1.bf16.msra.mxu0 %v871_v19  ;;  %1010 = vmatpush1.bf16.msra.mxu1 %v877_v21  ;;  %v5208_v46 = vcombine.high %v614_v41, %v614_v41  ;;  %v5207_v47 = vcombine.low %v614_v41, %v614_v41  ;;  %v5178_v53 = vcombine.high %v583_v48, %v599_v49  ;;  %v602_v4 = vld [vmem:[%s6358_s29 + $0xc8] sm:$0xff]  ;;  %v617_v9 = vld [vmem:[%s6358_s29 + $0x140] sm:$0x33]  ;;  %v587_v17 = vld [vmem:[%s6358_s29 + $0x50] sm:$0xff] }
  0x8c   : > { %1048 = vmatprep.subr.bf16.mxu0 %v5170_v20  ;;  %1089 = vmatprep.subr.bf16.mxu1 %v5172_v22  ;;  %v895_v52 = vsel %vm869_vm0, %v5205_v45, 0  ;;  %v5180_v55 = vcombine.high %v584_v50, %v600_v51  ;;  %v5177_v58 = vcombine.low %v583_v48, %v599_v49  ;;  %v5179_v59 = vcombine.low %v584_v50, %v600_v51  ;;  %v618_v10 = vld [vmem:[%s6358_s29 + $0x148] sm:$0x33]  ;;  %v603_v18 = vld [vmem:[%s6358_s29 + $0xd0] sm:$0xff]  ;;  %v588_v19 = vld [vmem:[%s6358_s29 + $0x58] sm:$0xff] }
  0x8d   : > { %v901_v54 = vsel %vm869_vm0, %v5207_v47, 0  ;;  %v5210_v60 = vcombine.high %v615_v56, %v615_v56  ;;  %v5209_v61 = vcombine.low %v615_v56, %v615_v56  ;;  %v5212_v62 = vcombine.high %v616_v57, %v616_v57  ;;  %v604_v20 = vld [vmem:[%s6358_s29 + $0xd8] sm:$0xff]  ;;  %v589_v34 = vld [vmem:[%s6358_s29 + $0x60] sm:$0xff]  ;;  %v591_v50 = vld [vmem:[%s6358_s29 + $0x70] sm:$0xff] }
  0x8e   : > { %5230 = vmatmul.mubr.msk.bf16.vlgmr.msra.gmra.mrb[0].mxu0 %vm865_vm1, %v6379_v25  ;;  %5232 = vmatmul.mubr.msk.bf16.vlgmr.msra.gmra.mrb[0].mxu1 %vm865_vm1, %v6379_v25  ;;  %v5211_v63 = vcombine.low %v616_v57, %v616_v57  ;;  %v5182_v6 = vcombine.high %v585_v1, %v601_v2  ;;  %v5184_v8 = vcombine.high %v586_v3, %v602_v4  ;;  %v605_v35 = vld [vmem:[%s6358_s29 + $0xe0] sm:$0xff]  ;;  %v607_v51 = vld [vmem:[%s6358_s29 + $0xf0] sm:$0xff]  ;;  %vm7255_vm8 = vmor %vm5044_vm7, %vm5041_vm6 }
  0x8f   : > { %1049 = vmatpush1.bf16.msra.mxu0 %v5169_v26  ;;  %1090 = vmatpush1.bf16.msra.mxu1 %v5171_v27  ;;  %v907_v5 = vsel %vm869_vm0, %v5209_v61, 0  ;;  %v5181_v11 = vcombine.low %v585_v1, %v601_v2  ;;  %v5183_v12 = vcombine.low %v586_v3, %v602_v4  ;;  %v5214_v13 = vcombine.high %v617_v9, %v617_v9  ;;  %v619_v26 = vld [vmem:[%s6358_s29 + $0x150] sm:$0x33]  ;;  %v620_v27 = vld [vmem:[%s6358_s29 + $0x158] sm:$0x33]  ;;  %v5261_v3 = vld [vmem:[%s6358_s29 + $0x180] sm:$0xff] }
  0x90   : > { %5233 = vmatprep.subr.msk.bf16.mxu0 %vm869_vm0, %v5202_v28  ;;  %5235 = vmatprep.subr.msk.bf16.mxu1 %vm869_vm0, %v5204_v30  ;;  %v913_v7 = vsel %vm869_vm0, %v5211_v63, 0  ;;  %v5213_v14 = vcombine.low %v617_v9, %v617_v9  ;;  %v5216_v15 = vcombine.high %v618_v10, %v618_v10  ;;  %v5215_v16 = vcombine.low %v618_v10, %v618_v10  ;;  %v5277_v4 = vld [vmem:[%s6358_s29 + $0x200] sm:$0xff] }
  0x91   : > { %1080 = vmatprep.mubr.bf16.mxu0 %v5909_v0  ;;  %1121 = vmatprep.mubr.bf16.mxu1 %v5909_v0  ;;  %v5186_v22 = vcombine.high %v587_v17, %v603_v18  ;;  %v5188_v24 = vcombine.high %v588_v19, %v604_v20  ;;  %v5185_v28 = vcombine.low %v587_v17, %v603_v18 }
  0x92   : > { %v919_v21 = vsel %vm869_vm0, %v5213_v14, 0  ;;  %v925_v23 = vsel %vm869_vm0, %v5215_v16, 0  ;;  %v5187_v29 = vcombine.low %v588_v19, %v604_v20  ;;  %v5218_v30 = vcombine.high %v619_v26, %v619_v26  ;;  %v5263_v19 = vld [vmem:[%s6358_s29 + $0x190] sm:$0xff] }
  0x93   : > { %1051 = vmatpush1.bf16.msra.mxu0 %v883_v36  ;;  %1092 = vmatpush1.bf16.msra.mxu1 %v889_v38  ;;  %v5217_v31 = vcombine.low %v619_v26, %v619_v26  ;;  %v5220_v32 = vcombine.high %v620_v27, %v620_v27  ;;  %v5219_v33 = vcombine.low %v620_v27, %v620_v27  ;;  %v590_v36 = vld [vmem:[%s6358_s29 + $0x68] sm:$0xff]  ;;  %v5279_v20 = vld [vmem:[%s6358_s29 + $0x210] sm:$0xff] }
  0x94   : > { %1130 = vmatprep.subr.bf16.mxu0 %v5174_v37  ;;  %1171 = vmatprep.subr.bf16.mxu1 %v5176_v39  ;;  %v606_v37 = vld [vmem:[%s6358_s29 + $0xe8] sm:$0xff]  ;;  %v5190_v39 = vcombine.high %v589_v34, %v605_v35 }
  0x95   : > { %v931_v38 = vsel %vm869_vm0, %v5217_v31, 0  ;;  %v937_v40 = vsel %vm869_vm0, %v5219_v33, 0  ;;  %v5192_v41 = vcombine.high %v590_v36, %v606_v37  ;;  %v5191_v45 = vcombine.low %v590_v36, %v606_v37  ;;  %v5265_v36 = vld [vmem:[%s6358_s29 + $0x1a0] sm:$0xff] }
  0x96   : > { %5234 = vmatmul.mubr.msk.bf16.vlgmr.msra.gmra.mrb[4].mxu0 %vm865_vm1, %v6379_v25  ;;  %5236 = vmatmul.mubr.msk.bf16.vlgmr.msra.gmra.mrb[4].mxu1 %vm865_vm1, %v6379_v25  ;;  %v5281_v37 = vld [vmem:[%s6358_s29 + $0x220] sm:$0xff] }
  0x97   : > { %1131 = vmatpush1.bf16.msra.mxu0 %v5173_v42  ;;  %1172 = vmatpush1.bf16.msra.mxu1 %v5175_v43  ;;  %v621_v42 = vld [vmem:[%s6358_s29 + $0x160] sm:$0x33]  ;;  %v622_v43 = vld [vmem:[%s6358_s29 + $0x168] sm:$0x33] }
  0x98   : > { %5237 = vmatprep.subr.msk.bf16.mxu0 %vm869_vm0, %v5206_v44  ;;  %5239 = vmatprep.subr.msk.bf16.mxu1 %vm869_vm0, %v5208_v46  ;;  %v5189_v44 = vcombine.low %v589_v34, %v605_v35  ;;  %v5222_v46 = vcombine.high %v621_v42, %v621_v42  ;;  %v5221_v47 = vcombine.low %v621_v42, %v621_v42 }
  0x99   : > { %1162 = vmatprep.mubr.bf16.mxu0 %v5909_v0  ;;  %1203 = vmatprep.mubr.bf16.mxu1 %v5909_v0  ;;  %v5224_v48 = vcombine.high %v622_v43, %v622_v43  ;;  %v5223_v49 = vcombine.low %v622_v43, %v622_v43 }
  0x9b   : > { %1133 = vmatpush1.bf16.msra.mxu0 %v895_v52  ;;  %1174 = vmatpush1.bf16.msra.mxu1 %v901_v54  ;;  %v592_v52 = vld [vmem:[%s6358_s29 + $0x78] sm:$0xff]  ;;  %v943_v54 = vsel %vm869_vm0, %v5221_v47, 0  ;;  %v949_v56 = vsel %vm869_vm0, %v5223_v49, 0 }
  0x9c   : > { %1212 = vmatprep.subr.bf16.mxu0 %v5178_v53  ;;  %1253 = vmatprep.subr.bf16.mxu1 %v5180_v55  ;;  %v608_v53 = vld [vmem:[%s6358_s29 + $0xf8] sm:$0xff]  ;;  %v5194_v55 = vcombine.high %v591_v50, %v607_v51 }
  0x9d   : > { %v5196_v57 = vcombine.high %v592_v52, %v608_v53  ;;  %v5195_v61 = vcombine.low %v592_v52, %v608_v53  ;;  %v5267_v52 = vld [vmem:[%s6358_s29 + $0x1b0] sm:$0xff] }
  0x9e   : > { %5238 = vmatmul.mubr.msk.bf16.vlgmr.msra.gmra.mrb[8].mxu0 %vm865_vm1, %v6379_v25  ;;  %5240 = vmatmul.mubr.msk.bf16.vlgmr.msra.gmra.mrb[8].mxu1 %vm865_vm1, %v6379_v25  ;;  %v5283_v53 = vld [vmem:[%s6358_s29 + $0x230] sm:$0xff] }
  0x9f   : > { %1213 = vmatpush1.bf16.msra.mxu0 %v5177_v58  ;;  %1254 = vmatpush1.bf16.msra.mxu1 %v5179_v59  ;;  %v623_v58 = vld [vmem:[%s6358_s29 + $0x170] sm:$0x33]  ;;  %v624_v59 = vld [vmem:[%s6358_s29 + $0x178] sm:$0x33] }
  0xa0   : > { %5241 = vmatprep.subr.msk.bf16.mxu0 %vm869_vm0, %v5210_v60  ;;  %5243 = vmatprep.subr.msk.bf16.mxu1 %vm869_vm0, %v5212_v62  ;;  %v5193_v60 = vcombine.low %v591_v50, %v607_v51  ;;  %v5226_v62 = vcombine.high %v623_v58, %v623_v58  ;;  %v5225_v63 = vcombine.low %v623_v58, %v623_v58 }
  0xa1   : > { %1244 = vmatprep.mubr.bf16.mxu0 %v5909_v0  ;;  %1285 = vmatprep.mubr.bf16.mxu1 %v5909_v0  ;;  %v5228_v1 = vcombine.high %v624_v59, %v624_v59  ;;  %v5227_v2 = vcombine.low %v624_v59, %v624_v59 }
  0xa3   : > { %1215 = vmatpush1.bf16.msra.mxu0 %v907_v5  ;;  %1256 = vmatpush1.bf16.msra.mxu1 %v913_v7  ;;  %v5262_v5 = vld [vmem:[%s6358_s29 + $0x188] sm:$0xff]  ;;  %v955_v7 = vsel %vm869_vm0, %v5225_v63, 0  ;;  %v961_v9 = vsel %vm869_vm0, %v5227_v2, 0 }
  0xa4   : > { %1294 = vmatprep.subr.bf16.mxu0 %v5182_v6  ;;  %1335 = vmatprep.subr.bf16.mxu1 %v5184_v8  ;;  %v5278_v6 = vld [vmem:[%s6358_s29 + $0x208] sm:$0xff]  ;;  %v5310_v8 = vcombine.high %v5261_v3, %v5277_v4 }
  0xa5   : > { %v5312_v10 = vcombine.high %v5262_v5, %v5278_v6  ;;  %v5311_v14 = vcombine.low %v5262_v5, %v5278_v6  ;;  %v5269_v5 = vld [vmem:[%s6358_s29 + $0x1c0] sm:$0xff] }
  0xa6   : > { %5242 = vmatmul.mubr.msk.bf16.vlgmr.msra.gmra.mrb[12].mxu0 %vm865_vm1, %v6379_v25  ;;  %5244 = vmatmul.mubr.msk.bf16.vlgmr.msra.gmra.mrb[12].mxu1 %vm865_vm1, %v6379_v25  ;;  %v5285_v6 = vld [vmem:[%s6358_s29 + $0x240] sm:$0xff] }
  0xa7   : > { %1295 = vmatpush1.bf16.msra.mxu0 %v5181_v11  ;;  %1336 = vmatpush1.bf16.msra.mxu1 %v5183_v12  ;;  %v5293_v11 = vld [vmem:[%s6358_s29 + $0x280] sm:$0x33]  ;;  %v5294_v12 = vld [vmem:[%s6358_s29 + $0x288] sm:$0x33] }
  0xa8   : > { %5245 = vmatprep.subr.msk.bf16.mxu0 %vm869_vm0, %v5214_v13  ;;  %5247 = vmatprep.subr.msk.bf16.mxu1 %vm869_vm0, %v5216_v15  ;;  %v5309_v13 = vcombine.low %v5261_v3, %v5277_v4  ;;  %v5342_v15 = vcombine.high %v5293_v11, %v5293_v11  ;;  %v5341_v16 = vcombine.low %v5293_v11, %v5293_v11 }
  0xa9   : > { %1326 = vmatprep.mubr.bf16.mxu0 %v5909_v0  ;;  %1367 = vmatprep.mubr.bf16.mxu1 %v5909_v0  ;;  %v5344_v17 = vcombine.high %v5294_v12, %v5294_v12  ;;  %v5343_v18 = vcombine.low %v5294_v12, %v5294_v12 }
  0xab   : > { %1297 = vmatpush1.bf16.msra.mxu0 %v919_v21  ;;  %1338 = vmatpush1.bf16.msra.mxu1 %v925_v23  ;;  %v5264_v21 = vld [vmem:[%s6358_s29 + $0x198] sm:$0xff]  ;;  %v1912_v23 = vsel %vm869_vm0, %v5341_v16, 0  ;;  %v1918_v26 = vsel %vm869_vm0, %v5343_v18, 0 }
  0xac   : > { %1376 = vmatprep.subr.bf16.mxu0 %v5186_v22  ;;  %1417 = vmatprep.subr.bf16.mxu1 %v5188_v24  ;;  %v5280_v22 = vld [vmem:[%s6358_s29 + $0x218] sm:$0xff]  ;;  %v5314_v24 = vcombine.high %v5263_v19, %v5279_v20 }
  0xad   : > { %v5316_v27 = vcombine.high %v5264_v21, %v5280_v22  ;;  %v5315_v31 = vcombine.low %v5264_v21, %v5280_v22  ;;  %v5271_v21 = vld [vmem:[%s6358_s29 + $0x1d0] sm:$0xff] }
  0xae   : > { %5246 = vmatmul.mubr.msk.bf16.vlgmr.msra.gmra.mrb[16].mxu0 %vm865_vm1, %v6379_v25  ;;  %5248 = vmatmul.mubr.msk.bf16.vlgmr.msra.gmra.mrb[16].mxu1 %vm865_vm1, %v6379_v25  ;;  %v5287_v22 = vld [vmem:[%s6358_s29 + $0x250] sm:$0xff] }
  0xaf   : > { %1377 = vmatpush1.bf16.msra.mxu0 %v5185_v28  ;;  %1418 = vmatpush1.bf16.msra.mxu1 %v5187_v29  ;;  %v5295_v28 = vld [vmem:[%s6358_s29 + $0x290] sm:$0x33]  ;;  %v5296_v29 = vld [vmem:[%s6358_s29 + $0x298] sm:$0x33] }
  0xb0   : > { %5249 = vmatprep.subr.msk.bf16.mxu0 %vm869_vm0, %v5218_v30  ;;  %5251 = vmatprep.subr.msk.bf16.mxu1 %vm869_vm0, %v5220_v32  ;;  %v5313_v30 = vcombine.low %v5263_v19, %v5279_v20  ;;  %v5346_v32 = vcombine.high %v5295_v28, %v5295_v28  ;;  %v5345_v33 = vcombine.low %v5295_v28, %v5295_v28 }
  0xb1   : > { %1408 = vmatprep.mubr.bf16.mxu0 %v5909_v0  ;;  %1449 = vmatprep.mubr.bf16.mxu1 %v5909_v0  ;;  %v5348_v34 = vcombine.high %v5296_v29, %v5296_v29  ;;  %v5347_v35 = vcombine.low %v5296_v29, %v5296_v29 }
  0xb3   : > { %1379 = vmatpush1.bf16.msra.mxu0 %v931_v38  ;;  %1420 = vmatpush1.bf16.msra.mxu1 %v937_v40  ;;  %v5266_v38 = vld [vmem:[%s6358_s29 + $0x1a8] sm:$0xff]  ;;  %v1924_v40 = vsel %vm869_vm0, %v5345_v33, 0  ;;  %v1930_v42 = vsel %vm869_vm0, %v5347_v35, 0 }
  0xb4   : > { %1458 = vmatprep.subr.bf16.mxu0 %v5190_v39  ;;  %1499 = vmatprep.subr.bf16.mxu1 %v5192_v41  ;;  %v5282_v39 = vld [vmem:[%s6358_s29 + $0x228] sm:$0xff]  ;;  %v5318_v41 = vcombine.high %v5265_v36, %v5281_v37 }
  0xb5   : > { %v5320_v43 = vcombine.high %v5266_v38, %v5282_v39  ;;  %v5319_v47 = vcombine.low %v5266_v38, %v5282_v39  ;;  %v5273_v38 = vld [vmem:[%s6358_s29 + $0x1e0] sm:$0xff] }
  0xb6   : > { %5250 = vmatmul.mubr.msk.bf16.vlgmr.msra.gmra.mrb[20].mxu0 %vm865_vm1, %v6379_v25  ;;  %5252 = vmatmul.mubr.msk.bf16.vlgmr.msra.gmra.mrb[20].mxu1 %vm865_vm1, %v6379_v25  ;;  %v5289_v39 = vld [vmem:[%s6358_s29 + $0x260] sm:$0xff] }
  0xb7   : > { %1459 = vmatpush1.bf16.msra.mxu0 %v5189_v44  ;;  %1500 = vmatpush1.bf16.msra.mxu1 %v5191_v45  ;;  %v5297_v44 = vld [vmem:[%s6358_s29 + $0x2a0] sm:$0x33]  ;;  %v5298_v45 = vld [vmem:[%s6358_s29 + $0x2a8] sm:$0x33] }
  0xb8   : > { %5253 = vmatprep.subr.msk.bf16.mxu0 %vm869_vm0, %v5222_v46  ;;  %5255 = vmatprep.subr.msk.bf16.mxu1 %vm869_vm0, %v5224_v48  ;;  %v5317_v46 = vcombine.low %v5265_v36, %v5281_v37  ;;  %v5350_v48 = vcombine.high %v5297_v44, %v5297_v44  ;;  %v5349_v49 = vcombine.low %v5297_v44, %v5297_v44 }
  0xb9   : > { %1490 = vmatprep.mubr.bf16.mxu0 %v5909_v0  ;;  %1531 = vmatprep.mubr.bf16.mxu1 %v5909_v0  ;;  %v5352_v50 = vcombine.high %v5298_v45, %v5298_v45  ;;  %v5351_v51 = vcombine.low %v5298_v45, %v5298_v45 }
  0xbb   : > { %1461 = vmatpush1.bf16.msra.mxu0 %v943_v54  ;;  %1502 = vmatpush1.bf16.msra.mxu1 %v949_v56  ;;  %v5268_v54 = vld [vmem:[%s6358_s29 + $0x1b8] sm:$0xff]  ;;  %v1936_v56 = vsel %vm869_vm0, %v5349_v49, 0  ;;  %v1942_v58 = vsel %vm869_vm0, %v5351_v51, 0 }
  0xbc   : > { %1540 = vmatprep.subr.bf16.mxu0 %v5194_v55  ;;  %1581 = vmatprep.subr.bf16.mxu1 %v5196_v57  ;;  %v5284_v55 = vld [vmem:[%s6358_s29 + $0x238] sm:$0xff]  ;;  %v5322_v57 = vcombine.high %v5267_v52, %v5283_v53 }
  0xbd   : > { %v5324_v59 = vcombine.high %v5268_v54, %v5284_v55  ;;  %v5323_v63 = vcombine.low %v5268_v54, %v5284_v55  ;;  %v5275_v54 = vld [vmem:[%s6358_s29 + $0x1f0] sm:$0xff] }
  0xbe   : > { %5254 = vmatmul.mubr.msk.bf16.vlgmr.msra.gmra.mrb[24].mxu0 %vm865_vm1, %v6379_v25  ;;  %5256 = vmatmul.mubr.msk.bf16.vlgmr.msra.gmra.mrb[24].mxu1 %vm865_vm1, %v6379_v25  ;;  %v5291_v55 = vld [vmem:[%s6358_s29 + $0x270] sm:$0xff] }
  0xbf   : > { %1541 = vmatpush1.bf16.msra.mxu0 %v5193_v60  ;;  %1582 = vmatpush1.bf16.msra.mxu1 %v5195_v61  ;;  %v5299_v60 = vld [vmem:[%s6358_s29 + $0x2b0] sm:$0x33]  ;;  %v5300_v61 = vld [vmem:[%s6358_s29 + $0x2b8] sm:$0x33] }
  0xc0   : > { %5257 = vmatprep.subr.msk.bf16.mxu0 %vm869_vm0, %v5226_v62  ;;  %5259 = vmatprep.subr.msk.bf16.mxu1 %vm869_vm0, %v5228_v1  ;;  %v5321_v62 = vcombine.low %v5267_v52, %v5283_v53  ;;  %v5354_v1 = vcombine.high %v5299_v60, %v5299_v60  ;;  %v5353_v2 = vcombine.low %v5299_v60, %v5299_v60 }
  0xc1   : > { %1572 = vmatprep.mubr.bf16.mxu0 %v5909_v0  ;;  %1613 = vmatprep.mubr.bf16.mxu1 %v5909_v0  ;;  %v5356_v3 = vcombine.high %v5300_v61, %v5300_v61  ;;  %v5355_v4 = vcombine.low %v5300_v61, %v5300_v61 }
  0xc3   : > { %1543 = vmatpush1.bf16.msra.mxu0 %v955_v7  ;;  %1584 = vmatpush1.bf16.msra.mxu1 %v961_v9  ;;  %v5270_v7 = vld [vmem:[%s6358_s29 + $0x1c8] sm:$0xff]  ;;  %v1948_v9 = vsel %vm869_vm0, %v5353_v2, 0  ;;  %v1954_v11 = vsel %vm869_vm0, %v5355_v4, 0 }
  0xc4   : > { %2007 = vmatprep.subr.bf16.mxu0 %v5310_v8  ;;  %2048 = vmatprep.subr.bf16.mxu1 %v5312_v10  ;;  %v5286_v8 = vld [vmem:[%s6358_s29 + $0x248] sm:$0xff]  ;;  %v5326_v10 = vcombine.high %v5269_v5, %v5285_v6 }
  0xc5   : > { %v5328_v12 = vcombine.high %v5270_v7, %v5286_v8  ;;  %v5327_v16 = vcombine.low %v5270_v7, %v5286_v8  ;;  %v5405_v7 = vld [vmem:[%s6358_s29 + $0x300] sm:$0xff] }
  0xc6   : > { %5258 = vmatmul.mubr.msk.bf16.vlgmr.msra.gmra.mrb[28].mxu0 %vm865_vm1, %v6379_v25  ;;  %5260 = vmatmul.mubr.msk.bf16.vlgmr.msra.gmra.mrb[28].mxu1 %vm865_vm1, %v6379_v25  ;;  %v5421_v8 = vld [vmem:[%s6358_s29 + $0x380] sm:$0xff] }
  0xc7   : > { %2008 = vmatpush1.bf16.msra.mxu0 %v5309_v13  ;;  %2049 = vmatpush1.bf16.msra.mxu1 %v5311_v14  ;;  %v5301_v13 = vld [vmem:[%s6358_s29 + $0x2c0] sm:$0x33]  ;;  %v5302_v14 = vld [vmem:[%s6358_s29 + $0x2c8] sm:$0x33] }
  0xc8   : > { %5373 = vmatprep.subr.msk.bf16.mxu0 %vm869_vm0, %v5342_v15  ;;  %5375 = vmatprep.subr.msk.bf16.mxu1 %vm869_vm0, %v5344_v17  ;;  %v5325_v15 = vcombine.low %v5269_v5, %v5285_v6  ;;  %v5358_v17 = vcombine.high %v5301_v13, %v5301_v13  ;;  %v5357_v18 = vcombine.low %v5301_v13, %v5301_v13 }
  0xc9   : > { %2039 = vmatprep.mubr.bf16.mxu0 %v5909_v0  ;;  %2080 = vmatprep.mubr.bf16.mxu1 %v5909_v0  ;;  %v5360_v19 = vcombine.high %v5302_v14, %v5302_v14  ;;  %v5359_v20 = vcombine.low %v5302_v14, %v5302_v14 }
  0xcb   : > { %2010 = vmatpush1.bf16.msra.mxu0 %v1912_v23  ;;  %2051 = vmatpush1.bf16.msra.mxu1 %v1918_v26  ;;  %v5272_v23 = vld [vmem:[%s6358_s29 + $0x1d8] sm:$0xff]  ;;  %v1960_v26 = vsel %vm869_vm0, %v5357_v18, 0  ;;  %v1966_v28 = vsel %vm869_vm0, %v5359_v20, 0 }
  0xcc   : > { %2089 = vmatprep.subr.bf16.mxu0 %v5314_v24  ;;  %2130 = vmatprep.subr.bf16.mxu1 %v5316_v27  ;;  %v5288_v24 = vld [vmem:[%s6358_s29 + $0x258] sm:$0xff]  ;;  %v5330_v27 = vcombine.high %v5271_v21, %v5287_v22 }
  0xcd   : > { %v5332_v29 = vcombine.high %v5272_v23, %v5288_v24  ;;  %v5331_v33 = vcombine.low %v5272_v23, %v5288_v24  ;;  %v5407_v23 = vld [vmem:[%s6358_s29 + $0x310] sm:$0xff] }
  0xce   : > { %5374 = vmatmul.mubr.msk.bf16.vlgmr.msra.gmra.mrb[32].mxu0 %vm865_vm1, %v6379_v25  ;;  %5376 = vmatmul.mubr.msk.bf16.vlgmr.msra.gmra.mrb[32].mxu1 %vm865_vm1, %v6379_v25  ;;  %v5423_v24 = vld [vmem:[%s6358_s29 + $0x390] sm:$0xff] }
  0xcf   : > { %2090 = vmatpush1.bf16.msra.mxu0 %v5313_v30  ;;  %2131 = vmatpush1.bf16.msra.mxu1 %v5315_v31  ;;  %v5303_v30 = vld [vmem:[%s6358_s29 + $0x2d0] sm:$0x33]  ;;  %v5304_v31 = vld [vmem:[%s6358_s29 + $0x2d8] sm:$0x33] }
  0xd0   : > { %5377 = vmatprep.subr.msk.bf16.mxu0 %vm869_vm0, %v5346_v32  ;;  %5379 = vmatprep.subr.msk.bf16.mxu1 %vm869_vm0, %v5348_v34  ;;  %v5329_v32 = vcombine.low %v5271_v21, %v5287_v22  ;;  %v5362_v34 = vcombine.high %v5303_v30, %v5303_v30  ;;  %v5361_v35 = vcombine.low %v5303_v30, %v5303_v30 }
  0xd1   : > { %2121 = vmatprep.mubr.bf16.mxu0 %v5909_v0  ;;  %2162 = vmatprep.mubr.bf16.mxu1 %v5909_v0  ;;  %v5364_v36 = vcombine.high %v5304_v31, %v5304_v31  ;;  %v5363_v37 = vcombine.low %v5304_v31, %v5304_v31 }
  0xd3   : > { %2092 = vmatpush1.bf16.msra.mxu0 %v1924_v40  ;;  %2133 = vmatpush1.bf16.msra.mxu1 %v1930_v42  ;;  %v5274_v40 = vld [vmem:[%s6358_s29 + $0x1e8] sm:$0xff]  ;;  %v1972_v42 = vsel %vm869_vm0, %v5361_v35, 0  ;;  %v1978_v44 = vsel %vm869_vm0, %v5363_v37, 0 }
  0xd4   : > { %2171 = vmatprep.subr.bf16.mxu0 %v5318_v41  ;;  %2212 = vmatprep.subr.bf16.mxu1 %v5320_v43  ;;  %v5290_v41 = vld [vmem:[%s6358_s29 + $0x268] sm:$0xff]  ;;  %v5334_v43 = vcombine.high %v5273_v38, %v5289_v39 }
  0xd5   : > { %v5336_v45 = vcombine.high %v5274_v40, %v5290_v41  ;;  %v5335_v49 = vcombine.low %v5274_v40, %v5290_v41  ;;  %v5409_v40 = vld [vmem:[%s6358_s29 + $0x320] sm:$0xff] }
  0xd6   : > { %5378 = vmatmul.mubr.msk.bf16.vlgmr.msra.gmra.mrb[36].mxu0 %vm865_vm1, %v6379_v25  ;;  %5380 = vmatmul.mubr.msk.bf16.vlgmr.msra.gmra.mrb[36].mxu1 %vm865_vm1, %v6379_v25  ;;  %v5425_v41 = vld [vmem:[%s6358_s29 + $0x3a0] sm:$0xff] }
  0xd7   : > { %2172 = vmatpush1.bf16.msra.mxu0 %v5317_v46  ;;  %2213 = vmatpush1.bf16.msra.mxu1 %v5319_v47  ;;  %v5305_v46 = vld [vmem:[%s6358_s29 + $0x2e0] sm:$0x33]  ;;  %v5306_v47 = vld [vmem:[%s6358_s29 + $0x2e8] sm:$0x33] }
  0xd8   : > { %5381 = vmatprep.subr.msk.bf16.mxu0 %vm869_vm0, %v5350_v48  ;;  %5383 = vmatprep.subr.msk.bf16.mxu1 %vm869_vm0, %v5352_v50  ;;  %v5333_v48 = vcombine.low %v5273_v38, %v5289_v39  ;;  %v5366_v50 = vcombine.high %v5305_v46, %v5305_v46  ;;  %v5365_v51 = vcombine.low %v5305_v46, %v5305_v46 }
  0xd9   : > { %2203 = vmatprep.mubr.bf16.mxu0 %v5909_v0  ;;  %2244 = vmatprep.mubr.bf16.mxu1 %v5909_v0  ;;  %v5368_v52 = vcombine.high %v5306_v47, %v5306_v47  ;;  %v5367_v53 = vcombine.low %v5306_v47, %v5306_v47 }
  0xdb   : > { %2174 = vmatpush1.bf16.msra.mxu0 %v1936_v56  ;;  %2215 = vmatpush1.bf16.msra.mxu1 %v1942_v58  ;;  %v5276_v56 = vld [vmem:[%s6358_s29 + $0x1f8] sm:$0xff]  ;;  %v1984_v58 = vsel %vm869_vm0, %v5365_v51, 0  ;;  %v1990_v60 = vsel %vm869_vm0, %v5367_v53, 0 }
  0xdc   : > { %2253 = vmatprep.subr.bf16.mxu0 %v5322_v57  ;;  %2294 = vmatprep.subr.bf16.mxu1 %v5324_v59  ;;  %v5292_v57 = vld [vmem:[%s6358_s29 + $0x278] sm:$0xff]  ;;  %v5338_v59 = vcombine.high %v5275_v54, %v5291_v55 }
  0xdd   : > { %v5340_v61 = vcombine.high %v5276_v56, %v5292_v57  ;;  %v5339_v2 = vcombine.low %v5276_v56, %v5292_v57  ;;  %v5411_v56 = vld [vmem:[%s6358_s29 + $0x330] sm:$0xff] }
  0xde   : > { %5382 = vmatmul.mubr.msk.bf16.vlgmr.msra.gmra.mrb[40].mxu0 %vm865_vm1, %v6379_v25  ;;  %5384 = vmatmul.mubr.msk.bf16.vlgmr.msra.gmra.mrb[40].mxu1 %vm865_vm1, %v6379_v25  ;;  %v5427_v57 = vld [vmem:[%s6358_s29 + $0x3b0] sm:$0xff] }
  0xdf   : > { %2254 = vmatpush1.bf16.msra.mxu0 %v5321_v62  ;;  %2295 = vmatpush1.bf16.msra.mxu1 %v5323_v63  ;;  %v5307_v62 = vld [vmem:[%s6358_s29 + $0x2f0] sm:$0x33]  ;;  %v5308_v63 = vld [vmem:[%s6358_s29 + $0x2f8] sm:$0x33] }
  0xe0   : > { %5385 = vmatprep.subr.msk.bf16.mxu0 %vm869_vm0, %v5354_v1  ;;  %5387 = vmatprep.subr.msk.bf16.mxu1 %vm869_vm0, %v5356_v3  ;;  %v5337_v1 = vcombine.low %v5275_v54, %v5291_v55  ;;  %v5370_v3 = vcombine.high %v5307_v62, %v5307_v62  ;;  %v5369_v4 = vcombine.low %v5307_v62, %v5307_v62 }
  0xe1   : > { %2285 = vmatprep.mubr.bf16.mxu0 %v5909_v0  ;;  %2326 = vmatprep.mubr.bf16.mxu1 %v5909_v0  ;;  %v5372_v5 = vcombine.high %v5308_v63, %v5308_v63  ;;  %v5371_v6 = vcombine.low %v5308_v63, %v5308_v63 }
  0xe3   : > { %2256 = vmatpush1.bf16.msra.mxu0 %v1948_v9  ;;  %2297 = vmatpush1.bf16.msra.mxu1 %v1954_v11  ;;  %v5406_v9 = vld [vmem:[%s6358_s29 + $0x308] sm:$0xff]  ;;  %v1996_v11 = vsel %vm869_vm0, %v5369_v4, 0  ;;  %v2002_v13 = vsel %vm869_vm0, %v5371_v6, 0 }
  0xe4   : > { %2335 = vmatprep.subr.bf16.mxu0 %v5326_v10  ;;  %2376 = vmatprep.subr.bf16.mxu1 %v5328_v12  ;;  %v5422_v10 = vld [vmem:[%s6358_s29 + $0x388] sm:$0xff]  ;;  %v5454_v12 = vcombine.high %v5405_v7, %v5421_v8 }
  0xe5   : > { %v5456_v14 = vcombine.high %v5406_v9, %v5422_v10  ;;  %v5455_v18 = vcombine.low %v5406_v9, %v5422_v10  ;;  %v5429_v9 = vld [vmem:[%s6358_s29 + $0x3c0] sm:$0xff] }
  0xe6   : > { %5386 = vmatmul.mubr.msk.bf16.vlgmr.msra.gmra.mrb[44].mxu0 %vm865_vm1, %v6379_v25  ;;  %5388 = vmatmul.mubr.msk.bf16.vlgmr.msra.gmra.mrb[44].mxu1 %vm865_vm1, %v6379_v25  ;;  %v6674_v10 = vld [vmem:[%s7390_s1] sm:$0x7] }
  0xe7   : > { %2336 = vmatpush1.bf16.msra.mxu0 %v5325_v15  ;;  %2377 = vmatpush1.bf16.msra.mxu1 %v5327_v16  ;;  %v5437_v15 = vld [vmem:[%s6358_s29 + $0x400] sm:$0x33]  ;;  %v5438_v16 = vld [vmem:[%s6358_s29 + $0x408] sm:$0x33] }
  0xe8   : > { %5389 = vmatprep.subr.msk.bf16.mxu0 %vm869_vm0, %v5358_v17  ;;  %5391 = vmatprep.subr.msk.bf16.mxu1 %vm869_vm0, %v5360_v19  ;;  %v5453_v17 = vcombine.low %v5405_v7, %v5421_v8  ;;  %v5486_v19 = vcombine.high %v5437_v15, %v5437_v15  ;;  %v5485_v20 = vcombine.low %v5437_v15, %v5437_v15  ;;  %v5413_v8 = vld [vmem:[%s6358_s29 + $0x340] sm:$0xff] }
  0xe9   : > { %2367 = vmatprep.mubr.bf16.mxu0 %v5909_v0  ;;  %2408 = vmatprep.mubr.bf16.mxu1 %v5909_v0  ;;  %v5488_v21 = vcombine.high %v5438_v16, %v5438_v16  ;;  %v5487_v22 = vcombine.low %v5438_v16, %v5438_v16 }
  0xeb   : > { %2338 = vmatpush1.bf16.msra.mxu0 %v1960_v26  ;;  %2379 = vmatpush1.bf16.msra.mxu1 %v1966_v28  ;;  %v5408_v26 = vld [vmem:[%s6358_s29 + $0x318] sm:$0xff]  ;;  %v2985_v28 = vsel %vm869_vm0, %v5485_v20, 0  ;;  %v2991_v30 = vsel %vm869_vm0, %v5487_v22, 0 }
  0xec   : > { %2417 = vmatprep.subr.bf16.mxu0 %v5330_v27  ;;  %2458 = vmatprep.subr.bf16.mxu1 %v5332_v29  ;;  %v5424_v27 = vld [vmem:[%s6358_s29 + $0x398] sm:$0xff]  ;;  %v5458_v29 = vcombine.high %v5407_v23, %v5423_v24 }
  0xed   : > { %v5460_v31 = vcombine.high %v5408_v26, %v5424_v27  ;;  %v5459_v35 = vcombine.low %v5408_v26, %v5424_v27  ;;  %v5415_v27 = vld [vmem:[%s6358_s29 + $0x350] sm:$0xff] }
  0xee   : > { %5390 = vmatmul.mubr.msk.bf16.vlgmr.msra.gmra.mrb[48].mxu0 %vm865_vm1, %v6379_v25  ;;  %5392 = vmatmul.mubr.msk.bf16.vlgmr.msra.gmra.mrb[48].mxu1 %vm865_vm1, %v6379_v25 }
  0xef   : > { %2418 = vmatpush1.bf16.msra.mxu0 %v5329_v32  ;;  %2459 = vmatpush1.bf16.msra.mxu1 %v5331_v33  ;;  %v5439_v32 = vld [vmem:[%s6358_s29 + $0x410] sm:$0x33]  ;;  %v5440_v33 = vld [vmem:[%s6358_s29 + $0x418] sm:$0x33] }
  0xf0   : > { %5393 = vmatprep.subr.msk.bf16.mxu0 %vm869_vm0, %v5362_v34  ;;  %5395 = vmatprep.subr.msk.bf16.mxu1 %vm869_vm0, %v5364_v36  ;;  %v5457_v34 = vcombine.low %v5407_v23, %v5423_v24  ;;  %v5490_v36 = vcombine.high %v5439_v32, %v5439_v32  ;;  %v5489_v37 = vcombine.low %v5439_v32, %v5439_v32  ;;  %v4841_v23 = vld [vmem:[%s7391_s2] sm:$0x1f] }
  0xf1   : > { %2449 = vmatprep.mubr.bf16.mxu0 %v5909_v0  ;;  %2490 = vmatprep.mubr.bf16.mxu1 %v5909_v0  ;;  %v5492_v38 = vcombine.high %v5440_v33, %v5440_v33  ;;  %v5491_v39 = vcombine.low %v5440_v33, %v5440_v33 }
  0xf2   : > { %4844 = vperm.xlu0 %5755, %v4841_v23  }
  0xf3   : > { %2420 = vmatpush1.bf16.msra.mxu0 %v1972_v42  ;;  %2461 = vmatpush1.bf16.msra.mxu1 %v1978_v44  ;;  %v5410_v42 = vld [vmem:[%s6358_s29 + $0x328] sm:$0xff]  ;;  %v2997_v44 = vsel %vm869_vm0, %v5489_v37, 0  ;;  %v3003_v46 = vsel %vm869_vm0, %v5491_v39, 0 }
  0xf4   : > { %2499 = vmatprep.subr.bf16.mxu0 %v5334_v43  ;;  %2540 = vmatprep.subr.bf16.mxu1 %v5336_v45  ;;  %v5426_v43 = vld [vmem:[%s6358_s29 + $0x3a8] sm:$0xff]  ;;  %v5462_v45 = vcombine.high %v5409_v40, %v5425_v41 }
  0xf5   : > { %v5464_v47 = vcombine.high %v5410_v42, %v5426_v43  ;;  %v5463_v51 = vcombine.low %v5410_v42, %v5426_v43  ;;  %v5417_v43 = vld [vmem:[%s6358_s29 + $0x360] sm:$0xff] }
  0xf6   : > { %5394 = vmatmul.mubr.msk.bf16.vlgmr.msra.gmra.mrb[52].mxu0 %vm865_vm1, %v6379_v25  ;;  %5396 = vmatmul.mubr.msk.bf16.vlgmr.msra.gmra.mrb[52].mxu1 %vm865_vm1, %v6379_v25 }
  0xf7   : > { %2500 = vmatpush1.bf16.msra.mxu0 %v5333_v48  ;;  %2541 = vmatpush1.bf16.msra.mxu1 %v5335_v49  ;;  %v5441_v48 = vld [vmem:[%s6358_s29 + $0x420] sm:$0x33]  ;;  %v5442_v49 = vld [vmem:[%s6358_s29 + $0x428] sm:$0x33] }
  0xf8   : > { %5397 = vmatprep.subr.msk.bf16.mxu0 %vm869_vm0, %v5366_v50  ;;  %5399 = vmatprep.subr.msk.bf16.mxu1 %vm869_vm0, %v5368_v52  ;;  %v5461_v50 = vcombine.low %v5409_v40, %v5425_v41  ;;  %v5494_v52 = vcombine.high %v5441_v48, %v5441_v48  ;;  %v5493_v53 = vcombine.low %v5441_v48, %v5441_v48 }
  0xf9   : > { %2531 = vmatprep.mubr.bf16.mxu0 %v5909_v0  ;;  %2572 = vmatprep.mubr.bf16.mxu1 %v5909_v0  ;;  %v5496_v54 = vcombine.high %v5442_v49, %v5442_v49  ;;  %v5495_v55 = vcombine.low %v5442_v49, %v5442_v49 }
  0xfb   : > { %2502 = vmatpush1.bf16.msra.mxu0 %v1984_v58  ;;  %2543 = vmatpush1.bf16.msra.mxu1 %v1990_v60  ;;  %v5412_v58 = vld [vmem:[%s6358_s29 + $0x338] sm:$0xff]  ;;  %v3009_v60 = vsel %vm869_vm0, %v5493_v53, 0  ;;  %v3015_v62 = vsel %vm869_vm0, %v5495_v55, 0 }
  0xfc   : > { %2581 = vmatprep.subr.bf16.mxu0 %v5338_v59  ;;  %2622 = vmatprep.subr.bf16.mxu1 %v5340_v61  ;;  %v5428_v59 = vld [vmem:[%s6358_s29 + $0x3b8] sm:$0xff]  ;;  %v5466_v61 = vcombine.high %v5411_v56, %v5427_v57 }
  0xfd   : > { %v5468_v63 = vcombine.high %v5412_v58, %v5428_v59 }
  0xfe   : > { %5398 = vmatmul.mubr.msk.bf16.vlgmr.msra.gmra.mrb[56].mxu0 %vm865_vm1, %v6379_v25  ;;  %5400 = vmatmul.mubr.msk.bf16.vlgmr.msra.gmra.mrb[56].mxu1 %vm865_vm1, %v6379_v25 }
  0xff   : > { %2582 = vmatpush1.bf16.msra.mxu0 %v5337_v1  ;;  %2623 = vmatpush1.bf16.msra.mxu1 %v5339_v2  ;;  %v5443_v1 = vld [vmem:[%s6358_s29 + $0x430] sm:$0x33]  ;;  %v5465_v2 = vcombine.low %v5411_v56, %v5427_v57 }
 0x100   : > { %5401 = vmatprep.subr.msk.bf16.mxu0 %vm869_vm0, %v5370_v3  ;;  %5403 = vmatprep.subr.msk.bf16.mxu1 %vm869_vm0, %v5372_v5  ;;  %v5467_v3 = vcombine.low %v5412_v58, %v5428_v59  ;;  %v5498_v4 = vcombine.high %v5443_v1, %v5443_v1  ;;  %v5497_v5 = vcombine.low %v5443_v1, %v5443_v1  ;;  %v5419_v59 = vld [vmem:[%s6358_s29 + $0x370] sm:$0xff] }
 0x101   : > { %2613 = vmatprep.mubr.bf16.mxu0 %v5909_v0  ;;  %2654 = vmatprep.mubr.bf16.mxu1 %v5909_v0 }
 0x103   : > { %2584 = vmatpush1.bf16.msra.mxu0 %v1996_v11  ;;  %2625 = vmatpush1.bf16.msra.mxu1 %v2002_v13  ;;  %v5414_v11 = vld [vmem:[%s6358_s29 + $0x348] sm:$0xff]  ;;  %v3021_v13 = vsel %vm869_vm0, %v5497_v5, 0 }
 0x104   : > { %3080 = vmatprep.subr.bf16.mxu0 %v5454_v12  ;;  %3121 = vmatprep.subr.bf16.mxu1 %v5456_v14  ;;  %v5430_v12 = vld [vmem:[%s6358_s29 + $0x3c8] sm:$0xff]  ;;  %v5470_v14 = vcombine.high %v5413_v8, %v5429_v9 }
 0x105   : > { %v5472_v16 = vcombine.high %v5414_v11, %v5430_v12  ;;  %v5471_v20 = vcombine.low %v5414_v11, %v5430_v12  ;;  %v5549_v12 = vld [vmem:[%s6358_s29 + $0x480] sm:$0xff] }
 0x106   : > { %5402 = vmatmul.mubr.msk.bf16.vlgmr.msra.gmra.mrb[60].mxu0 %vm865_vm1, %v6379_v25  ;;  %5404 = vmatmul.mubr.msk.bf16.vlgmr.msra.gmra.mrb[60].mxu1 %vm865_vm1, %v6379_v25 }
 0x107   : > { %3081 = vmatpush1.bf16.msra.mxu0 %v5453_v17  ;;  %3122 = vmatpush1.bf16.msra.mxu1 %v5455_v18  ;;  %v5445_v17 = vld [vmem:[%s6358_s29 + $0x440] sm:$0x33]  ;;  %v5446_v18 = vld [vmem:[%s6358_s29 + $0x448] sm:$0x33] }
 0x108   : > { %5517 = vmatprep.subr.msk.bf16.mxu0 %vm869_vm0, %v5486_v19  ;;  %5519 = vmatprep.subr.msk.bf16.mxu1 %vm869_vm0, %v5488_v21  ;;  %v5469_v19 = vcombine.low %v5413_v8, %v5429_v9  ;;  %v5502_v21 = vcombine.high %v5445_v17, %v5445_v17  ;;  %v5501_v22 = vcombine.low %v5445_v17, %v5445_v17 }
 0x109   : > { %3112 = vmatprep.mubr.bf16.mxu0 %v5909_v0  ;;  %3153 = vmatprep.mubr.bf16.mxu1 %v5909_v0  ;;  %v5504_v24 = vcombine.high %v5446_v18, %v5446_v18  ;;  %v5503_v26 = vcombine.low %v5446_v18, %v5446_v18 }
 0x10b   : > { %3083 = vmatpush1.bf16.msra.mxu0 %v2985_v28  ;;  %3124 = vmatpush1.bf16.msra.mxu1 %v2991_v30  ;;  %v5431_v28 = vld [vmem:[%s6358_s29 + $0x3d0] sm:$0xff]  ;;  %v5432_v30 = vld [vmem:[%s6358_s29 + $0x3d8] sm:$0xff]  ;;  %v3039_v33 = vsel %vm869_vm0, %v5503_v26, 0 }
 0x10c   : > { %3162 = vmatprep.subr.bf16.mxu0 %v5458_v29  ;;  %3203 = vmatprep.subr.bf16.mxu1 %v5460_v31  ;;  %v5416_v29 = vld [vmem:[%s6358_s29 + $0x358] sm:$0xff]  ;;  %v3033_v31 = vsel %vm869_vm0, %v5501_v22, 0  ;;  %v5474_v32 = vcombine.high %v5415_v27, %v5431_v28  ;;  %v5473_v37 = vcombine.low %v5415_v27, %v5431_v28 }
 0x10e   : > { %5518 = vmatmul.mubr.msk.bf16.vlgmr.msra.gmra.mrb[64].mxu0 %vm865_vm1, %v6379_v25  ;;  %5520 = vmatmul.mubr.msk.bf16.vlgmr.msra.gmra.mrb[64].mxu1 %vm865_vm1, %v6379_v25 }
 0x10f   : > { %3163 = vmatpush1.bf16.msra.mxu0 %v5457_v34  ;;  %3204 = vmatpush1.bf16.msra.mxu1 %v5459_v35  ;;  %v5476_v34 = vcombine.high %v5416_v29, %v5432_v30  ;;  %v5447_v35 = vld [vmem:[%s6358_s29 + $0x450] sm:$0x33] }
 0x110   : > { %5521 = vmatprep.subr.msk.bf16.mxu0 %vm869_vm0, %v5490_v36  ;;  %5523 = vmatprep.subr.msk.bf16.mxu1 %vm869_vm0, %v5492_v38  ;;  %v5448_v36 = vld [vmem:[%s6358_s29 + $0x458] sm:$0x33]  ;;  %v5475_v38 = vcombine.low %v5416_v29, %v5432_v30  ;;  %v5506_v39 = vcombine.high %v5447_v35, %v5447_v35  ;;  %v5505_v40 = vcombine.low %v5447_v35, %v5447_v35  ;;  %v5551_v29 = vld [vmem:[%s6358_s29 + $0x490] sm:$0xff] }
 0x111   : > { %3194 = vmatprep.mubr.bf16.mxu0 %v5909_v0  ;;  %3235 = vmatprep.mubr.bf16.mxu1 %v5909_v0  ;;  %v5508_v41 = vcombine.high %v5448_v36, %v5448_v36  ;;  %v5507_v42 = vcombine.low %v5448_v36, %v5448_v36  ;;  %v5567_v30 = vld [vmem:[%s6358_s29 + $0x510] sm:$0xff] }
 0x113   : > { %3165 = vmatpush1.bf16.msra.mxu0 %v2997_v44  ;;  %3206 = vmatpush1.bf16.msra.mxu1 %v3003_v46  ;;  %v5433_v44 = vld [vmem:[%s6358_s29 + $0x3e0] sm:$0xff]  ;;  %v5434_v46 = vld [vmem:[%s6358_s29 + $0x3e8] sm:$0xff]  ;;  %v3051_v49 = vsel %vm869_vm0, %v5507_v42, 0 }
 0x114   : > { %3244 = vmatprep.subr.bf16.mxu0 %v5462_v45  ;;  %3285 = vmatprep.subr.bf16.mxu1 %v5464_v47  ;;  %v5418_v45 = vld [vmem:[%s6358_s29 + $0x368] sm:$0xff]  ;;  %v3045_v47 = vsel %vm869_vm0, %v5505_v40, 0  ;;  %v5478_v48 = vcombine.high %v5417_v43, %v5433_v44  ;;  %v5477_v53 = vcombine.low %v5417_v43, %v5433_v44 }
 0x116   : > { %5522 = vmatmul.mubr.msk.bf16.vlgmr.msra.gmra.mrb[68].mxu0 %vm865_vm1, %v6379_v25  ;;  %5524 = vmatmul.mubr.msk.bf16.vlgmr.msra.gmra.mrb[68].mxu1 %vm865_vm1, %v6379_v25  ;;  %v5444_v25 = vld [vmem:[%s6358_s29 + $0x438] sm:$0x33] }
 0x117   : > { %3245 = vmatpush1.bf16.msra.mxu0 %v5461_v50  ;;  %3286 = vmatpush1.bf16.msra.mxu1 %v5463_v51  ;;  %v5500_v6 = vcombine.high %v5444_v25, %v5444_v25  ;;  %v5499_v7 = vcombine.low %v5444_v25, %v5444_v25  ;;  %v5480_v50 = vcombine.high %v5418_v45, %v5434_v46  ;;  %v5449_v51 = vld [vmem:[%s6358_s29 + $0x460] sm:$0x33] }
 0x118   : > { %5525 = vmatprep.subr.msk.bf16.mxu0 %vm869_vm0, %v5494_v52  ;;  %5527 = vmatprep.subr.msk.bf16.mxu1 %vm869_vm0, %v5496_v54  ;;  %v5450_v52 = vld [vmem:[%s6358_s29 + $0x468] sm:$0x33]  ;;  %v5479_v54 = vcombine.low %v5418_v45, %v5434_v46  ;;  %v5510_v55 = vcombine.high %v5449_v51, %v5449_v51  ;;  %v5509_v56 = vcombine.low %v5449_v51, %v5449_v51  ;;  %v5553_v45 = vld [vmem:[%s6358_s29 + $0x4a0] sm:$0xff] }
 0x119   : > { %3276 = vmatprep.mubr.bf16.mxu0 %v5909_v0  ;;  %3317 = vmatprep.mubr.bf16.mxu1 %v5909_v0  ;;  %v3027_v15 = vsel %vm869_vm0, %v5499_v7, 0  ;;  %v5512_v57 = vcombine.high %v5450_v52, %v5450_v52  ;;  %v5511_v58 = vcombine.low %v5450_v52, %v5450_v52  ;;  %v5569_v46 = vld [vmem:[%s6358_s29 + $0x520] sm:$0xff] }
 0x11b   : > { %3247 = vmatpush1.bf16.msra.mxu0 %v3009_v60  ;;  %3288 = vmatpush1.bf16.msra.mxu1 %v3015_v62  ;;  %v5435_v60 = vld [vmem:[%s6358_s29 + $0x3f0] sm:$0xff]  ;;  %v5436_v62 = vld [vmem:[%s6358_s29 + $0x3f8] sm:$0xff]  ;;  %v3063_v25 = vsel %vm869_vm0, %v5511_v58, 0 }
 0x11c   : > { %3326 = vmatprep.subr.bf16.mxu0 %v5466_v61  ;;  %3367 = vmatprep.subr.bf16.mxu1 %v5468_v63  ;;  %v5420_v61 = vld [vmem:[%s6358_s29 + $0x378] sm:$0xff]  ;;  %v3057_v63 = vsel %vm869_vm0, %v5509_v56, 0  ;;  %v5482_v1 = vcombine.high %v5419_v59, %v5435_v60  ;;  %v5481_v5 = vcombine.low %v5419_v59, %v5435_v60 }
 0x11e   : > { %5526 = vmatmul.mubr.msk.bf16.vlgmr.msra.gmra.mrb[72].mxu0 %vm865_vm1, %v6674_v10  ;;  %5528 = vmatmul.mubr.msk.bf16.vlgmr.msra.gmra.mrb[72].mxu1 %vm865_vm1, %v6674_v10 }
 0x11f   : > { %3327 = vmatpush1.bf16.msra.mxu0 %v5465_v2  ;;  %3368 = vmatpush1.bf16.msra.mxu1 %v5467_v3  ;;  %v5484_v2 = vcombine.high %v5420_v61, %v5436_v62  ;;  %v5451_v3 = vld [vmem:[%s6358_s29 + $0x470] sm:$0x33] }
 0x120   : > { %5529 = vmatprep.subr.msk.bf16.mxu0 %vm869_vm0, %v5498_v4  ;;  %5531 = vmatprep.subr.msk.bf16.mxu1 %vm869_vm0, %v5500_v6  ;;  %v5452_v4 = vld [vmem:[%s6358_s29 + $0x478] sm:$0x33]  ;;  %v5483_v6 = vcombine.low %v5420_v61, %v5436_v62  ;;  %v5514_v7 = vcombine.high %v5451_v3, %v5451_v3  ;;  %v5513_v8 = vcombine.low %v5451_v3, %v5451_v3  ;;  %v5555_v61 = vld [vmem:[%s6358_s29 + $0x4b0] sm:$0xff] }
 0x121   : > { %3358 = vmatprep.mubr.bf16.mxu0 %v5909_v0  ;;  %3399 = vmatprep.mubr.bf16.mxu1 %v5909_v0  ;;  %v5516_v9 = vcombine.high %v5452_v4, %v5452_v4  ;;  %v5515_v11 = vcombine.low %v5452_v4, %v5452_v4  ;;  %v5571_v62 = vld [vmem:[%s6358_s29 + $0x530] sm:$0xff] }
 0x123   : > { %3329 = vmatpush1.bf16.msra.mxu0 %v3021_v13  ;;  %3370 = vmatpush1.bf16.msra.mxu1 %v3027_v15  ;;  %v5565_v13 = vld [vmem:[%s6358_s29 + $0x500] sm:$0xff]  ;;  %v5566_v15 = vld [vmem:[%s6358_s29 + $0x508] sm:$0xff]  ;;  %v3075_v18 = vsel %vm869_vm0, %v5515_v11, 0 }
 0x124   : > { %3408 = vmatprep.subr.bf16.mxu0 %v5470_v14  ;;  %3449 = vmatprep.subr.bf16.mxu1 %v5472_v16  ;;  %v5550_v14 = vld [vmem:[%s6358_s29 + $0x488] sm:$0xff]  ;;  %v3069_v16 = vsel %vm869_vm0, %v5513_v8, 0  ;;  %v5598_v17 = vcombine.high %v5549_v12, %v5565_v13  ;;  %v5597_v22 = vcombine.low %v5549_v12, %v5565_v13 }
 0x125   : > { %v5599_v23 = vcombine.low %v5550_v14, %v5566_v15 }
 0x126   : > { %5530 = vmatmul.mubr.msk.bf16.vlgmr.msra.gmra.mrb[76].mxu0 %vm865_vm1, %v6674_v10  ;;  %5532 = vmatmul.mubr.msk.bf16.vlgmr.msra.gmra.mrb[76].mxu1 %vm865_vm1, %v6674_v10 }
 0x127   : > { %3409 = vmatpush1.bf16.msra.mxu0 %v5469_v19  ;;  %3450 = vmatpush1.bf16.msra.mxu1 %v5471_v20  ;;  %v5600_v19 = vcombine.high %v5550_v14, %v5566_v15  ;;  %v5581_v20 = vld [vmem:[%s6358_s29 + $0x580] sm:$0x33] }
 0x128   : > { %5533 = vmatprep.subr.msk.bf16.mxu0 %vm869_vm0, %v5502_v21  ;;  %5535 = vmatprep.subr.msk.bf16.mxu1 %vm869_vm0, %v5504_v24  ;;  %v5582_v21 = vld [vmem:[%s6358_s29 + $0x588] sm:$0x33]  ;;  %v5630_v24 = vcombine.high %v5581_v20, %v5581_v20  ;;  %v5629_v26 = vcombine.low %v5581_v20, %v5581_v20  ;;  %v5557_v14 = vld [vmem:[%s6358_s29 + $0x4c0] sm:$0xff] }
 0x129   : > { %3440 = vmatprep.mubr.bf16.mxu0 %v5909_v0  ;;  %3481 = vmatprep.mubr.bf16.mxu1 %v5909_v0  ;;  %v5632_v27 = vcombine.high %v5582_v21, %v5582_v21  ;;  %v5631_v28 = vcombine.low %v5582_v21, %v5582_v21  ;;  %v5573_v15 = vld [vmem:[%s6358_s29 + $0x540] sm:$0xff] }
 0x12b   : > { %3411 = vmatpush1.bf16.msra.mxu0 %v3033_v31  ;;  %3452 = vmatpush1.bf16.msra.mxu1 %v3039_v33  ;;  %v5552_v31 = vld [vmem:[%s6358_s29 + $0x498] sm:$0xff]  ;;  %v4058_v33 = vsel %vm869_vm0, %v5629_v26, 0  ;;  %v4064_v35 = vsel %vm869_vm0, %v5631_v28, 0 }
 0x12c   : > { %3490 = vmatprep.subr.bf16.mxu0 %v5474_v32  ;;  %3531 = vmatprep.subr.bf16.mxu1 %v5476_v34  ;;  %v5568_v32 = vld [vmem:[%s6358_s29 + $0x518] sm:$0xff]  ;;  %v5602_v34 = vcombine.high %v5551_v29, %v5567_v30 }
 0x12d   : > { %v5604_v36 = vcombine.high %v5552_v31, %v5568_v32  ;;  %v5603_v40 = vcombine.low %v5552_v31, %v5568_v32 }
 0x12e   : > { %5534 = vmatmul.mubr.msk.bf16.vlgmr.msra.gmra.mrb[80].mxu0 %vm865_vm1, %v6674_v10  ;;  %5536 = vmatmul.mubr.msk.bf16.vlgmr.msra.gmra.mrb[80].mxu1 %vm865_vm1, %v6674_v10 }
 0x12f   : > { %3491 = vmatpush1.bf16.msra.mxu0 %v5473_v37  ;;  %3532 = vmatpush1.bf16.msra.mxu1 %v5475_v38  ;;  %v5583_v37 = vld [vmem:[%s6358_s29 + $0x590] sm:$0x33]  ;;  %v5584_v38 = vld [vmem:[%s6358_s29 + $0x598] sm:$0x33] }
 0x130   : > { %5537 = vmatprep.subr.msk.bf16.mxu0 %vm869_vm0, %v5506_v39  ;;  %5539 = vmatprep.subr.msk.bf16.mxu1 %vm869_vm0, %v5508_v41  ;;  %v5601_v39 = vcombine.low %v5551_v29, %v5567_v30  ;;  %v5634_v41 = vcombine.high %v5583_v37, %v5583_v37  ;;  %v5633_v42 = vcombine.low %v5583_v37, %v5583_v37 }
 0x131   : > { %3522 = vmatprep.mubr.bf16.mxu0 %v5909_v0  ;;  %3563 = vmatprep.mubr.bf16.mxu1 %v5909_v0  ;;  %v5636_v43 = vcombine.high %v5584_v38, %v5584_v38  ;;  %v5635_v44 = vcombine.low %v5584_v38, %v5584_v38  ;;  %v5613_v30 = vcombine.low %v5557_v14, %v5573_v15 }
 0x133   : > { %3493 = vmatpush1.bf16.msra.mxu0 %v3045_v47  ;;  %3534 = vmatpush1.bf16.msra.mxu1 %v3051_v49  ;;  %v5554_v47 = vld [vmem:[%s6358_s29 + $0x4a8] sm:$0xff]  ;;  %v4070_v49 = vsel %vm869_vm0, %v5633_v42, 0  ;;  %v4076_v51 = vsel %vm869_vm0, %v5635_v44, 0  ;;  %v5576_v42 = vld [vmem:[%s6358_s29 + $0x558] sm:$0xff] }
 0x134   : > { %3572 = vmatprep.subr.bf16.mxu0 %v5478_v48  ;;  %3613 = vmatprep.subr.bf16.mxu1 %v5480_v50  ;;  %v5570_v48 = vld [vmem:[%s6358_s29 + $0x528] sm:$0xff]  ;;  %v5606_v50 = vcombine.high %v5553_v45, %v5569_v46 }
 0x135   : > { %v5608_v52 = vcombine.high %v5554_v47, %v5570_v48  ;;  %v5607_v56 = vcombine.low %v5554_v47, %v5570_v48  ;;  %v5591_v48 = vld [vmem:[%s6358_s29 + $0x5d0] sm:$0x33] }
 0x136   : > { %5538 = vmatmul.mubr.msk.bf16.vlgmr.msra.gmra.mrb[84].mxu0 %vm865_vm1, %v6674_v10  ;;  %5540 = vmatmul.mubr.msk.bf16.vlgmr.msra.gmra.mrb[84].mxu1 %vm865_vm1, %v6674_v10 }
 0x137   : > { %3573 = vmatpush1.bf16.msra.mxu0 %v5477_v53  ;;  %3614 = vmatpush1.bf16.msra.mxu1 %v5479_v54  ;;  %v5585_v53 = vld [vmem:[%s6358_s29 + $0x5a0] sm:$0x33]  ;;  %v5586_v54 = vld [vmem:[%s6358_s29 + $0x5a8] sm:$0x33] }
 0x138   : > { %5541 = vmatprep.subr.msk.bf16.mxu0 %vm869_vm0, %v5510_v55  ;;  %5543 = vmatprep.subr.msk.bf16.mxu1 %vm869_vm0, %v5512_v57  ;;  %v5605_v55 = vcombine.low %v5553_v45, %v5569_v46  ;;  %v5638_v57 = vcombine.high %v5585_v53, %v5585_v53  ;;  %v5637_v58 = vcombine.low %v5585_v53, %v5585_v53 }
 0x139   : > { %3604 = vmatprep.mubr.bf16.mxu0 %v5909_v0  ;;  %3645 = vmatprep.mubr.bf16.mxu1 %v5909_v0  ;;  %v5640_v59 = vcombine.high %v5586_v54, %v5586_v54  ;;  %v5639_v60 = vcombine.low %v5586_v54, %v5586_v54 }
 0x13b   : > { %3575 = vmatpush1.bf16.msra.mxu0 %v3057_v63  ;;  %3616 = vmatpush1.bf16.msra.mxu1 %v3063_v25  ;;  %v5556_v63 = vld [vmem:[%s6358_s29 + $0x4b8] sm:$0xff]  ;;  %v4082_v25 = vsel %vm869_vm0, %v5637_v58, 0  ;;  %v4088_v3 = vsel %vm869_vm0, %v5639_v60, 0  ;;  %v5650_v58 = vcombine.high %v5591_v48, %v5591_v48 }
 0x13c   : > { %3654 = vmatprep.subr.bf16.mxu0 %v5482_v1  ;;  %3695 = vmatprep.subr.bf16.mxu1 %v5484_v2  ;;  %v5572_v1 = vld [vmem:[%s6358_s29 + $0x538] sm:$0xff]  ;;  %v5610_v2 = vcombine.high %v5555_v61, %v5571_v62 }
 0x13d   : > { %v5612_v4 = vcombine.high %v5556_v63, %v5572_v1  ;;  %v5611_v8 = vcombine.low %v5556_v63, %v5572_v1  ;;  %v5561_v63 = vld [vmem:[%s6358_s29 + $0x4e0] sm:$0xff] }
 0x13e   : > { %5542 = vmatmul.mubr.msk.bf16.vlgmr.msra.gmra.mrb[88].mxu0 %vm865_vm1, %v6674_v10  ;;  %5544 = vmatmul.mubr.msk.bf16.vlgmr.msra.gmra.mrb[88].mxu1 %vm865_vm1, %v6674_v10  ;;  %v5577_v1 = vld [vmem:[%s6358_s29 + $0x560] sm:$0xff] }
 0x13f   : > { %3655 = vmatpush1.bf16.msra.mxu0 %v5481_v5  ;;  %3696 = vmatpush1.bf16.msra.mxu1 %v5483_v6  ;;  %v5587_v5 = vld [vmem:[%s6358_s29 + $0x5b0] sm:$0x33]  ;;  %v5588_v6 = vld [vmem:[%s6358_s29 + $0x5b8] sm:$0x33] }
 0x140   : > { %5545 = vmatprep.subr.msk.bf16.mxu0 %vm869_vm0, %v5514_v7  ;;  %5547 = vmatprep.subr.msk.bf16.mxu1 %vm869_vm0, %v5516_v9  ;;  %v5609_v7 = vcombine.low %v5555_v61, %v5571_v62  ;;  %v5642_v9 = vcombine.high %v5587_v5, %v5587_v5  ;;  %v5641_v11 = vcombine.low %v5587_v5, %v5587_v5 }
 0x141   : > { %3686 = vmatprep.mubr.bf16.mxu0 %v5909_v0  ;;  %3727 = vmatprep.mubr.bf16.mxu1 %v5909_v0  ;;  %v5644_v12 = vcombine.high %v5588_v6, %v5588_v6  ;;  %v5643_v13 = vcombine.low %v5588_v6, %v5588_v6 }
 0x143   : > { %3657 = vmatpush1.bf16.msra.mxu0 %v3069_v16  ;;  %3698 = vmatpush1.bf16.msra.mxu1 %v3075_v18  ;;  %v5558_v16 = vld [vmem:[%s6358_s29 + $0x4c8] sm:$0xff]  ;;  %v4094_v18 = vsel %vm869_vm0, %v5641_v11, 0  ;;  %v4100_v21 = vsel %vm869_vm0, %v5643_v13, 0 }
 0x144   : > { %4153 = vmatprep.subr.bf16.mxu0 %v5598_v17  ;;  %4194 = vmatprep.subr.bf16.mxu1 %v5600_v19  ;;  %v5574_v17 = vld [vmem:[%s6358_s29 + $0x548] sm:$0xff]  ;;  %v5614_v19 = vcombine.high %v5557_v14, %v5573_v15  ;;  %v5621_v15 = vcombine.low %v5561_v63, %v5577_v1 }
 0x146   : > { %5546 = vmatmul.mubr.msk.bf16.vlgmr.msra.gmra.mrb[92].mxu0 %vm865_vm1, %v6674_v10  ;;  %5548 = vmatmul.mubr.msk.bf16.vlgmr.msra.gmra.mrb[92].mxu1 %vm865_vm1, %v6674_v10 }
 0x147   : > { %4154 = vmatpush1.bf16.msra.mxu0 %v5597_v22  ;;  %4195 = vmatpush1.bf16.msra.mxu1 %v5599_v23  ;;  %v5616_v22 = vcombine.high %v5558_v16, %v5574_v17  ;;  %v5589_v23 = vld [vmem:[%s6358_s29 + $0x5c0] sm:$0x33] }
 0x148   : > { %5661 = vmatprep.subr.msk.bf16.mxu0 %vm869_vm0, %v5630_v24  ;;  %5663 = vmatprep.subr.msk.bf16.mxu1 %vm869_vm0, %v5632_v27  ;;  %v5590_v27 = vld [vmem:[%s6358_s29 + $0x5c8] sm:$0x33] }
 0x149   : > { %4185 = vmatprep.mubr.bf16.mxu0 %v5909_v0  ;;  %4226 = vmatprep.mubr.bf16.mxu1 %v5909_v0  ;;  %v5648_v37 = vcombine.high %v5590_v27, %v5590_v27  ;;  %v5647_v38 = vcombine.low %v5590_v27, %v5590_v27 }
 0x14b   : > { %4156 = vmatpush1.bf16.msra.mxu0 %v4058_v33  ;;  %4197 = vmatpush1.bf16.msra.mxu1 %v4064_v35  ;;  %v5615_v33 = vcombine.low %v5558_v16, %v5574_v17  ;;  %v5645_v35 = vcombine.low %v5589_v23, %v5589_v23  ;;  %v4112_v46 = vsel %vm869_vm0, %v5647_v38, 0  ;;  %v5595_v38 = vld [vmem:[%s6358_s29 + $0x5f0] sm:$0x33] }
 0x14c   : > { %4235 = vmatprep.subr.bf16.mxu0 %v5602_v34  ;;  %4276 = vmatprep.subr.bf16.mxu1 %v5604_v36  ;;  %v5646_v34 = vcombine.high %v5589_v23, %v5589_v23 }
 0x14e   : > { %5662 = vmatmul.mubr.msk.bf16.vlgmr.msra.gmra.mrb[96].mxu0 %vm865_vm1, %v6674_v10  ;;  %5664 = vmatmul.mubr.msk.bf16.vlgmr.msra.gmra.mrb[96].mxu1 %vm865_vm1, %v6674_v10 }
 0x14f   : > { %4236 = vmatpush1.bf16.msra.mxu0 %v5601_v39  ;;  %4277 = vmatpush1.bf16.msra.mxu1 %v5603_v40  ;;  %v5559_v39 = vld [vmem:[%s6358_s29 + $0x4d0] sm:$0xff] }
 0x150   : > { %5665 = vmatprep.subr.msk.bf16.mxu0 %vm869_vm0, %v5634_v41  ;;  %5667 = vmatprep.subr.msk.bf16.mxu1 %vm869_vm0, %v5636_v43  ;;  %v5575_v40 = vld [vmem:[%s6358_s29 + $0x550] sm:$0xff]  ;;  %v5560_v41 = vld [vmem:[%s6358_s29 + $0x4d8] sm:$0xff]  ;;  %v4106_v43 = vsel %vm869_vm0, %v5645_v35, 0 }
 0x151   : > { %4267 = vmatprep.mubr.bf16.mxu0 %v5909_v0  ;;  %4308 = vmatprep.mubr.bf16.mxu1 %v5909_v0  ;;  %v5618_v44 = vcombine.high %v5559_v39, %v5575_v40  ;;  %v5620_v47 = vcombine.high %v5560_v41, %v5576_v42  ;;  %v5617_v54 = vcombine.low %v5559_v39, %v5575_v40 }
 0x153   : > { %4238 = vmatpush1.bf16.msra.mxu0 %v4070_v49  ;;  %4279 = vmatpush1.bf16.msra.mxu1 %v4076_v51  ;;  %v5592_v51 = vld [vmem:[%s6358_s29 + $0x5d8] sm:$0x33] }
 0x154   : > { %4317 = vmatprep.subr.bf16.mxu0 %v5606_v50  ;;  %4358 = vmatprep.subr.bf16.mxu1 %v5608_v52  ;;  %v5652_v61 = vcombine.high %v5592_v51, %v5592_v51  ;;  %v5651_v62 = vcombine.low %v5592_v51, %v5592_v51  ;;  %v5658_v51 = vcombine.high %v5595_v38, %v5595_v38 }
 0x156   : > { %5666 = vmatmul.mubr.msk.bf16.vlgmr.msra.gmra.mrb[100].mxu0 %vm865_vm1, %v6674_v10  ;;  %5668 = vmatmul.mubr.msk.bf16.vlgmr.msra.gmra.mrb[100].mxu1 %vm865_vm1, %v6674_v10  ;;  %v4124_v6 = vsel %vm869_vm0, %v5651_v62, 0 }
 0x157   : > { %4318 = vmatpush1.bf16.msra.mxu0 %v5605_v55  ;;  %4359 = vmatpush1.bf16.msra.mxu1 %v5607_v56 }
 0x158   : > { %5669 = vmatprep.subr.msk.bf16.mxu0 %vm869_vm0, %v5638_v57  ;;  %5671 = vmatprep.subr.msk.bf16.mxu1 %vm869_vm0, %v5640_v59  ;;  %v5619_v57 = vcombine.low %v5560_v41, %v5576_v42  ;;  %v5649_v59 = vcombine.low %v5591_v48, %v5591_v48  ;;  %v5596_v41 = vld [vmem:[%s6358_s29 + $0x5f8] sm:$0x33] }
 0x159   : > { %4349 = vmatprep.mubr.bf16.mxu0 %v5909_v0  ;;  %4390 = vmatprep.mubr.bf16.mxu1 %v5909_v0 }
 0x15b   : > { %4320 = vmatpush1.bf16.msra.mxu0 %v4082_v25  ;;  %4361 = vmatpush1.bf16.msra.mxu1 %v4088_v3  ;;  %v5562_v25 = vld [vmem:[%s6358_s29 + $0x4e8] sm:$0xff]  ;;  %v4118_v3 = vsel %vm869_vm0, %v5649_v59, 0 }
 0x15c   : > { %4399 = vmatprep.subr.bf16.mxu0 %v5610_v2  ;;  %4440 = vmatprep.subr.bf16.mxu1 %v5612_v4  ;;  %v5578_v2 = vld [vmem:[%s6358_s29 + $0x568] sm:$0xff]  ;;  %v5622_v4 = vcombine.high %v5561_v63, %v5577_v1 }
 0x15e   : > { %5670 = vmatmul.mubr.msk.bf16.vlgmr.msra.gmra.mrb[104].mxu0 %vm865_vm1, %v6674_v10  ;;  %5672 = vmatmul.mubr.msk.bf16.vlgmr.msra.gmra.mrb[104].mxu1 %vm865_vm1, %v6674_v10 }
 0x15f   : > { %4400 = vmatpush1.bf16.msra.mxu0 %v5609_v7  ;;  %4441 = vmatpush1.bf16.msra.mxu1 %v5611_v8  ;;  %v5624_v7 = vcombine.high %v5562_v25, %v5578_v2  ;;  %v5593_v8 = vld [vmem:[%s6358_s29 + $0x5e0] sm:$0x33] }
 0x160   : > { %5673 = vmatprep.subr.msk.bf16.mxu0 %vm869_vm0, %v5642_v9  ;;  %5675 = vmatprep.subr.msk.bf16.mxu1 %vm869_vm0, %v5644_v12  ;;  %v5594_v12 = vld [vmem:[%s6358_s29 + $0x5e8] sm:$0x33] }
 0x161   : > { %v6815_v20 = vpop.f32.mrb[0].mxu0  ;;  %4431 = vmatprep.mubr.bf16.mxu0 %v5909_v0  ;;  %v6821_v24 = vpop.f32.mrb[0].mxu1  ;;  %4472 = vmatprep.mubr.bf16.mxu1 %v5909_v0  ;;  %v5656_v23 = vcombine.high %v5594_v12, %v5594_v12  ;;  %v5655_v27 = vcombine.low %v5594_v12, %v5594_v12 }
 0x162   : > { %v6823_v26 = vpop.f32.mrb[1].mxu0  ;;  %v6827_v28 = vpop.f32.mrb[1].mxu1 }
 0x163   : > { %v1004_v29 = vpop.f32.mrb[2].mxu0  ;;  %4402 = vmatpush1.bf16.msra.mxu0 %v4094_v18  ;;  %v1045_v31 = vpop.f32.mrb[2].mxu1  ;;  %4443 = vmatpush1.bf16.msra.mxu1 %v4100_v21  ;;  %v5623_v18 = vcombine.low %v5562_v25, %v5578_v2  ;;  %v5653_v21 = vcombine.low %v5593_v8, %v5593_v8 }
 0x164   : > { %v1005_v32 = vpop.f32.mrb[3].mxu0  ;;  %4481 = vmatprep.subr.bf16.mxu0 %v5614_v19  ;;  %v1046_v36 = vpop.f32.mrb[3].mxu1  ;;  %4522 = vmatprep.subr.bf16.mxu1 %v5616_v22  ;;  %v5654_v19 = vcombine.high %v5593_v8, %v5593_v8  ;;  %v5563_v29 = vld [vmem:[%s6358_s29 + $0x4f0] sm:$0xff]  ;;  %v5564_v31 = vld [vmem:[%s6358_s29 + $0x4f8] sm:$0xff] }
 0x165   : > { %v5580_v32 = vld [vmem:[%s6358_s29 + $0x578] sm:$0xff]  ;;  %v4136_v36 = vsel %vm869_vm0, %v5655_v27, 0 }
 0x166   : > { %5674 = vmatmul.mubr.msk.bf16.vlgmr.msra.gmra.mrb[108].mxu0 %vm865_vm1, %v6674_v10  ;;  %5676 = vmatmul.mubr.msk.bf16.vlgmr.msra.gmra.mrb[108].mxu1 %vm865_vm1, %v6674_v10  ;;  %v5627_v48 = vcombine.low %v5564_v31, %v5580_v32 }
 0x167   : > { %4482 = vmatpush1.bf16.msra.mxu0 %v5613_v30  ;;  %4523 = vmatpush1.bf16.msra.mxu1 %v5615_v33  ;;  %v5579_v30 = vld [vmem:[%s6358_s29 + $0x570] sm:$0xff]  ;;  %v4130_v33 = vsel %vm869_vm0, %v5653_v21, 0 }
 0x168   : > { %5677 = vmatprep.subr.msk.bf16.mxu0 %vm869_vm0, %v5646_v34  ;;  %5679 = vmatprep.subr.msk.bf16.mxu1 %vm869_vm0, %v5648_v37  ;;  %v5626_v34 = vcombine.high %v5563_v29, %v5579_v30  ;;  %v5628_v37 = vcombine.high %v5564_v31, %v5580_v32 }
 0x169   : > { %v6839_v45 = vpop.f32.mrb[4].mxu0  ;;  %4513 = vmatprep.mubr.bf16.mxu0 %v5909_v0  ;;  %v6845_v49 = vpop.f32.mrb[4].mxu1  ;;  %4554 = vmatprep.mubr.bf16.mxu1 %v5909_v0 }
 0x16a   : > { %v6847_v50 = vpop.f32.mrb[5].mxu0  ;;  %v6851_v52 = vpop.f32.mrb[5].mxu1 }
 0x16b   : > { %v1086_v53 = vpop.f32.mrb[6].mxu0  ;;  %4484 = vmatpush1.bf16.msra.mxu0 %v4106_v43  ;;  %v1127_v55 = vpop.f32.mrb[6].mxu1  ;;  %4525 = vmatpush1.bf16.msra.mxu1 %v4112_v46 }
 0x16c   : > { %v1087_v56 = vpop.f32.mrb[7].mxu0  ;;  %4563 = vmatprep.subr.bf16.mxu0 %v5618_v44  ;;  %v1128_v60 = vpop.f32.mrb[7].mxu1  ;;  %4604 = vmatprep.subr.bf16.mxu1 %v5620_v47  ;;  %v5625_v44 = vcombine.low %v5563_v29, %v5579_v30  ;;  %v5657_v53 = vcombine.low %v5595_v38, %v5595_v38  ;;  %v5660_v55 = vcombine.high %v5596_v41, %v5596_v41 }
 0x16d   : > { %v5659_v56 = vcombine.low %v5596_v41, %v5596_v41 }
 0x16e   : > { %5678 = vmatmul.mubr.msk.bf16.vlgmr.msra.gmra.mrb[112].mxu0 %vm865_vm1, %v6674_v10  ;;  %5680 = vmatmul.mubr.msk.bf16.vlgmr.msra.gmra.mrb[112].mxu1 %vm865_vm1, %v6674_v10 }
 0x16f   : > { %4564 = vmatpush1.bf16.msra.mxu0 %v5617_v54  ;;  %4605 = vmatpush1.bf16.msra.mxu1 %v5619_v57  ;;  %v4142_v57 = vsel %vm869_vm0, %v5657_v53, 0  ;;  %v4148_v59 = vsel %vm869_vm0, %v5659_v56, 0 }
 0x170   : > { %5681 = vmatprep.subr.msk.bf16.mxu0 %vm869_vm0, %v5650_v58  ;;  %5683 = vmatprep.subr.msk.bf16.mxu1 %vm869_vm0, %v5652_v61 }
 0x171   : > { %v6863_v5 = vpop.f32.mrb[8].mxu0  ;;  %4595 = vmatprep.mubr.bf16.mxu0 %v5909_v0  ;;  %v6869_v9 = vpop.f32.mrb[8].mxu1  ;;  %4636 = vmatprep.mubr.bf16.mxu1 %v5909_v0 }
 0x172   : > { %v6871_v11 = vpop.f32.mrb[9].mxu0  ;;  %v6875_v13 = vpop.f32.mrb[9].mxu1 }
 0x173   : > { %v1168_v14 = vpop.f32.mrb[10].mxu0  ;;  %4566 = vmatpush1.bf16.msra.mxu0 %v4118_v3  ;;  %v1209_v16 = vpop.f32.mrb[10].mxu1  ;;  %4607 = vmatpush1.bf16.msra.mxu1 %v4124_v6 }
 0x174   : > { %v1169_v17 = vpop.f32.mrb[11].mxu0  ;;  %4645 = vmatprep.subr.bf16.mxu0 %v5622_v4  ;;  %v1210_v22 = vpop.f32.mrb[11].mxu1  ;;  %4686 = vmatprep.subr.bf16.mxu1 %v5624_v7 }
 0x176   : > { %5682 = vmatmul.mubr.msk.bf16.vlgmr.msra.gmra.mrb[116].mxu0 %vm865_vm1, %v6674_v10  ;;  %5684 = vmatmul.mubr.msk.bf16.vlgmr.msra.gmra.mrb[116].mxu1 %vm865_vm1, %v6674_v10 }
 0x177   : > { %4646 = vmatpush1.bf16.msra.mxu0 %v5621_v15  ;;  %4687 = vmatpush1.bf16.msra.mxu1 %v5623_v18 }
 0x178   : > { %5685 = vmatprep.subr.msk.bf16.mxu0 %vm869_vm0, %v5654_v19  ;;  %5687 = vmatprep.subr.msk.bf16.mxu1 %vm869_vm0, %v5656_v23 }
 0x179   : > { %v6887_v35 = vpop.f32.mrb[12].mxu0  ;;  %4677 = vmatprep.mubr.bf16.mxu0 %v5909_v0  ;;  %v6893_v39 = vpop.f32.mrb[12].mxu1  ;;  %4718 = vmatprep.mubr.bf16.mxu1 %v5909_v0 }
 0x17a   : > { %v6895_v40 = vpop.f32.mrb[13].mxu0  ;;  %v6899_v42 = vpop.f32.mrb[13].mxu1 }
 0x17b   : > { %v1250_v43 = vpop.f32.mrb[14].mxu0  ;;  %4648 = vmatpush1.bf16.msra.mxu0 %v4130_v33  ;;  %v1291_v46 = vpop.f32.mrb[14].mxu1  ;;  %4689 = vmatpush1.bf16.msra.mxu1 %v4136_v36 }
 0x17c   : > { %v1251_v47 = vpop.f32.mrb[15].mxu0  ;;  %4727 = vmatprep.subr.bf16.mxu0 %v5626_v34  ;;  %v1292_v54 = vpop.f32.mrb[15].mxu1  ;;  %4768 = vmatprep.subr.bf16.mxu1 %v5628_v37 }
 0x17e   : > { %5686 = vmatmul.mubr.msk.bf16.vlgmr.msra.gmra.mrb[120].mxu0 %vm865_vm1, %v6674_v10  ;;  %5688 = vmatmul.mubr.msk.bf16.vlgmr.msra.gmra.mrb[120].mxu1 %vm865_vm1, %v6674_v10 }
 0x17f   : > { %4728 = vmatpush1.bf16.msra.mxu0 %v5625_v44  ;;  %4769 = vmatpush1.bf16.msra.mxu1 %v5627_v48 }
 0x180   : > { %5689 = vmatprep.subr.msk.bf16.mxu0 %vm869_vm0, %v5658_v51  ;;  %5691 = vmatprep.subr.msk.bf16.mxu1 %vm869_vm0, %v5660_v55 }
 0x181   : > { %v6907_v58 = vpop.f32.mrb[16].mxu0  ;;  %4759 = vmatprep.mubr.bf16.mxu0 %v5909_v0  ;;  %v6912_v60 = vpop.f32.mrb[16].mxu1  ;;  %4800 = vmatprep.mubr.bf16.mxu1 %v5909_v0 }
 0x182   : > { %v6914_v61 = vpop.f32.mrb[17].mxu0  ;;  %v6917_v62 = vpop.f32.mrb[17].mxu1 }
 0x183   : > { %v1332_v63 = vpop.f32.mrb[18].mxu0  ;;  %4730 = vmatpush1.bf16.msra.mxu0 %v4142_v57  ;;  %v1373_v1 = vpop.f32.mrb[18].mxu1  ;;  %4771 = vmatpush1.bf16.msra.mxu1 %v4148_v59 }
 0x184   : > { %v1333_v25 = vpop.f32.mrb[19].mxu0  ;;  %v1374_v2 = vpop.f32.mrb[19].mxu1 }
 0x186   : > { %5690 = vmatmul.mubr.msk.bf16.vlgmr.msra.gmra.mrb[124].mxu0 %vm865_vm1, %v6674_v10  ;;  %5692 = vmatmul.mubr.msk.bf16.vlgmr.msra.gmra.mrb[124].mxu1 %vm865_vm1, %v6674_v10 }
 0x189   : > { %v6923_v3 = vpop.f32.mrb[20].mxu0  ;;  %v6925_v4 = vpop.f32.mrb[20].mxu1 }
 0x18a   : > { %7405 = vst [vmem:[#allocation3_spill] sm:$0xff] %v6923_v3  ;;  %v6927_v6 = vpop.f32.mrb[21].mxu0  ;;  %v6929_v0 = vpop.f32.mrb[21].mxu1 }
 0x18b   : > { %v1414_v7 = vpop.f32.mrb[22].mxu0  ;;  %v1455_v8 = vpop.f32.mrb[22].mxu1 }
 0x18c   : > { %v1415_v12 = vpop.f32.mrb[23].mxu0  ;;  %v1456_v14 = vpop.f32.mrb[23].mxu1 }
 0x191   : > { %v6931_v15 = vpop.f32.mrb[24].mxu0  ;;  %v6933_v16 = vpop.f32.mrb[24].mxu1 }
 0x192   : > { %7406 = vst [vmem:[#allocation4_spill] sm:$0xff] %v6931_v15  ;;  %v6935_v17 = vpop.f32.mrb[25].mxu0  ;;  %v6937_v18 = vpop.f32.mrb[25].mxu1 }
 0x193   : > { %7407 = vst [vmem:[#allocation5_spill] sm:$0xff] %v6937_v18  ;;  %v1496_v10 = vpop.f32.mrb[26].mxu0  ;;  %v1537_v19 = vpop.f32.mrb[26].mxu1 }
 0x194   : > { %v1497_v21 = vpop.f32.mrb[27].mxu0  ;;  %v1538_v22 = vpop.f32.mrb[27].mxu1 }
 0x199   : > { %v6939_v23 = vpop.f32.mrb[28].mxu0  ;;  %v6941_v27 = vpop.f32.mrb[28].mxu1 }
 0x19a   : > { %7408 = vst [vmem:[#allocation6_spill] sm:$0xff] %v6939_v23  ;;  %v6943_v29 = vpop.f32.mrb[29].mxu0  ;;  %v6945_v30 = vpop.f32.mrb[29].mxu1 }
 0x19b   : > { %v1578_v31 = vpop.f32.mrb[30].mxu0  ;;  %v1619_v32 = vpop.f32.mrb[30].mxu1 }
 0x19c   : > { %v1579_v33 = vpop.f32.mrb[31].mxu0  ;;  %v1620_v34 = vpop.f32.mrb[31].mxu1 }
 0x1a1   : > { %v6947_v36 = vpop.f32.mrb[32].mxu0  ;;  %v6951_v38 = vpop.f32.mrb[32].mxu1 }
 0x1a2   : > { %v6953_v41 = vpop.f32.mrb[33].mxu0  ;;  %v6959_v46 = vpop.f32.mrb[33].mxu1 }
 0x1a3   : > { %v2045_v47 = vpop.f32.mrb[34].mxu0  ;;  %v2086_v51 = vpop.f32.mrb[34].mxu1 }
 0x1a4   : > { %v2046_v53 = vpop.f32.mrb[35].mxu0  ;;  %v2087_v54 = vpop.f32.mrb[35].mxu1 }
 0x1a9   : > { %v6963_v55 = vpop.f32.mrb[36].mxu0  ;;  %v6967_v57 = vpop.f32.mrb[36].mxu1 }
 0x1aa   : > { %v6969_v59 = vpop.f32.mrb[37].mxu0  ;;  %v6975_v25 = vpop.f32.mrb[37].mxu1 }
 0x1ab   : > { %v2127_v2 = vpop.f32.mrb[38].mxu0  ;;  %v2168_v8 = vpop.f32.mrb[38].mxu1 }
 0x1ac   : > { %v2128_v12 = vpop.f32.mrb[39].mxu0  ;;  %v2169_v14 = vpop.f32.mrb[39].mxu1 }
 0x1b1   : > { %v6979_v10 = vpop.f32.mrb[40].mxu0  ;;  %v6983_v21 = vpop.f32.mrb[40].mxu1 }
 0x1b2   : > { %v6985_v22 = vpop.f32.mrb[41].mxu0  ;;  %v6991_v33 = vpop.f32.mrb[41].mxu1 }
 0x1b3   : > { %v2209_v34 = vpop.f32.mrb[42].mxu0  ;;  %v2250_v51 = vpop.f32.mrb[42].mxu1 }
 0x1b4   : > { %v2210_v53 = vpop.f32.mrb[43].mxu0  ;;  %v2251_v54 = vpop.f32.mrb[43].mxu1 }
 0x1b9   : > { %v6995_v2 = vpop.f32.mrb[44].mxu0  ;;  %v6999_v12 = vpop.f32.mrb[44].mxu1 }
 0x1ba   : > { %v7001_v14 = vpop.f32.mrb[45].mxu0  ;;  %v7007_v31 = vpop.f32.mrb[45].mxu1 }
 0x1bb   : > { %v2291_v51 = vpop.f32.mrb[46].mxu0  ;;  %v2332_v54 = vpop.f32.mrb[46].mxu1 }
 0x1bc   : > { %v2292_v47 = vpop.f32.mrb[47].mxu0  ;;  %v2333_v19 = vpop.f32.mrb[47].mxu1 }
 0x1c1   : > { %v7011_v8 = vpop.f32.mrb[48].mxu0  ;;  %v7015_v1 = vpop.f32.mrb[48].mxu1 }
 0x1c2   : > { %v7017_v32 = vpop.f32.mrb[49].mxu0  ;;  %v7023_v63 = vpop.f32.mrb[49].mxu1 }
 0x1c3   : > { %v2373_v54 = vpop.f32.mrb[50].mxu0  ;;  %v2414_v47 = vpop.f32.mrb[50].mxu1 }
 0x1c4   : > { %v2374_v53 = vpop.f32.mrb[51].mxu0  ;;  %v2415_v56 = vpop.f32.mrb[51].mxu1 }
 0x1c9   : > { %v7027_v7 = vpop.f32.mrb[52].mxu0  ;;  %v7031_v44 = vpop.f32.mrb[52].mxu1 }
 0x1ca   : > { %7409 = vst [vmem:[#allocation7_spill] sm:$0xff] %v7027_v7  ;;  %v7033_v34 = vpop.f32.mrb[53].mxu0  ;;  %v7039_v43 = vpop.f32.mrb[53].mxu1 }
 0x1cb   : > { %7410 = vst [vmem:[#allocation8_spill] sm:$0xff] %v7033_v34  ;;  %7411 = vst [vmem:[#allocation9_spill] sm:$0xff] %v7039_v43  ;;  %v2455_v47 = vpop.f32.mrb[54].mxu0  ;;  %v2496_v53 = vpop.f32.mrb[54].mxu1 }
 0x1cc   : > { %v2456_v19 = vpop.f32.mrb[55].mxu0  ;;  %v2497_v37 = vpop.f32.mrb[55].mxu1 }
 0x1d1   : > { %v7043_v48 = vpop.f32.mrb[56].mxu0  ;;  %v7047_v3 = vpop.f32.mrb[56].mxu1 }
 0x1d2   : > { %7412 = vst [vmem:[#allocation10_spill] sm:$0xff] %v7043_v48  ;;  %v7049_v51 = vpop.f32.mrb[57].mxu0  ;;  %v7055_v34 = vpop.f32.mrb[57].mxu1 }
 0x1d3   : > { %7413 = vst [vmem:[#allocation11_spill] sm:$0xff] %v7049_v51  ;;  %7414 = vst [vmem:[#allocation12_spill] sm:$0xff] %v7055_v34  ;;  %v2537_v53 = vpop.f32.mrb[58].mxu0  ;;  %v2578_v19 = vpop.f32.mrb[58].mxu1 }
 0x1d4   : > { %v2538_v56 = vpop.f32.mrb[59].mxu0  ;;  %v2579_v43 = vpop.f32.mrb[59].mxu1  ;;  %v7419_v53 = vmax.f32 %v6821_v24, %v6951_v38  ;;  %v7422_v24 = vmax.f32 %v6839_v45, %v6963_v55 }
 0x1d9   : > { %v7059_v7 = vpop.f32.mrb[60].mxu0  ;;  %v7063_v15 = vpop.f32.mrb[60].mxu1 }
 0x1da   : > { %7415 = vst [vmem:[#allocation13_spill] sm:$0xff] %v7059_v7  ;;  %v7065_v54 = vpop.f32.mrb[61].mxu0  ;;  %v7071_v51 = vpop.f32.mrb[61].mxu1  ;;  %v7417_v7 = vmax.f32 %v6815_v20, %v6947_v36 }
 0x1db   : > { %7416 = vst [vmem:[#allocation14_spill] sm:$0xff] %v7065_v54  ;;  %v2619_v19 = vpop.f32.mrb[62].mxu0  ;;  %v2660_v56 = vpop.f32.mrb[62].mxu1 }
 0x1dc   : > { %v2620_v37 = vpop.f32.mrb[63].mxu0  ;;  %v2661_v34 = vpop.f32.mrb[63].mxu1  ;;  %v7420_v19 = vmax.f32 %v6823_v26, %v6953_v41  ;;  %v7421_v56 = vmax.f32 %v6827_v28, %v6959_v46  ;;  %v7423_v41 = vmax.f32 %v6845_v49, %v6967_v57  ;;  %v7424_v28 = vmax.f32 %v6847_v50, %v6969_v59 }
 0x1dd   : > { %v7426_v49 = vmax.f32 %v6863_v5, %v6979_v10  ;;  %v7427_v59 = vmax.f32 %v6869_v9, %v6983_v21  ;;  %v7430_v9 = vmax.f32 %v6887_v35, %v6995_v2 }
 0x1e1   : > { %v3114_v48 = vpop.f32.mrb[64].mxu0  ;;  %v3155_v18 = vpop.f32.mrb[64].mxu1 }
 0x1e2   : > { %v7078_v23 = vmax.f32 %v7417_v7, %v3114_v48  ;;  %v3116_v47 = vpop.f32.mrb[65].mxu0  ;;  %v7083_v54 = vmax.f32 %v7419_v53, %v3155_v18  ;;  %v3157_v37 = vpop.f32.mrb[65].mxu1 }
 0x1e3   : > { %v7088_v43 = vmax.f32 %v7420_v19, %v3116_v47  ;;  %v3118_v34 = vpop.f32.mrb[66].mxu0  ;;  %v7093_v20 = vmax.f32 %v7421_v56, %v3157_v37  ;;  %v3159_v36 = vpop.f32.mrb[66].mxu1  ;;  %v7425_v37 = vmax.f32 %v6851_v52, %v6975_v25  ;;  %v7428_v52 = vmax.f32 %v6871_v11, %v6985_v22 }
 0x1e4   : > { %7418 = vst [vmem:[#allocation15_spill] sm:$0xff] %v7078_v23  ;;  %v3119_v48 = vpop.f32.mrb[67].mxu0  ;;  %v3160_v7 = vpop.f32.mrb[67].mxu1  ;;  %v7431_v22 = vmax.f32 %v6893_v39, %v6999_v12  ;;  %v7434_v39 = vmax.f32 %v6907_v58, %v7011_v8 }
 0x1e9   : > { %v3196_v23 = vpop.f32.mrb[68].mxu0  ;;  %v3237_v38 = vpop.f32.mrb[68].mxu1 }
 0x1ea   : > { %v7098_v18 = vmax.f32 %v7422_v24, %v3196_v23  ;;  %v3198_v26 = vpop.f32.mrb[69].mxu0  ;;  %v7103_v47 = vmax.f32 %v7423_v41, %v3237_v38  ;;  %v3239_v53 = vpop.f32.mrb[69].mxu1  ;;  %v7429_v38 = vmax.f32 %v6875_v13, %v6991_v33  ;;  %v7432_v13 = vmax.f32 %v6895_v40, %v7001_v14 }
 0x1eb   : > { %v7108_v46 = vmax.f32 %v7424_v28, %v3198_v26  ;;  %v3200_v19 = vpop.f32.mrb[70].mxu0  ;;  %v7113_v45 = vmax.f32 %v7425_v37, %v3239_v53  ;;  %v3241_v23 = vpop.f32.mrb[70].mxu1  ;;  %v7435_v14 = vmax.f32 %v6912_v60, %v7015_v1  ;;  %v7439_v60 = vld [vmem:[#allocation7_spill] sm:$0xff] }
 0x1ec   : > { %v3201_v55 = vpop.f32.mrb[71].mxu0  ;;  %v3242_v34 = vpop.f32.mrb[71].mxu1 }
 0x1ed   : > { %v7433_v55 = vmax.f32 %v6899_v42, %v7007_v31  ;;  %v7436_v42 = vmax.f32 %v6914_v61, %v7017_v32  ;;  %v7441_v32 = vmax.f32 %v6925_v4, %v7031_v44  ;;  %v7446_v4 = vld [vmem:[#allocation4_spill] sm:$0xff]  ;;  %v7447_v44 = vld [vmem:[#allocation10_spill] sm:$0xff] }
 0x1f1   : > { %v3278_v56 = vpop.f32.mrb[72].mxu0  ;;  %v3319_v36 = vpop.f32.mrb[72].mxu1 }
 0x1f2   : > { %v7118_v57 = vmax.f32 %v7426_v49, %v3278_v56  ;;  %v3280_v50 = vpop.f32.mrb[73].mxu0  ;;  %v7123_v48 = vmax.f32 %v7427_v59, %v3319_v36  ;;  %v3321_v7 = vpop.f32.mrb[73].mxu1 }
 0x1f3   : > { %v7128_v25 = vmax.f32 %v7428_v52, %v3280_v50  ;;  %v3282_v24 = vpop.f32.mrb[74].mxu0  ;;  %v7133_v5 = vmax.f32 %v7429_v38, %v3321_v7  ;;  %v3323_v10 = vpop.f32.mrb[74].mxu1  ;;  %v7437_v7 = vmax.f32 %v6917_v62, %v7023_v63  ;;  %v7442_v62 = vld [vmem:[#allocation8_spill] sm:$0xff] }
 0x1f4   : > { %v3283_v26 = vpop.f32.mrb[75].mxu0  ;;  %v3324_v41 = vpop.f32.mrb[75].mxu1  ;;  %v7443_v63 = vmax.f32 %v6927_v6, %v7442_v62 }
 0x1f5   : > { %v7438_v26 = vld [vmem:[#allocation3_spill] sm:$0xff] }
 0x1f6   : > { %v7440_v1 = vmax.f32 %v7438_v26, %v7439_v60 }
 0x1f9   : > { %v3360_v28 = vpop.f32.mrb[76].mxu0  ;;  %v3401_v53 = vpop.f32.mrb[76].mxu1 }
 0x1fa   : > { %v7138_v21 = vmax.f32 %v7430_v9, %v3360_v28  ;;  %v3362_v11 = vpop.f32.mrb[77].mxu0  ;;  %v7143_v19 = vmax.f32 %v7431_v22, %v3401_v53  ;;  %v3403_v37 = vpop.f32.mrb[77].mxu1 }
 0x1fb   : > { %v7148_v33 = vmax.f32 %v7432_v13, %v3362_v11  ;;  %v3364_v23 = vpop.f32.mrb[78].mxu0  ;;  %v7153_v35 = vmax.f32 %v7433_v55, %v3403_v37  ;;  %v3405_v2 = vpop.f32.mrb[78].mxu1  ;;  %v7444_v13 = vld [vmem:[#allocation9_spill] sm:$0xff] }
 0x1fc   : > { %v3365_v34 = vpop.f32.mrb[79].mxu0  ;;  %v3406_v56 = vpop.f32.mrb[79].mxu1  ;;  %v7445_v37 = vmax.f32 %v6929_v0, %v7444_v13  ;;  %v7450_v0 = vld [vmem:[#allocation11_spill] sm:$0xff] }
 0x201   : > { %v3442_v49 = vpop.f32.mrb[80].mxu0  ;;  %v3483_v36 = vpop.f32.mrb[80].mxu1 }
 0x202   : > { %v7158_v12 = vmax.f32 %v7434_v39, %v3442_v49  ;;  %v3444_v40 = vpop.f32.mrb[81].mxu0  ;;  %v7163_v50 = vmax.f32 %v7435_v14, %v3483_v36  ;;  %v3485_v59 = vpop.f32.mrb[81].mxu1  ;;  %v7448_v49 = vmax.f32 %v7446_v4, %v7447_v44 }
 0x203   : > { %v7168_v31 = vmax.f32 %v7436_v42, %v3444_v40  ;;  %v3446_v52 = vpop.f32.mrb[82].mxu0  ;;  %v7173_v58 = vmax.f32 %v7437_v7, %v3485_v59  ;;  %v3487_v8 = vpop.f32.mrb[82].mxu1  ;;  %v7449_v40 = vmax.f32 %v6933_v16, %v7047_v3  ;;  %v7451_v42 = vmax.f32 %v6935_v17, %v7450_v0  ;;  %v7455_v16 = vld [vmem:[#allocation6_spill] sm:$0xff] }
 0x204   : > { %v3447_v24 = vpop.f32.mrb[83].mxu0  ;;  %v3488_v38 = vpop.f32.mrb[83].mxu1  ;;  %v7452_v8 = vld [vmem:[#allocation5_spill] sm:$0xff] }
 0x205   : > { %v7453_v24 = vld [vmem:[#allocation12_spill] sm:$0xff] }
 0x206   : > { %v7454_v38 = vmax.f32 %v7452_v8, %v7453_v24 }
 0x209   : > { %v3524_v10 = vpop.f32.mrb[84].mxu0  ;;  %v3565_v28 = vpop.f32.mrb[84].mxu1 }
 0x20a   : > { %v7178_v41 = vmax.f32 %v7440_v1, %v3524_v10  ;;  %v3526_v61 = vpop.f32.mrb[85].mxu0  ;;  %v7183_v9 = vmax.f32 %v7441_v32, %v3565_v28  ;;  %v3567_v11 = vpop.f32.mrb[85].mxu1  ;;  %v7456_v28 = vld [vmem:[#allocation13_spill] sm:$0xff] }
 0x20b   : > { %v7188_v53 = vmax.f32 %v7443_v63, %v3526_v61  ;;  %v3528_v22 = vpop.f32.mrb[86].mxu0  ;;  %v7193_v23 = vmax.f32 %v7445_v37, %v3567_v11  ;;  %v3569_v55 = vpop.f32.mrb[86].mxu1  ;;  %v7457_v61 = vmax.f32 %v7455_v16, %v7456_v28  ;;  %v7458_v63 = vmax.f32 %v6941_v27, %v7063_v15  ;;  %v7462_v27 = vld [vmem:[#allocation15_spill] sm:$0xff] }
 0x20c   : > { %v3529_v2 = vpop.f32.mrb[87].mxu0  ;;  %v3570_v34 = vpop.f32.mrb[87].mxu1  ;;  %v7459_v22 = vld [vmem:[#allocation14_spill] sm:$0xff]  ;;  %v5046_v28 = vld [vmem:[%s7249_s14] sm:$0x77] }
 0x20d   : > { %v7460_v13 = vmax.f32 %v6943_v29, %v7459_v22  ;;  %v7461_v34 = vmax.f32 %v6945_v30, %v7071_v51  ;;  %v7237_v15 = vpop.permute.xlu0 %4844 }
 0x211   : > { %v3606_v56 = vpop.f32.mrb[88].mxu0  ;;  %v3647_v6 = vpop.f32.mrb[88].mxu1 }
 0x212   : > { %v7198_v39 = vmax.f32 %v7448_v49, %v3606_v56  ;;  %v3608_v36 = vpop.f32.mrb[89].mxu0  ;;  %v7203_v14 = vmax.f32 %v7449_v40, %v3647_v6  ;;  %v3649_v52 = vpop.f32.mrb[89].mxu1 }
 0x213   : > { %v7208_v59 = vmax.f32 %v7451_v42, %v3608_v36  ;;  %v3610_v7 = vpop.f32.mrb[90].mxu0  ;;  %v7213_v10 = vmax.f32 %v7454_v38, %v3649_v52  ;;  %v3651_v26 = vpop.f32.mrb[90].mxu1 }
 0x214   : > { %v3611_v60 = vpop.f32.mrb[91].mxu0  ;;  %v3652_v1 = vpop.f32.mrb[91].mxu1 }
 0x219   : > { %v3688_v3 = vpop.f32.mrb[92].mxu0  ;;  %v3729_v17 = vpop.f32.mrb[92].mxu1 }
 0x21a   : > { %v7220_v32 = vmax.f32 %v7457_v61, %v3688_v3  ;;  %v3690_v62 = vpop.f32.mrb[93].mxu0  ;;  %v7225_v11 = vmax.f32 %v7458_v63, %v3729_v17  ;;  %v3731_v55 = vpop.f32.mrb[93].mxu1 }
 0x21b   : > { %v7230_v37 = vmax.f32 %v7460_v13, %v3690_v62  ;;  %v3692_v2 = vpop.f32.mrb[94].mxu0  ;;  %v7235_v56 = vmax.f32 %v7461_v34, %v3731_v55  ;;  %v3733_v4 = vpop.f32.mrb[94].mxu1  ;;  %v5049_v62 = vld [vmem:[%s7249_s14 + $0x8] sm:$0x77] }
 0x21c   : > { %v3693_v44 = vpop.f32.mrb[95].mxu0  ;;  %v3734_v49 = vpop.f32.mrb[95].mxu1 }
 0x221   : > { %v4187_v6 = vpop.f32.mrb[96].mxu0  ;;  %v4228_v36 = vpop.f32.mrb[96].mxu1 }
 0x222   : > { %v4809_v29 = vmax.f32 %v7462_v27, %v4187_v6  ;;  %v4189_v40 = vpop.f32.mrb[97].mxu0  ;;  %v4811_v30 = vmax.f32 %v7083_v54, %v4228_v36  ;;  %v4230_v0 = vpop.f32.mrb[97].mxu1 }
 0x223   : > { %v4810_v51 = vmax.f32 %v7088_v43, %v4189_v40  ;;  %v4191_v42 = vpop.f32.mrb[98].mxu0  ;;  %v4812_v52 = vmax.f32 %v7093_v20, %v4230_v0  ;;  %v4232_v7 = vpop.f32.mrb[98].mxu1 }
 0x224   : > { %v4192_v8 = vpop.f32.mrb[99].mxu0  ;;  %v4847_v24 = vadd.f32 %v7237_v15, %v4809_v29  ;;  %v4233_v38 = vpop.f32.mrb[99].mxu1  ;;  %v4849_v43 = vadd.f32 %v7237_v15, %v4811_v30 }
 0x225   : > { %v4848_v54 = vadd.f32 %v7237_v15, %v4810_v51  ;;  %v4850_v20 = vadd.f32 %v7237_v15, %v4812_v52  ;;  %v5052_v52 = vld [vmem:[%s7249_s14 + $0x10] sm:$0x77] }
 0x226   : > { %v4879_v26 = vmax.f32 %v4847_v24, 0.0  ;;  %v4881_v1 = vmax.f32 %v4849_v43, 0.0  ;;  %v5055_v24 = vld [vmem:[%s7249_s14 + $0x18] sm:$0x77] }
 0x227   : > { %v4880_v60 = vmax.f32 %v4848_v54, 0.0  ;;  %v4882_v3 = vmax.f32 %v4850_v20, 0.0 }
 0x229   : > { %v4269_v61 = vpop.f32.mrb[100].mxu0  ;;  %v5712_v17 = vpack.c.bf16 %v4880_v60, %v4879_v26  ;;  %v4310_v22 = vpop.f32.mrb[100].mxu1  ;;  %v5713_v55 = vpack.c.bf16 %v4882_v3, %v4881_v1 }
 0x22a   : > { %v4813_v63 = vmax.f32 %v7098_v18, %v4269_v61  ;;  %v4271_v13 = vpop.f32.mrb[101].mxu0  ;;  %v4815_v2 = vmax.f32 %v7103_v47, %v4310_v22  ;;  %v4312_v44 = vpop.f32.mrb[101].mxu1 }
 0x22b   : > { %v4814_v34 = vmax.f32 %v7108_v46, %v4271_v13  ;;  %v5047_v4 = vsel %vm7255_vm8, %v5712_v17, %v5046_v28  ;;  %v4273_v49 = vpop.f32.mrb[102].mxu0  ;;  %v5050_v18 = vsel %vm7255_vm8, %v5713_v55, %v5049_v62  ;;  %v4816_v27 = vmax.f32 %v7113_v45, %v4312_v44  ;;  %v4314_v29 = vpop.f32.mrb[102].mxu1 }
 0x22c   : > { %v4851_v6 = vadd.f32 %v7237_v15, %v4813_v63  ;;  %5048 = vst [vmem:[%s7249_s14] sm:$0x77] %v5047_v4  ;;  %v4274_v36 = vpop.f32.mrb[103].mxu0  ;;  %v4853_v47 = vadd.f32 %v7237_v15, %v4815_v2  ;;  %5051 = vst [vmem:[%s7249_s14 + $0x8] sm:$0x77] %v5050_v18  ;;  %v4315_v40 = vpop.f32.mrb[103].mxu1 }
 0x22d   : > { %v4852_v46 = vadd.f32 %v7237_v15, %v4814_v34  ;;  %v4854_v51 = vadd.f32 %v7237_v15, %v4816_v27  ;;  %v5058_v4 = vld [vmem:[%s7249_s14 + $0x20] sm:$0x77] }
 0x22e   : > { %v4883_v30 = vmax.f32 %v4851_v6, 0.0  ;;  %v4885_v0 = vmax.f32 %v4853_v47, 0.0  ;;  %v5061_v6 = vld [vmem:[%s7249_s14 + $0x28] sm:$0x77] }
 0x22f   : > { %v4884_v42 = vmax.f32 %v4852_v46, 0.0  ;;  %v4886_v7 = vmax.f32 %v4854_v51, 0.0 }
 0x231   : > { %v5714_v8 = vpack.c.bf16 %v4884_v42, %v4883_v30  ;;  %v4351_v38 = vpop.f32.mrb[104].mxu0  ;;  %v5715_v45 = vpack.c.bf16 %v4886_v7, %v4885_v0  ;;  %v4392_v43 = vpop.f32.mrb[104].mxu1 }
 0x232   : > { %v4817_v54 = vmax.f32 %v7118_v57, %v4351_v38  ;;  %v4353_v20 = vpop.f32.mrb[105].mxu0  ;;  %v4819_v60 = vmax.f32 %v7123_v48, %v4392_v43  ;;  %v4394_v3 = vpop.f32.mrb[105].mxu1  ;;  %v5064_v43 = vld [vmem:[%s7249_s14 + $0x30] sm:$0x77] }
 0x233   : > { %v5053_v26 = vsel %vm7255_vm8, %v5714_v8, %v5052_v52  ;;  %v4818_v1 = vmax.f32 %v7128_v25, %v4353_v20  ;;  %v4355_v28 = vpop.f32.mrb[106].mxu0  ;;  %v5056_v61 = vsel %vm7255_vm8, %v5715_v45, %v5055_v24  ;;  %v4820_v57 = vmax.f32 %v7133_v5, %v4394_v3  ;;  %v4396_v62 = vpop.f32.mrb[106].mxu1 }
 0x234   : > { %5054 = vst [vmem:[%s7249_s14 + $0x10] sm:$0x77] %v5053_v26  ;;  %v4855_v17 = vadd.f32 %v7237_v15, %v4817_v54  ;;  %v4356_v63 = vpop.f32.mrb[107].mxu0  ;;  %5057 = vst [vmem:[%s7249_s14 + $0x18] sm:$0x77] %v5056_v61  ;;  %v4857_v22 = vadd.f32 %v7237_v15, %v4819_v60  ;;  %v4397_v25 = vpop.f32.mrb[107].mxu1 }
 0x235   : > { %v4856_v48 = vadd.f32 %v7237_v15, %v4818_v1  ;;  %v4858_v55 = vadd.f32 %v7237_v15, %v4820_v57  ;;  %v5067_v60 = vld [vmem:[%s7249_s14 + $0x38] sm:$0x77] }
 0x236   : > { %v4887_v13 = vmax.f32 %v4855_v17, 0.0  ;;  %v4889_v2 = vmax.f32 %v4857_v22, 0.0 }
 0x237   : > { %v4888_v34 = vmax.f32 %v4856_v48, 0.0  ;;  %v4890_v44 = vmax.f32 %v4858_v55, 0.0 }
 0x239   : > { %v5716_v49 = vpack.c.bf16 %v4888_v34, %v4887_v13  ;;  %v4433_v18 = vpop.f32.mrb[108].mxu0  ;;  %v5717_v5 = vpack.c.bf16 %v4890_v44, %v4889_v2  ;;  %v4474_v29 = vpop.f32.mrb[108].mxu1 }
 0x23a   : > { %v4821_v27 = vmax.f32 %v7138_v21, %v4433_v18  ;;  %v4435_v36 = vpop.f32.mrb[109].mxu0  ;;  %v4823_v46 = vmax.f32 %v7143_v19, %v4474_v29  ;;  %v4476_v30 = vpop.f32.mrb[109].mxu1 }
 0x23b   : > { %v5059_v47 = vsel %vm7255_vm8, %v5716_v49, %v5058_v4  ;;  %v4822_v40 = vmax.f32 %v7148_v33, %v4435_v36  ;;  %v4437_v51 = vpop.f32.mrb[110].mxu0  ;;  %v5062_v0 = vsel %vm7255_vm8, %v5717_v5, %v5061_v6  ;;  %v4824_v21 = vmax.f32 %v7153_v35, %v4476_v30  ;;  %v4478_v52 = vpop.f32.mrb[110].mxu1  ;;  %v5070_v6 = vld [vmem:[%s7249_s14 + $0x40] sm:$0x77] }
 0x23c   : > { %5060 = vst [vmem:[%s7249_s14 + $0x20] sm:$0x77] %v5059_v47  ;;  %v4859_v42 = vadd.f32 %v7237_v15, %v4821_v27  ;;  %v4438_v7 = vpop.f32.mrb[111].mxu0  ;;  %5063 = vst [vmem:[%s7249_s14 + $0x28] sm:$0x77] %v5062_v0  ;;  %v4861_v8 = vadd.f32 %v7237_v15, %v4823_v46  ;;  %v4479_v33 = vpop.f32.mrb[111].mxu1 }
 0x23d   : > { %v4860_v19 = vadd.f32 %v7237_v15, %v4822_v40  ;;  %v4862_v38 = vadd.f32 %v7237_v15, %v4824_v21  ;;  %v5073_v27 = vld [vmem:[%s7249_s14 + $0x48] sm:$0x77] }
 0x23e   : > { %v4891_v24 = vmax.f32 %v4859_v42, 0.0  ;;  %v4893_v45 = vmax.f32 %v4861_v8, 0.0 }
 0x23f   : > { %v4892_v54 = vmax.f32 %v4860_v19, 0.0  ;;  %v4894_v20 = vmax.f32 %v4862_v38, 0.0 }
 0x241   : > { %v5718_v26 = vpack.c.bf16 %v4892_v54, %v4891_v24  ;;  %v4515_v1 = vpop.f32.mrb[112].mxu0  ;;  %v5719_v35 = vpack.c.bf16 %v4894_v20, %v4893_v45  ;;  %v4556_v28 = vpop.f32.mrb[112].mxu1  ;;  %v5076_v54 = vld [vmem:[%s7249_s14 + $0x50] sm:$0x77] }
 0x242   : > { %v4825_v3 = vmax.f32 %v7158_v12, %v4515_v1  ;;  %v4517_v61 = vpop.f32.mrb[113].mxu0  ;;  %v4827_v57 = vmax.f32 %v7163_v50, %v4556_v28  ;;  %v4558_v63 = vpop.f32.mrb[113].mxu1 }
 0x243   : > { %v5065_v17 = vsel %vm7255_vm8, %v5718_v26, %v5064_v43  ;;  %v4826_v62 = vmax.f32 %v7168_v31, %v4517_v61  ;;  %v4519_v22 = vpop.f32.mrb[114].mxu0  ;;  %v5068_v48 = vsel %vm7255_vm8, %v5719_v35, %v5067_v60  ;;  %v4828_v12 = vmax.f32 %v7173_v58, %v4558_v63  ;;  %v4560_v13 = vpop.f32.mrb[114].mxu1  ;;  %v5079_v26 = vld [vmem:[%s7249_s14 + $0x58] sm:$0x77] }
 0x244   : > { %5066 = vst [vmem:[%s7249_s14 + $0x30] sm:$0x77] %v5065_v17  ;;  %v4863_v25 = vadd.f32 %v7237_v15, %v4825_v3  ;;  %v4520_v55 = vpop.f32.mrb[115].mxu0  ;;  %5069 = vst [vmem:[%s7249_s14 + $0x38] sm:$0x77] %v5068_v48  ;;  %v4865_v2 = vadd.f32 %v7237_v15, %v4827_v57  ;;  %v4561_v31 = vpop.f32.mrb[115].mxu1 }
 0x245   : > { %v4864_v50 = vadd.f32 %v7237_v15, %v4826_v62  ;;  %v4866_v4 = vadd.f32 %v7237_v15, %v4828_v12  ;;  %v5082_v31 = vld [vmem:[%s7249_s14 + $0x60] sm:$0x77] }
 0x246   : > { %v4895_v34 = vmax.f32 %v4863_v25, 0.0  ;;  %v4897_v44 = vmax.f32 %v4865_v2, 0.0 }
 0x247   : > { %v4896_v49 = vmax.f32 %v4864_v50, 0.0  ;;  %v4898_v18 = vmax.f32 %v4866_v4, 0.0 }
 0x249   : > { %v5720_v5 = vpack.c.bf16 %v4896_v49, %v4895_v34  ;;  %v4597_v29 = vpop.f32.mrb[116].mxu0  ;;  %v5721_v58 = vpack.c.bf16 %v4898_v18, %v4897_v44  ;;  %v4638_v47 = vpop.f32.mrb[116].mxu1  ;;  %v5085_v44 = vld [vmem:[%s7249_s14 + $0x68] sm:$0x77] }
 0x24a   : > { %v4829_v36 = vmax.f32 %v7178_v41, %v4597_v29  ;;  %v4599_v46 = vpop.f32.mrb[117].mxu0  ;;  %v4831_v30 = vmax.f32 %v7183_v9, %v4638_v47  ;;  %v4640_v0 = vpop.f32.mrb[117].mxu1 }
 0x24b   : > { %v5071_v40 = vsel %vm7255_vm8, %v5720_v5, %v5070_v6  ;;  %v4830_v51 = vmax.f32 %v7188_v53, %v4599_v46  ;;  %v4601_v42 = vpop.f32.mrb[118].mxu0  ;;  %v5074_v21 = vsel %vm7255_vm8, %v5721_v58, %v5073_v27  ;;  %v4832_v41 = vmax.f32 %v7193_v23, %v4640_v0  ;;  %v4642_v7 = vpop.f32.mrb[118].mxu1 }
 0x24c   : > { %5072 = vst [vmem:[%s7249_s14 + $0x40] sm:$0x77] %v5071_v40  ;;  %v4867_v52 = vadd.f32 %v7237_v15, %v4829_v36  ;;  %v4602_v8 = vpop.f32.mrb[119].mxu0  ;;  %5075 = vst [vmem:[%s7249_s14 + $0x48] sm:$0x77] %v5074_v21  ;;  %v4869_v19 = vadd.f32 %v7237_v15, %v4831_v30  ;;  %v4643_v53 = vpop.f32.mrb[119].mxu1 }
 0x24d   : > { %v4868_v9 = vadd.f32 %v7237_v15, %v4830_v51  ;;  %v4870_v24 = vadd.f32 %v7237_v15, %v4832_v41  ;;  %v5088_v7 = vld [vmem:[%s7249_s14 + $0x70] sm:$0x77] }
 0x24e   : > { %v4899_v33 = vmax.f32 %v4867_v52, 0.0  ;;  %v4901_v38 = vmax.f32 %v4869_v19, 0.0 }
 0x24f   : > { %v4900_v45 = vmax.f32 %v4868_v9, 0.0  ;;  %v4902_v43 = vmax.f32 %v4870_v24, 0.0  ;;  %v5091_v9 = vld [vmem:[%s7249_s14 + $0x78] sm:$0x77] }
 0x251   : > { %v5722_v20 = vpack.c.bf16 %v4900_v45, %v4899_v33  ;;  %v4679_v60 = vpop.f32.mrb[120].mxu0  ;;  %v5723_v23 = vpack.c.bf16 %v4902_v43, %v4901_v38  ;;  %v4720_v35 = vpop.f32.mrb[120].mxu1 }
 0x252   : > { %v4833_v1 = vmax.f32 %v7198_v39, %v4679_v60  ;;  %v4681_v3 = vpop.f32.mrb[121].mxu0  ;;  %v4835_v61 = vmax.f32 %v7203_v14, %v4720_v35  ;;  %v4722_v57 = vpop.f32.mrb[121].mxu1 }
 0x253   : > { %v5077_v28 = vsel %vm7255_vm8, %v5722_v20, %v5076_v54  ;;  %v4834_v17 = vmax.f32 %v7208_v59, %v4681_v3  ;;  %v4683_v62 = vpop.f32.mrb[122].mxu0  ;;  %v5080_v63 = vsel %vm7255_vm8, %v5723_v23, %v5079_v26  ;;  %v4836_v39 = vmax.f32 %v7213_v10, %v4722_v57  ;;  %v4724_v48 = vpop.f32.mrb[122].mxu1 }
 0x254   : > { %5078 = vst [vmem:[%s7249_s14 + $0x50] sm:$0x77] %v5077_v28  ;;  %v4871_v22 = vadd.f32 %v7237_v15, %v4833_v1  ;;  %v4684_v25 = vpop.f32.mrb[123].mxu0  ;;  %5081 = vst [vmem:[%s7249_s14 + $0x58] sm:$0x77] %v5080_v63  ;;  %v4873_v12 = vadd.f32 %v7237_v15, %v4835_v61  ;;  %v4725_v59 = vpop.f32.mrb[123].mxu1 }
 0x255   : > { %v4872_v14 = vadd.f32 %v7237_v15, %v4834_v17  ;;  %v4874_v55 = vadd.f32 %v7237_v15, %v4836_v39 }
 0x256   : > { %v4903_v13 = vmax.f32 %v4871_v22, 0.0  ;;  %v4905_v2 = vmax.f32 %v4873_v12, 0.0 }
 0x257   : > { %v4904_v50 = vmax.f32 %v4872_v14, 0.0  ;;  %v4906_v34 = vmax.f32 %v4874_v55, 0.0 }
 0x259   : > { %v5724_v4 = vpack.c.bf16 %v4904_v50, %v4903_v13  ;;  %v4761_v49 = vpop.f32.mrb[124].mxu0  ;;  %v5725_v10 = vpack.c.bf16 %v4906_v34, %v4905_v2  ;;  %v4802_v18 = vpop.f32.mrb[124].mxu1 }
 0x25a   : > { %v4837_v6 = vmax.f32 %v7220_v32, %v4761_v49  ;;  %v4763_v5 = vpop.f32.mrb[125].mxu0  ;;  %v4839_v29 = vmax.f32 %v7225_v11, %v4802_v18  ;;  %v4804_v36 = vpop.f32.mrb[125].mxu1 }
 0x25b   : > { %v5083_v27 = vsel %vm7255_vm8, %v5724_v4, %v5082_v31  ;;  %v4838_v58 = vmax.f32 %v7230_v37, %v4763_v5  ;;  %v4765_v47 = vpop.f32.mrb[126].mxu0  ;;  %v5086_v46 = vsel %vm7255_vm8, %v5725_v10, %v5085_v44  ;;  %v4840_v32 = vmax.f32 %v7235_v56, %v4804_v36  ;;  %v4806_v30 = vpop.f32.mrb[126].mxu1 }
 0x25c   : > { %5084 = vst [vmem:[%s7249_s14 + $0x60] sm:$0x77] %v5083_v27  ;;  %v4875_v40 = vadd.f32 %v7237_v15, %v4837_v6  ;;  %v4766_v51 = vpop.f32.mrb[127].mxu0  ;;  %5087 = vst [vmem:[%s7249_s14 + $0x68] sm:$0x77] %v5086_v46  ;;  %v4877_v11 = vadd.f32 %v7237_v15, %v4839_v29  ;;  %v4807_v0 = vpop.f32.mrb[127].mxu1 }
 0x25d   : > { %v4876_v37 = vadd.f32 %v7237_v15, %v4838_v58  ;;  %v4878_v21 = vadd.f32 %v7237_v15, %v4840_v32 }
 0x25e   : > { %v4907_v42 = vmax.f32 %v4875_v40, 0.0  ;;  %v4909_v52 = vmax.f32 %v4877_v11, 0.0 }
 0x25f   : > { %v4908_v41 = vmax.f32 %v4876_v37, 0.0  ;;  %v4910_v8 = vmax.f32 %v4878_v21, 0.0 }
 0x261   : > { %v5726_v19 = vpack.c.bf16 %v4908_v41, %v4907_v42  ;;  %v5727_v56 = vpack.c.bf16 %v4910_v8, %v4909_v52 }
 0x263   : > { %v5089_v53 = vsel %vm7255_vm8, %v5726_v19, %v5088_v7  ;;  %v5092_v33 = vsel %vm7255_vm8, %v5727_v56, %v5091_v9 }
 0x264   : > { %5090 = vst [vmem:[%s7249_s14 + $0x70] sm:$0x77] %v5089_v53  ;;  %5093 = vst [vmem:[%s7249_s14 + $0x78] sm:$0x77] %v5092_v33 }
 0x265 PF: > { %p10_p9 = scmp.ge.s32.totalorder %s5947_s16, 4   ;;  %s7465_s12 = smov %s5903_s13 }
 0x266   : > { %s7466_s13 = smov %s5956_s19  ;;  %s7467_s14 = smov %s5947_s16 }
 0x267   :  { %12 = sbr.rel (!%p10_p9) target bundleno = 2 (0x2), region = 93 }

// kernel: tshn_forward.3
= control target key start
LH: loop header
LB: loop body
LE: loop exit
PB: predicated region body
PF: predicated region fallthrough
CT: control target
= control target key end

     0   :  { %v5064_v1 = vmov 0   ;;  %vm103_vm0 = vcmask 1041408   ;;  %vm99_vm1 = vcmask 162816   ;;  %vm665_vm2 = vcmask 1040384   ;;  %s6478_s0 = inlined_call_operand.vmem [shape: bf16[4,20,512], index: 0, kind: input, shape index: {}]   ;;  %s6479_s3 = inlined_call_operand.vmem [shape: bf16[5,20], index: 3, kind: input, shape index: {}]   ;;  %s6480_s4 = inlined_call_operand.vmem [shape: f32[5,1], index: 4, kind: input, shape index: {}]   ;;  %s6481_s5 = inlined_call_operand.vmem [shape: bf16[1280,512], index: 5, kind: input, shape index: {}]   ;;  %s6482_s7 = inlined_call_operand.vmem [shape: bf16[512,128], index: 7, kind: input, shape index: {}]   ;;  %s6483_s13 = inlined_call_operand.vmem [shape: bf16[128,32], index: 13, kind: input, shape index: {}]   ;;  %s6484_s6 = inlined_call_operand.vmem [shape: f32[1,512], index: 6, kind: input, shape index: {}]   ;;  %s6485_s2 = inlined_call_operand.vmem [shape: f32[2,512], index: 2, kind: input, shape index: {}]   ;;  %s6486_s9 = inlined_call_operand.vmem [shape: f32[4,16], index: 9, kind: input, shape index: {}]   ;;  %s6487_s1 = inlined_call_operand.vmem [shape: f32[2,4], index: 1, kind: input, shape index: {}]   ;;  %s6488_s11 = inlined_call_operand.vmem [shape: f32[16,4], index: 11, kind: input, shape index: {}]   ;;  %s6489_s8 = inlined_call_operand.vmem [shape: f32[1,128], index: 8, kind: input, shape index: {}]   ;;  %s6490_s10 = inlined_call_operand.vmem [shape: f32[1,16], index: 10, kind: input, shape index: {}]   ;;  %s6491_s14 = inlined_call_operand.vmem [shape: f32[4,32], index: 14, kind: input, shape index: {}]   ;;  %s6492_s12 = inlined_call_operand.vmem [shape: f32[1,4], index: 12, kind: input, shape index: {}]   ;;  %s6493_s16 = inlined_call_operand.vmem [shape: f32[32,1], index: 16, kind: input, shape index: {}]   ;;  %s6494_s17 = inlined_call_operand.<no memory space> [shape: f32[1,1], index: 17, kind: input, shape index: {}]   ;;  %s6495_s15 = inlined_call_operand.vmem [shape: f32[1,32], index: 15, kind: input, shape index: {}]   ;;  %s6496_s18 = inlined_call_operand.vmem [shape: f32[2,1], index: 18, kind: output, shape index: {}]  }
   0x1   :  { %6498 = sst [smem:[#allocation3_spill]] %s6478_s0  ;;  %148 = vmatprep.mubr.bf16.mxu0 %v5064_v1  ;;  %320 = vmatprep.mubr.bf16.mxu1 %v5064_v1  ;;  %v4549_v40 = vld [vmem:[%s6481_s5 + $0xc] ss:$16 sps:$4 sm:$0xff]   ;;  %v4547_v45 = vld [vmem:[%s6481_s5 + $0x8] ss:$16 sps:$4 sm:$0xff]   ;;  %vm3454_vm4 = vcmask 1043456  }
   0x2   :  { %6499 = sst [smem:[#allocation4_spill]] %s6479_s3  ;;  %s6501_s29 = sld [smem:[#allocation3_spill]]  ;;  %4503 = vset.pattern.permute.xlu0 %v5064_v1  ;;  %v4555_v46 = vld [vmem:[%s6481_s5 + $0x2c] ss:$16 sps:$4 sm:$0xff]   ;;  %v4553_v50 = vld [vmem:[%s6481_s5 + $0x28] ss:$16 sps:$4 sm:$0xff]  }
   0x3   :  { %6500 = sst [smem:[#allocation5_spill]] %s6480_s4  ;;  %s6502_s30 = sld [smem:[#allocation4_spill]]  ;;  %v4561_v51 = vld [vmem:[%s6481_s5 + $0x4c] ss:$16 sps:$4 sm:$0xff]   ;;  %v4559_v53 = vld [vmem:[%s6481_s5 + $0x48] ss:$16 sps:$4 sm:$0xff]  }
   0x4   :  { %s6503_s4 = sld [smem:[#allocation5_spill]]  ;;  %v4567_v54 = vld [vmem:[%s6481_s5 + $0x6c] ss:$16 sps:$4 sm:$0xff]   ;;  %v4546_v57 = vld [vmem:[%s6481_s5 + $0x4] ss:$16 sps:$4 sm:$0xff]   ;;  %vm5067_vm5 = vmmov 0  }
   0x5   :  { %v4565_v58 = vld [vmem:[%s6481_s5 + $0x68] ss:$16 sps:$4 sm:$0xff]   ;;  %v4573_v59 = vld [vmem:[%s6481_s5 + $0x8c] ss:$16 sps:$4 sm:$0xff]   ;;  %v4544_v61 = vld [vmem:[%s6481_s5] ss:$16 sps:$4 sm:$0xff]  }
   0x6   :  { %v4552_v62 = vld [vmem:[%s6481_s5 + $0x24] ss:$16 sps:$4 sm:$0xff]   ;;  %v4571_v63 = vld [vmem:[%s6481_s5 + $0x88] ss:$16 sps:$4 sm:$0xff]   ;;  %vm3450_vm6 = vcmask 31744   ;;  %vm3538_vm7 = vcmask 130048  }
   0x7   :  { %vm3815_vm8 = vcmask 261120   ;;  %vm3889_vm9 = vcmask 1024  }
   0x8   :  { %v4504_v0 = vld [vmem:[%s6501_s29 + $0x4] ss:$16 sps:$4 sm:$0xff]   ;;  %v4506_v2 = vld [vmem:[%s6501_s29 + $0x3c] ss:$16 sps:$4 sm:$0xff]   ;;  %v4508_v3 = vld [vmem:[%s6501_s29] ss:$16 sps:$4 sm:$0xff]  }
   0x9   :  { %116 = vmatprep.subr.bf16.mxu0 %v4504_v0  ;;  %v4509_v4 = vld [vmem:[%s6501_s29 + $0x38] ss:$16 sps:$4 sm:$0xff]   ;;  %v67_v5 = vld [vmem:[%s6501_s29 + $0x20] sm:$0x33]  ;;  %288 = vmatprep.subr.bf16.mxu1 %v4506_v2  ;;  %v4516_v12 = vld [vmem:[%s6501_s29 + $0xc] ss:$16 sps:$4 sm:$0xff]  }
   0xa   :  { %v3900_v6 = vcombine.high %v67_v5, %v67_v5  ;;  %v3912_v7 = vld [vmem:[%s6501_s29 + $0x58] sm:$0x33]  ;;  %v3899_v8 = vcombine.low %v67_v5, %v67_v5  ;;  %117 = vmatpush1.bf16.msra.mxu0 %v4508_v3  ;;  %289 = vmatpush1.bf16.msra.mxu1 %v4509_v4  ;;  %v5195_v14 = vld [vmem:[%s6502_s30] sm:$0x7]  ;;  %v68_v16 = vld [vmem:[%s6501_s29 + $0x28] sm:$0x33] }
   0xb   :  { %v3920_v9 = vcombine.high %v3912_v7, %v3912_v7  ;;  %v3919_v10 = vcombine.low %v3912_v7, %v3912_v7  ;;  %v4519_v15 = vld [vmem:[%s6501_s29 + $0x6c] ss:$16 sps:$4 sm:$0xff]   ;;  %v4514_v17 = vld [vmem:[%s6501_s29 + $0x8] ss:$16 sps:$4 sm:$0xff]   ;;  %v3901_v20 = vcombine.low %v68_v16, %v68_v16  ;;  %v3902_v21 = vcombine.high %v68_v16, %v68_v16  ;;  %v4526_v24 = vld [vmem:[%s6501_s29 + $0x34] ss:$16 sps:$4 sm:$0xff]  }
   0xc   :  { %3903 = vmatprep.subr.msk.bf16.mxu0 %vm103_vm0, %v3900_v6  ;;  %v105_v11 = vsel %vm103_vm0, %v3899_v8, 0  ;;  %v3930_v18 = vld [vmem:[%s6501_s29 + $0x88] sm:$0x33]  ;;  %v3911_v28 = vld [vmem:[%s6501_s29 + $0x50] sm:$0x33] }
   0xd   :  { %3923 = vmatprep.subr.msk.bf16.mxu1 %vm103_vm0, %v3920_v9  ;;  %v242_v13 = vsel %vm103_vm0, %v3919_v10, 0  ;;  %v4517_v19 = vld [vmem:[%s6501_s29 + $0x68] ss:$16 sps:$4 sm:$0xff]   ;;  %v3938_v22 = vcombine.high %v3930_v18, %v3930_v18  ;;  %v3937_v23 = vcombine.low %v3930_v18, %v3930_v18  ;;  %v111_v25 = vsel %vm103_vm0, %v3901_v20, 0  ;;  %v4529_v26 = vld [vmem:[%s6501_s29 + $0x9c] ss:$16 sps:$4 sm:$0xff]  }
   0xe   :  { %119 = vmatpush1.bf16.msra.mxu0 %v105_v11  ;;  %291 = vmatpush1.bf16.msra.mxu1 %v242_v13  ;;  %v3948_v29 = vld [vmem:[%s6501_s29 + $0xb8] sm:$0x33]  ;;  %v603_v30 = vld [vmem:[%s6503_s4] sm:$0x1f]  ;;  %v3918_v33 = vcombine.high %v3911_v28, %v3911_v28  ;;  %v3917_v35 = vcombine.low %v3911_v28, %v3911_v28  ;;  %v3947_v48 = vld [vmem:[%s6501_s29 + $0xb0] sm:$0x33] }
   0xf   :  { %157 = vmatprep.subr.bf16.mxu0 %v4516_v12  ;;  %423 = vmatprep.subr.bf16.mxu1 %v4519_v15  ;;  %v377_v27 = vsel %vm103_vm0, %v3937_v23, 0  ;;  %v4524_v31 = vld [vmem:[%s6501_s29 + $0x30] ss:$16 sps:$4 sm:$0xff]   ;;  %v4527_v32 = vld [vmem:[%s6501_s29 + $0x98] ss:$16 sps:$4 sm:$0xff]   ;;  %v3956_v34 = vcombine.high %v3948_v29, %v3948_v29  ;;  %v3955_v36 = vcombine.low %v3948_v29, %v3948_v29  ;;  %v3954_v55 = vcombine.high %v3947_v48, %v3947_v48 }
  0x10   :  { %606 = vperm.xlu0 %4503, %v603_v30   ;;  %v4536_v37 = vld [vmem:[%s6501_s29 + $0x64] ss:$16 sps:$4 sm:$0xff]   ;;  %v236_v38 = vsel %vm103_vm0, %v3917_v35, 0  ;;  %v4534_v42 = vld [vmem:[%s6501_s29 + $0x60] ss:$16 sps:$4 sm:$0xff]   ;;  %v3953_v56 = vcombine.low %v3947_v48, %v3947_v48 }
  0x11   :  { %3904 = vmatmul.mubr.msk.bf16.vlgmr.msra.gmra.mrb[0].mxu0 %vm99_vm1, %v5195_v14  ;;  %3924 = vmatmul.mubr.msk.bf16.vlgmr.msra.gmra.mrb[0].mxu1 %vm99_vm1, %v5195_v14  ;;  %v512_v39 = vsel %vm103_vm0, %v3955_v36, 0  ;;  %v3929_v41 = vld [vmem:[%s6501_s29 + $0x80] sm:$0x33]  ;;  %v4579_v0 = vld [vmem:[%s6481_s5 + $0xac] ss:$16 sps:$4 sm:$0xff]  }
  0x12   :  { %158 = vmatpush1.bf16.msra.mxu0 %v4514_v17  ;;  %424 = vmatpush1.bf16.msra.mxu1 %v4517_v19  ;;  %v3936_v43 = vcombine.high %v3929_v41, %v3929_v41  ;;  %v3935_v44 = vcombine.low %v3929_v41, %v3929_v41  ;;  %v4541_v47 = vld [vmem:[%s6501_s29 + $0x94] ss:$16 sps:$4 sm:$0xff]   ;;  %v4539_v52 = vld [vmem:[%s6501_s29 + $0x90] ss:$16 sps:$4 sm:$0xff]   ;;  %v506_v60 = vsel %vm103_vm0, %v3953_v56, 0 }
  0x13   :  { %3905 = vmatprep.subr.msk.bf16.mxu0 %vm103_vm0, %v3902_v21  ;;  %3941 = vmatprep.subr.msk.bf16.mxu1 %vm103_vm0, %v3938_v22  ;;  %v4558_v2 = vld [vmem:[%s6481_s5 + $0x44] ss:$16 sps:$4 sm:$0xff]   ;;  %v4577_v3 = vld [vmem:[%s6481_s5 + $0xa8] ss:$16 sps:$4 sm:$0xff]   ;;  %v4556_v4 = vld [vmem:[%s6481_s5 + $0x40] ss:$16 sps:$4 sm:$0xff]  }
  0x14   :  { %189 = vmatprep.mubr.bf16.mxu0 %v5064_v1  ;;  %455 = vmatprep.mubr.bf16.mxu1 %v5064_v1  ;;  %v371_v49 = vsel %vm103_vm0, %v3935_v44, 0  ;;  %v4564_v5 = vld [vmem:[%s6481_s5 + $0x64] ss:$16 sps:$4 sm:$0xff]   ;;  %v4562_v6 = vld [vmem:[%s6481_s5 + $0x60] ss:$16 sps:$4 sm:$0xff]  }
  0x15   :  { %v4570_v7 = vld [vmem:[%s6481_s5 + $0x84] ss:$16 sps:$4 sm:$0xff]   ;;  %v4568_v8 = vld [vmem:[%s6481_s5 + $0x80] ss:$16 sps:$4 sm:$0xff]   ;;  %v4585_v12 = vld [vmem:[%s6481_s5 + $0xcc] ss:$16 sps:$4 sm:$0xff]  }
  0x16   :  { %160 = vmatpush1.bf16.msra.mxu0 %v111_v25  ;;  %426 = vmatpush1.bf16.msra.mxu1 %v377_v27  ;;  %v4576_v9 = vld [vmem:[%s6481_s5 + $0xa4] ss:$16 sps:$4 sm:$0xff]   ;;  %v4574_v10 = vld [vmem:[%s6481_s5 + $0xa0] ss:$16 sps:$4 sm:$0xff]   ;;  %v4589_v17 = vld [vmem:[%s6481_s5 + $0xe8] ss:$16 sps:$4 sm:$0xff]  }
  0x17   :  { %247 = vmatprep.subr.bf16.mxu0 %v4526_v24  ;;  %558 = vmatprep.subr.bf16.mxu1 %v4529_v26  ;;  %v4582_v11 = vld [vmem:[%s6481_s5 + $0xc4] ss:$16 sps:$4 sm:$0xff]   ;;  %v4580_v13 = vld [vmem:[%s6481_s5 + $0xc0] ss:$16 sps:$4 sm:$0xff]   ;;  %v4591_v18 = vld [vmem:[%s6481_s5 + $0xec] ss:$16 sps:$4 sm:$0xff]  }
  0x18   :  { %v4586_v15 = vld [vmem:[%s6481_s5 + $0xe0] ss:$16 sps:$4 sm:$0xff]   ;;  %v4588_v16 = vld [vmem:[%s6481_s5 + $0xe4] ss:$16 sps:$4 sm:$0xff]   ;;  %v4597_v20 = vld [vmem:[%s6481_s5 + $0x10c] ss:$16 sps:$4 sm:$0xff]  }
  0x19   :  { %3906 = vmatmul.mubr.msk.bf16.vlgmr.msra.gmra.mrb[4].mxu0 %vm99_vm1, %v5195_v14  ;;  %3942 = vmatmul.mubr.msk.bf16.vlgmr.msra.gmra.mrb[4].mxu1 %vm99_vm1, %v5195_v14  ;;  %v4594_v19 = vld [vmem:[%s6481_s5 + $0x104] ss:$16 sps:$4 sm:$0xff]   ;;  %v4592_v21 = vld [vmem:[%s6481_s5 + $0x100] ss:$16 sps:$4 sm:$0xff]   ;;  %v4595_v22 = vld [vmem:[%s6481_s5 + $0x108] ss:$16 sps:$4 sm:$0xff]  }
  0x1a   :  { %248 = vmatpush1.bf16.msra.mxu0 %v4524_v31  ;;  %559 = vmatpush1.bf16.msra.mxu1 %v4527_v32  ;;  %v4598_v23 = vld [vmem:[%s6481_s5 + $0x120] ss:$16 sps:$4 sm:$0xff]   ;;  %v4600_v24 = vld [vmem:[%s6481_s5 + $0x124] ss:$16 sps:$4 sm:$0xff]   ;;  %v4601_v25 = vld [vmem:[%s6481_s5 + $0x128] ss:$16 sps:$4 sm:$0xff]  }
  0x1b   :  { %3921 = vmatprep.subr.msk.bf16.mxu0 %vm103_vm0, %v3918_v33  ;;  %3959 = vmatprep.subr.msk.bf16.mxu1 %vm103_vm0, %v3956_v34  ;;  %v4603_v26 = vld [vmem:[%s6481_s5 + $0x12c] ss:$16 sps:$4 sm:$0xff]   ;;  %v4606_v27 = vld [vmem:[%s6481_s5 + $0x144] ss:$16 sps:$4 sm:$0xff]   ;;  %v4604_v29 = vld [vmem:[%s6481_s5 + $0x140] ss:$16 sps:$4 sm:$0xff]  }
  0x1c   :  { %279 = vmatprep.mubr.bf16.mxu0 %v5064_v1  ;;  %590 = vmatprep.mubr.bf16.mxu1 %v5064_v1  ;;  %v4609_v28 = vld [vmem:[%s6481_s5 + $0x14c] ss:$16 sps:$4 sm:$0xff]   ;;  %v4607_v30 = vld [vmem:[%s6481_s5 + $0x148] ss:$16 sps:$4 sm:$0xff]   ;;  %v4612_v31 = vld [vmem:[%s6481_s5 + $0x164] ss:$16 sps:$4 sm:$0xff]  }
  0x1d   :  { %v4615_v32 = vld [vmem:[%s6481_s5 + $0x16c] ss:$16 sps:$4 sm:$0xff]   ;;  %v4610_v33 = vld [vmem:[%s6481_s5 + $0x160] ss:$16 sps:$4 sm:$0xff]   ;;  %v4613_v34 = vld [vmem:[%s6481_s5 + $0x168] ss:$16 sps:$4 sm:$0xff]  }
  0x1e   :  { %250 = vmatpush1.bf16.msra.mxu0 %v236_v38  ;;  %561 = vmatpush1.bf16.msra.mxu1 %v512_v39  ;;  %v4618_v35 = vld [vmem:[%s6481_s5 + $0x184] ss:$16 sps:$4 sm:$0xff]   ;;  %v4621_v36 = vld [vmem:[%s6481_s5 + $0x18c] ss:$16 sps:$4 sm:$0xff]   ;;  %v4619_v38 = vld [vmem:[%s6481_s5 + $0x188] ss:$16 sps:$4 sm:$0xff]  }
  0x1f   :  { %382 = vmatprep.subr.bf16.mxu0 %v4536_v37  ;;  %2833 = vmatprep.subr.bf16.mxu1 %v4549_v40  ;;  %v4616_v37 = vld [vmem:[%s6481_s5 + $0x180] ss:$16 sps:$4 sm:$0xff]   ;;  %v4624_v40 = vld [vmem:[%s6481_s5 + $0x1a4] ss:$16 sps:$4 sm:$0xff]   ;;  %v4625_v41 = vld [vmem:[%s6481_s5 + $0x1a8] ss:$16 sps:$4 sm:$0xff]  }
  0x20   :  { %v4622_v39 = vld [vmem:[%s6481_s5 + $0x1a0] ss:$16 sps:$4 sm:$0xff]   ;;  %v4633_v44 = vld [vmem:[%s6481_s5 + $0x1cc] ss:$16 sps:$4 sm:$0xff]  }
  0x21   :  { %3922 = vmatmul.mubr.msk.bf16.vlgmr.msra.gmra.mrb[8].mxu0 %vm99_vm1, %v5195_v14  ;;  %3960 = vmatmul.mubr.msk.bf16.vlgmr.msra.gmra.mrb[8].mxu1 %vm99_vm1, %v5195_v14  ;;  %v4639_v48 = vld [vmem:[%s6481_s5 + $0x1ec] ss:$16 sps:$4 sm:$0xff]  }
  0x22   :  { %383 = vmatpush1.bf16.msra.mxu0 %v4534_v42  ;;  %414 = vmatprep.mubr.bf16.mxu0 %v5064_v1  ;;  %v4627_v42 = vld [vmem:[%s6481_s5 + $0x1ac] ss:$16 sps:$4 sm:$0xff]  }
  0x23   :  { %3939 = vmatprep.subr.msk.bf16.mxu0 %vm103_vm0, %v3936_v43  ;;  %2834 = vmatpush1.bf16.msra.mxu1 %v4547_v45  ;;  %v4630_v43 = vld [vmem:[%s6481_s5 + $0x1c4] ss:$16 sps:$4 sm:$0xff]   ;;  %v4628_v45 = vld [vmem:[%s6481_s5 + $0x1c0] ss:$16 sps:$4 sm:$0xff]  }
  0x24   :  { %2835 = vmatprep.subr.bf16.mxu1 %v4555_v46  ;;  %v4631_v46 = vld [vmem:[%s6481_s5 + $0x1c8] ss:$16 sps:$4 sm:$0xff]  }
  0x26   :  { %385 = vmatpush1.bf16.msra.mxu0 %v371_v49  ;;  %v4634_v49 = vld [vmem:[%s6481_s5 + $0x1e0] ss:$16 sps:$4 sm:$0xff]  }
  0x27   :  { %517 = vmatprep.subr.bf16.mxu0 %v4541_v47  ;;  %2836 = vmatpush1.bf16.msra.mxu1 %v4553_v50  ;;  %v4636_v47 = vld [vmem:[%s6481_s5 + $0x1e4] ss:$16 sps:$4 sm:$0xff]   ;;  %v4637_v50 = vld [vmem:[%s6481_s5 + $0x1e8] ss:$16 sps:$4 sm:$0xff]  }
  0x28   :  { %2837 = vmatprep.subr.bf16.mxu1 %v4561_v51  ;;  %v4642_v51 = vld [vmem:[%s6481_s5 + $0x204] ss:$16 sps:$4 sm:$0xff]  }
  0x29   :  { %3940 = vmatmul.mubr.msk.bf16.vlgmr.msra.gmra.mrb[12].mxu0 %vm99_vm1, %v5195_v14 }
  0x2a   :  { %518 = vmatpush1.bf16.msra.mxu0 %v4539_v52  ;;  %549 = vmatprep.mubr.bf16.mxu0 %v5064_v1  ;;  %v4550_v1 = vld [vmem:[%s6481_s5 + $0x20] ss:$16 sps:$4 sm:$0xff]   ;;  %v4645_v52 = vld [vmem:[%s6481_s5 + $0x20c] ss:$16 sps:$4 sm:$0xff]  }
  0x2b   :  { %3957 = vmatprep.subr.msk.bf16.mxu0 %vm103_vm0, %v3954_v55  ;;  %2838 = vmatpush1.bf16.msra.mxu1 %v4559_v53 }
  0x2c   :  { %2839 = vmatprep.subr.bf16.mxu1 %v4567_v54 }
  0x2e   :  { %520 = vmatpush1.bf16.msra.mxu0 %v506_v60 }
  0x2f   :  { %2628 = vmatprep.subr.bf16.mxu0 %v4546_v57  ;;  %2840 = vmatpush1.bf16.msra.mxu1 %v4565_v58 }
  0x30   :  { %2841 = vmatprep.subr.bf16.mxu1 %v4573_v59 }
  0x31   :  { %3958 = vmatmul.mubr.msk.bf16.vlgmr.msra.gmra.mrb[16].mxu0 %vm99_vm1, %v5195_v14  ;;  %v4583_v14 = vld [vmem:[%s6481_s5 + $0xc8] ss:$16 sps:$4 sm:$0xff]  }
  0x32   :  { %2629 = vmatpush1.bf16.msra.mxu0 %v4544_v61 }
  0x33   :  { %2630 = vmatprep.subr.bf16.mxu0 %v4552_v62  ;;  %2842 = vmatpush1.bf16.msra.mxu1 %v4571_v63 }
  0x34   :  { %2843 = vmatprep.subr.bf16.mxu1 %v4579_v0 }
  0x36   :  { %2631 = vmatpush1.bf16.msra.mxu0 %v4550_v1 }
  0x37   :  { %2632 = vmatprep.subr.bf16.mxu0 %v4558_v2  ;;  %2844 = vmatpush1.bf16.msra.mxu1 %v4577_v3 }
  0x38   :  { %2845 = vmatprep.subr.bf16.mxu1 %v4585_v12 }
  0x3a   :  { %2633 = vmatpush1.bf16.msra.mxu0 %v4556_v4 }
  0x3b   :  { %2634 = vmatprep.subr.bf16.mxu0 %v4564_v5  ;;  %2846 = vmatpush1.bf16.msra.mxu1 %v4583_v14 }
  0x3c   :  { %2847 = vmatprep.subr.bf16.mxu1 %v4591_v18 }
  0x3e   :  { %2635 = vmatpush1.bf16.msra.mxu0 %v4562_v6 }
  0x3f   :  { %2636 = vmatprep.subr.bf16.mxu0 %v4570_v7  ;;  %2848 = vmatpush1.bf16.msra.mxu1 %v4589_v17 }
  0x40   :  { %2849 = vmatprep.subr.bf16.mxu1 %v4597_v20 }
  0x42   :  { %2637 = vmatpush1.bf16.msra.mxu0 %v4568_v8 }
  0x43   :  { %2638 = vmatprep.subr.bf16.mxu0 %v4576_v9  ;;  %2850 = vmatpush1.bf16.msra.mxu1 %v4595_v22 }
  0x44   :  { %2851 = vmatprep.subr.bf16.mxu1 %v4603_v26 }
  0x46   :  { %2639 = vmatpush1.bf16.msra.mxu0 %v4574_v10 }
  0x47   :  { %2640 = vmatprep.subr.bf16.mxu0 %v4582_v11  ;;  %2852 = vmatpush1.bf16.msra.mxu1 %v4601_v25 }
  0x48   :  { %2853 = vmatprep.subr.bf16.mxu1 %v4609_v28 }
  0x4a   :  { %2641 = vmatpush1.bf16.msra.mxu0 %v4580_v13 }
  0x4b   :  { %2642 = vmatprep.subr.bf16.mxu0 %v4588_v16  ;;  %2854 = vmatpush1.bf16.msra.mxu1 %v4607_v30 }
  0x4c   :  { %2855 = vmatprep.subr.bf16.mxu1 %v4615_v32 }
  0x4e   :  { %2643 = vmatpush1.bf16.msra.mxu0 %v4586_v15 }
  0x4f   :  { %2644 = vmatprep.subr.bf16.mxu0 %v4594_v19  ;;  %2856 = vmatpush1.bf16.msra.mxu1 %v4613_v34 }
  0x50   :  { %2857 = vmatprep.subr.bf16.mxu1 %v4621_v36 }
  0x52   :  { %2645 = vmatpush1.bf16.msra.mxu0 %v4592_v21 }
  0x53   :  { %2646 = vmatprep.subr.bf16.mxu0 %v4600_v24  ;;  %2858 = vmatpush1.bf16.msra.mxu1 %v4619_v38 }
  0x54   :  { %2859 = vmatprep.subr.bf16.mxu1 %v4627_v42 }
  0x56   :  { %2647 = vmatpush1.bf16.msra.mxu0 %v4598_v23 }
  0x57   :  { %2648 = vmatprep.subr.bf16.mxu0 %v4606_v27  ;;  %2860 = vmatpush1.bf16.msra.mxu1 %v4625_v41 }
  0x58   :  { %2861 = vmatprep.subr.bf16.mxu1 %v4633_v44 }
  0x5a   :  { %2649 = vmatpush1.bf16.msra.mxu0 %v4604_v29 }
  0x5b   :  { %2650 = vmatprep.subr.bf16.mxu0 %v4612_v31  ;;  %2862 = vmatpush1.bf16.msra.mxu1 %v4631_v46 }
  0x5c   :  { %2863 = vmatprep.subr.bf16.mxu1 %v4639_v48 }
  0x5e   :  { %2651 = vmatpush1.bf16.msra.mxu0 %v4610_v33 }
  0x5f   :  { %2652 = vmatprep.subr.bf16.mxu0 %v4618_v35  ;;  %2864 = vmatpush1.bf16.msra.mxu1 %v4637_v50 }
  0x60   :  { %2874 = vmatprep.subr.bf16.mxu1 %v4645_v52 }
  0x62   :  { %2653 = vmatpush1.bf16.msra.mxu0 %v4616_v37 }
  0x63   :  { %2654 = vmatprep.subr.bf16.mxu0 %v4624_v40 }
  0x66   :  { %2655 = vmatpush1.bf16.msra.mxu0 %v4622_v39 }
  0x67   :  { %2656 = vmatprep.subr.bf16.mxu0 %v4630_v43 }
  0x6a   :  { %2657 = vmatpush1.bf16.msra.mxu0 %v4628_v45 }
  0x6b   :  { %2658 = vmatprep.subr.bf16.mxu0 %v4636_v47 }
  0x6e   :  { %2659 = vmatpush1.bf16.msra.mxu0 %v4634_v49 }
  0x6f   :  { %2669 = vmatprep.subr.bf16.mxu0 %v4642_v51 }
  0x8f   :  { %v607_v24 = vpop.permute.xlu0 %606 }
  0xe4   :  { %v150_v53 = vpop.f32.mrb[0].mxu0  ;;  %v322_v54 = vpop.f32.mrb[0].mxu1 }
  0xe5   :  { %v152_v55 = vpop.f32.mrb[1].mxu0  ;;  %v324_v56 = vpop.f32.mrb[1].mxu1 }
  0xe6   :  { %v154_v57 = vpop.f32.mrb[2].mxu0  ;;  %v326_v58 = vpop.f32.mrb[2].mxu1 }
  0xe7   :  { %v155_v59 = vpop.f32.mrb[3].mxu0  ;;  %v327_v60 = vpop.f32.mrb[3].mxu1 }
  0xec   :  { %v191_v61 = vpop.f32.mrb[4].mxu0  ;;  %v457_v62 = vpop.f32.mrb[4].mxu1 }
  0xed   :  { %v331_v63 = vmax.f32 %v191_v61, %v322_v54  ;;  %v193_v0 = vpop.f32.mrb[5].mxu0  ;;  %v459_v1 = vpop.f32.mrb[5].mxu1  ;;  %v4640_v54 = vld [vmem:[%s6481_s5 + $0x200] ss:$16 sps:$4 sm:$0xff]  }
  0xee   :  { %v332_v2 = vmax.f32 %v193_v0, %v324_v56  ;;  %v195_v3 = vpop.f32.mrb[6].mxu0  ;;  %v461_v4 = vpop.f32.mrb[6].mxu1  ;;  %v4651_v0 = vld [vmem:[%s6481_s5 + $0x22c] ss:$16 sps:$4 sm:$0xff]  }
  0xef   :  { %v466_v5 = vmax.f32 %v331_v63, %v457_v62  ;;  %v196_v6 = vpop.f32.mrb[7].mxu0  ;;  %v462_v7 = vpop.f32.mrb[7].mxu1  ;;  %v4648_v63 = vld [vmem:[%s6481_s5 + $0x224] ss:$16 sps:$4 sm:$0xff]  }
  0xf0   :  { %v467_v8 = vmax.f32 %v332_v2, %v459_v1 }
  0xf4   :  { %v281_v9 = vpop.f32.mrb[8].mxu0  ;;  %v592_v10 = vpop.f32.mrb[8].mxu1 }
  0xf5   :  { %v329_v11 = vmax.f32 %v150_v53, %v281_v9  ;;  %v601_v12 = vmax.f32 %v466_v5, %v592_v10  ;;  %v283_v13 = vpop.f32.mrb[9].mxu0  ;;  %v594_v14 = vpop.f32.mrb[9].mxu1  ;;  %v4649_v9 = vld [vmem:[%s6481_s5 + $0x228] ss:$16 sps:$4 sm:$0xff]  }
  0xf6   :  { %v330_v15 = vmax.f32 %v152_v55, %v283_v13  ;;  %v602_v16 = vmax.f32 %v467_v8, %v594_v14  ;;  %v285_v17 = vpop.f32.mrb[10].mxu0  ;;  %v596_v18 = vpop.f32.mrb[10].mxu1  ;;  %v4643_v55 = vld [vmem:[%s6481_s5 + $0x208] ss:$16 sps:$4 sm:$0xff]   ;;  %v4646_v8 = vld [vmem:[%s6481_s5 + $0x220] ss:$16 sps:$4 sm:$0xff]  }
  0xf7   :  { %v286_v19 = vpop.f32.mrb[11].mxu0  ;;  %v597_v20 = vpop.f32.mrb[11].mxu1  ;;  %v611_v28 = vadd.f32 %v607_v24, %v601_v12  ;;  %v4657_v12 = vld [vmem:[%s6481_s5 + $0x24c] ss:$16 sps:$4 sm:$0xff]   ;;  %v4660_v17 = vld [vmem:[%s6481_s5 + $0x264] ss:$16 sps:$4 sm:$0xff]  }
  0xf8   :  { %v612_v29 = vadd.f32 %v607_v24, %v602_v16  ;;  %v4655_v16 = vld [vmem:[%s6481_s5 + $0x248] ss:$16 sps:$4 sm:$0xff]   ;;  %v4663_v18 = vld [vmem:[%s6481_s5 + $0x26c] ss:$16 sps:$4 sm:$0xff]   ;;  %v4658_v19 = vld [vmem:[%s6481_s5 + $0x260] ss:$16 sps:$4 sm:$0xff]  }
  0xf9   :  { %v615_v31 = vmax.f32 %v611_v28, 0.0  ;;  %v4661_v20 = vld [vmem:[%s6481_s5 + $0x268] ss:$16 sps:$4 sm:$0xff]  }
  0xfa   :  { %v616_v34 = vmax.f32 %v612_v29, 0.0  ;;  %v4673_v28 = vld [vmem:[%s6481_s5 + $0x2a8] ss:$16 sps:$4 sm:$0xff]   ;;  %v4678_v29 = vld [vmem:[%s6481_s5 + $0x2c4] ss:$16 sps:$4 sm:$0xff]  }
  0xfb   :  { %v645_v41 = vrot.slane %v615_v31, 7  ;;  %v3963_v44 = vrot.slane %v615_v31, 9  ;;  %v3965_v3 = vrot.slane %v615_v31, 10  ;;  %v3967_v7 = vrot.slane %v615_v31, 11 }
  0xfc   :  { %v416_v21 = vpop.f32.mrb[12].mxu0  ;;  %v646_v43 = vrot.slane %v616_v34, 7  ;;  %v3964_v47 = vrot.slane %v616_v34, 9  ;;  %v3966_v52 = vrot.slane %v616_v34, 10  ;;  %v3968_v5 = vrot.slane %v616_v34, 11 }
  0xfd   :  { %v464_v22 = vmax.f32 %v329_v11, %v416_v21  ;;  %v418_v23 = vpop.f32.mrb[13].mxu0  ;;  %v4654_v11 = vld [vmem:[%s6481_s5 + $0x244] ss:$16 sps:$4 sm:$0xff]  }
  0xfe   :  { %v465_v25 = vmax.f32 %v330_v15, %v418_v23  ;;  %v420_v26 = vpop.f32.mrb[14].mxu0  ;;  %v4652_v15 = vld [vmem:[%s6481_s5 + $0x240] ss:$16 sps:$4 sm:$0xff]   ;;  %v4666_v21 = vld [vmem:[%s6481_s5 + $0x284] ss:$16 sps:$4 sm:$0xff]  }
  0xff   :  { %v421_v27 = vpop.f32.mrb[15].mxu0  ;;  %v4664_v23 = vld [vmem:[%s6481_s5 + $0x280] ss:$16 sps:$4 sm:$0xff]   ;;  %v4675_v26 = vld [vmem:[%s6481_s5 + $0x2ac] ss:$16 sps:$4 sm:$0xff]  }
 0x100   :  { %v4670_v27 = vld [vmem:[%s6481_s5 + $0x2a0] ss:$16 sps:$4 sm:$0xff]  }
 0x104   :  { %v551_v30 = vpop.f32.mrb[16].mxu0 }
 0x105   :  { %v599_v32 = vmax.f32 %v464_v22, %v551_v30  ;;  %v553_v33 = vpop.f32.mrb[17].mxu0  ;;  %v4669_v22 = vld [vmem:[%s6481_s5 + $0x28c] ss:$16 sps:$4 sm:$0xff]  }
 0x106   :  { %v600_v35 = vmax.f32 %v465_v25, %v553_v33  ;;  %v555_v36 = vpop.f32.mrb[18].mxu0  ;;  %v4672_v25 = vld [vmem:[%s6481_s5 + $0x2a4] ss:$16 sps:$4 sm:$0xff]   ;;  %v4681_v30 = vld [vmem:[%s6481_s5 + $0x2cc] ss:$16 sps:$4 sm:$0xff]  }
 0x107   :  { %v609_v37 = vadd.f32 %v607_v24, %v599_v32  ;;  %v556_v38 = vpop.f32.mrb[19].mxu0  ;;  %v4679_v32 = vld [vmem:[%s6481_s5 + $0x2c8] ss:$16 sps:$4 sm:$0xff]   ;;  %v4684_v33 = vld [vmem:[%s6481_s5 + $0x2e4] ss:$16 sps:$4 sm:$0xff]  }
 0x108   :  { %v610_v39 = vadd.f32 %v607_v24, %v600_v35  ;;  %v4667_v24 = vld [vmem:[%s6481_s5 + $0x288] ss:$16 sps:$4 sm:$0xff]   ;;  %v4682_v35 = vld [vmem:[%s6481_s5 + $0x2e0] ss:$16 sps:$4 sm:$0xff]   ;;  %v4693_v38 = vld [vmem:[%s6481_s5 + $0x30c] ss:$16 sps:$4 sm:$0xff]  }
 0x109   :  { %v613_v40 = vmax.f32 %v609_v37, 0.0  ;;  %v4685_v36 = vld [vmem:[%s6481_s5 + $0x2e8] ss:$16 sps:$4 sm:$0xff]   ;;  %v4690_v37 = vld [vmem:[%s6481_s5 + $0x304] ss:$16 sps:$4 sm:$0xff]  }
 0x10a   :  { %v614_v42 = vmax.f32 %v610_v39, 0.0  ;;  %v4688_v39 = vld [vmem:[%s6481_s5 + $0x300] ss:$16 sps:$4 sm:$0xff]  }
 0x10b   :  { %v666_v45 = vsel %vm665_vm2, %v613_v40, %v645_v41  ;;  %v619_v46 = vrot.slane %v613_v40, 1  ;;  %v623_v48 = vrot.slane %v613_v40, 2  ;;  %v627_v2 = vrot.slane %v613_v40, 3  ;;  %v4696_v41 = vld [vmem:[%s6481_s5 + $0x324] ss:$16 sps:$4 sm:$0xff]  }
 0x10c   :  { %v667_v49 = vsel %vm665_vm2, %v614_v42, %v646_v43  ;;  %v620_v50 = vrot.slane %v614_v42, 1  ;;  %v624_v51 = vrot.slane %v614_v42, 2  ;;  %v628_v58 = vrot.slane %v614_v42, 3  ;;  %v4694_v43 = vld [vmem:[%s6481_s5 + $0x320] ss:$16 sps:$4 sm:$0xff]  }
 0x10d   :  { %v677_v53 = vpack.c.bf16 %v667_v49, %v667_v49  ;;  %v5492_v56 = vsel %vm665_vm2, %v619_v46, %v615_v31  ;;  %v5495_v57 = vsel %vm665_vm2, %v623_v48, %v3963_v44  ;;  %v676_v59 = vpack.c.bf16 %v666_v45, %v666_v45  ;;  %v4676_v31 = vld [vmem:[%s6481_s5 + $0x2c0] ss:$16 sps:$4 sm:$0xff]   ;;  %v4697_v44 = vld [vmem:[%s6481_s5 + $0x328] ss:$16 sps:$4 sm:$0xff]   ;;  %v4702_v45 = vld [vmem:[%s6481_s5 + $0x344] ss:$16 sps:$4 sm:$0xff]  }
 0x10e   :  { %v669_v60 = vsel %vm665_vm2, %v620_v50, %v616_v34  ;;  %v5499_v61 = vsel %vm665_vm2, %v624_v51, %v3964_v47  ;;  %v5508_v1 = vsel %vm665_vm2, %v628_v58, %v3966_v52  ;;  %v632_v4 = vrot.slane %v614_v42, 4  ;;  %v4687_v34 = vld [vmem:[%s6481_s5 + $0x2ec] ss:$16 sps:$4 sm:$0xff]   ;;  %v4700_v47 = vld [vmem:[%s6481_s5 + $0x340] ss:$16 sps:$4 sm:$0xff]  }
 0x10f   :  { %2660 = vmatprep.mubr.bf16.mxu0 %v677_v53  ;;  %2865 = vmatprep.mubr.bf16.mxu1 %v677_v53  ;;  %v679_v62 = vpack.c.bf16 %v669_v60, %v669_v60  ;;  %v631_v6 = vrot.slane %v613_v40, 4  ;;  %v5517_v10 = vsel %vm665_vm2, %v627_v2, %v3965_v3  ;;  %v4691_v40 = vld [vmem:[%s6481_s5 + $0x308] ss:$16 sps:$4 sm:$0xff]   ;;  %v4699_v42 = vld [vmem:[%s6481_s5 + $0x32c] ss:$16 sps:$4 sm:$0xff]  }
 0x110   :  { %2661 = vmatmul.mubr.bf16.vlgmr.msra.gmra.mrb[20].mxu0 %v676_v59  ;;  %2866 = vmatmul.mubr.bf16.vlgmr.msra.gmra.mrb[12].mxu1 %v676_v59  ;;  %v5526_v13 = vsel %vm665_vm2, %v632_v4, %v3968_v5  ;;  %v4705_v46 = vld [vmem:[%s6481_s5 + $0x34c] ss:$16 sps:$4 sm:$0xff]   ;;  %v4703_v48 = vld [vmem:[%s6481_s5 + $0x348] ss:$16 sps:$4 sm:$0xff]   ;;  %v4708_v49 = vld [vmem:[%s6481_s5 + $0x364] ss:$16 sps:$4 sm:$0xff]  }
 0x111   :  { %2670 = vmatpush1.bf16.msra.mxu0 %v4640_v54  ;;  %2875 = vmatpush1.bf16.msra.mxu1 %v4643_v55  ;;  %v5529_v14 = vsel %vm665_vm2, %v631_v6, %v3967_v7  ;;  %v4711_v50 = vld [vmem:[%s6481_s5 + $0x36c] ss:$16 sps:$4 sm:$0xff]   ;;  %v4706_v51 = vld [vmem:[%s6481_s5 + $0x360] ss:$16 sps:$4 sm:$0xff]   ;;  %v4709_v52 = vld [vmem:[%s6481_s5 + $0x368] ss:$16 sps:$4 sm:$0xff]  }
 0x112   :  { %2701 = vmatprep.mubr.bf16.mxu0 %v679_v62  ;;  %2906 = vmatprep.mubr.bf16.mxu1 %v679_v62  ;;  %v4714_v53 = vld [vmem:[%s6481_s5 + $0x384] ss:$16 sps:$4 sm:$0xff]   ;;  %v4717_v54 = vld [vmem:[%s6481_s5 + $0x38c] ss:$16 sps:$4 sm:$0xff]   ;;  %v4712_v55 = vld [vmem:[%s6481_s5 + $0x380] ss:$16 sps:$4 sm:$0xff]  }
 0x113   :  { %2671 = vmatprep.subr.bf16.mxu0 %v4648_v63  ;;  %2876 = vmatprep.subr.bf16.mxu1 %v4651_v0  ;;  %v4715_v58 = vld [vmem:[%s6481_s5 + $0x388] ss:$16 sps:$4 sm:$0xff]   ;;  %v4720_v59 = vld [vmem:[%s6481_s5 + $0x3a4] ss:$16 sps:$4 sm:$0xff]   ;;  %v4723_v60 = vld [vmem:[%s6481_s5 + $0x3ac] ss:$16 sps:$4 sm:$0xff]  }
 0x114   :  { %v4718_v62 = vld [vmem:[%s6481_s5 + $0x3a0] ss:$16 sps:$4 sm:$0xff]   ;;  %v4721_v63 = vld [vmem:[%s6481_s5 + $0x3a8] ss:$16 sps:$4 sm:$0xff]   ;;  %v4726_v0 = vld [vmem:[%s6481_s5 + $0x3c4] ss:$16 sps:$4 sm:$0xff]  }
 0x115   :  { %2672 = vmatpush1.bf16.msra.mxu0 %v4646_v8  ;;  %2877 = vmatpush1.bf16.msra.mxu1 %v4649_v9  ;;  %v4729_v2 = vld [vmem:[%s6481_s5 + $0x3cc] ss:$16 sps:$4 sm:$0xff]   ;;  %v4724_v3 = vld [vmem:[%s6481_s5 + $0x3c0] ss:$16 sps:$4 sm:$0xff]   ;;  %v4727_v4 = vld [vmem:[%s6481_s5 + $0x3c8] ss:$16 sps:$4 sm:$0xff]  }
 0x116   :  { %2673 = vmatprep.subr.bf16.mxu0 %v4654_v11  ;;  %2878 = vmatprep.subr.bf16.mxu1 %v4657_v12  ;;  %v4732_v5 = vld [vmem:[%s6481_s5 + $0x3e4] ss:$16 sps:$4 sm:$0xff]   ;;  %v4735_v6 = vld [vmem:[%s6481_s5 + $0x3ec] ss:$16 sps:$4 sm:$0xff]   ;;  %v4730_v7 = vld [vmem:[%s6481_s5 + $0x3e0] ss:$16 sps:$4 sm:$0xff]  }
 0x117   :  { %v4733_v8 = vld [vmem:[%s6481_s5 + $0x3e8] ss:$16 sps:$4 sm:$0xff]   ;;  %v4738_v9 = vld [vmem:[%s6481_s5 + $0x404] ss:$16 sps:$4 sm:$0xff]   ;;  %v4741_v11 = vld [vmem:[%s6481_s5 + $0x40c] ss:$16 sps:$4 sm:$0xff]  }
 0x118   :  { %v4736_v12 = vld [vmem:[%s6481_s5 + $0x400] ss:$16 sps:$4 sm:$0xff]  }
 0x119   :  { %2674 = vmatpush1.bf16.msra.mxu0 %v4652_v15  ;;  %2879 = vmatpush1.bf16.msra.mxu1 %v4655_v16  ;;  %v678_v15 = vpack.c.bf16 %v5492_v56, %v5492_v56  ;;  %v4739_v16 = vld [vmem:[%s6481_s5 + $0x408] ss:$16 sps:$4 sm:$0xff]   ;;  %v4742_v56 = vld [vmem:[%s6481_s5 + $0x420] ss:$16 sps:$4 sm:$0xff]  }
 0x11a   :  { %2675 = vmatprep.subr.bf16.mxu0 %v4660_v17  ;;  %2880 = vmatprep.subr.bf16.mxu1 %v4663_v18  ;;  %v681_v17 = vpack.c.bf16 %v5499_v61, %v5499_v61  ;;  %v4744_v18 = vld [vmem:[%s6481_s5 + $0x424] ss:$16 sps:$4 sm:$0xff]   ;;  %v4745_v61 = vld [vmem:[%s6481_s5 + $0x428] ss:$16 sps:$4 sm:$0xff]  }
 0x11d   :  { %2676 = vmatpush1.bf16.msra.mxu0 %v4658_v19  ;;  %2881 = vmatpush1.bf16.msra.mxu1 %v4661_v20  ;;  %v4747_v19 = vld [vmem:[%s6481_s5 + $0x42c] ss:$16 sps:$4 sm:$0xff]   ;;  %v4750_v20 = vld [vmem:[%s6481_s5 + $0x444] ss:$16 sps:$4 sm:$0xff]  }
 0x11e   :  { %2677 = vmatprep.subr.bf16.mxu0 %v4666_v21  ;;  %2882 = vmatprep.subr.bf16.mxu1 %v4669_v22  ;;  %v4753_v21 = vld [vmem:[%s6481_s5 + $0x44c] ss:$16 sps:$4 sm:$0xff]   ;;  %v4748_v22 = vld [vmem:[%s6481_s5 + $0x440] ss:$16 sps:$4 sm:$0xff]  }
 0x121   :  { %2678 = vmatpush1.bf16.msra.mxu0 %v4664_v23  ;;  %2883 = vmatpush1.bf16.msra.mxu1 %v4667_v24  ;;  %v4751_v23 = vld [vmem:[%s6481_s5 + $0x448] ss:$16 sps:$4 sm:$0xff]   ;;  %v4756_v24 = vld [vmem:[%s6481_s5 + $0x464] ss:$16 sps:$4 sm:$0xff]  }
 0x122   :  { %2679 = vmatprep.subr.bf16.mxu0 %v4672_v25  ;;  %2884 = vmatprep.subr.bf16.mxu1 %v4675_v26  ;;  %v4759_v25 = vld [vmem:[%s6481_s5 + $0x46c] ss:$16 sps:$4 sm:$0xff]   ;;  %v4754_v26 = vld [vmem:[%s6481_s5 + $0x460] ss:$16 sps:$4 sm:$0xff]  }
 0x125   :  { %2680 = vmatpush1.bf16.msra.mxu0 %v4670_v27  ;;  %2885 = vmatpush1.bf16.msra.mxu1 %v4673_v28  ;;  %v4757_v27 = vld [vmem:[%s6481_s5 + $0x468] ss:$16 sps:$4 sm:$0xff]   ;;  %v4762_v28 = vld [vmem:[%s6481_s5 + $0x484] ss:$16 sps:$4 sm:$0xff]  }
 0x126   :  { %2681 = vmatprep.subr.bf16.mxu0 %v4678_v29  ;;  %2886 = vmatprep.subr.bf16.mxu1 %v4681_v30  ;;  %v4765_v29 = vld [vmem:[%s6481_s5 + $0x48c] ss:$16 sps:$4 sm:$0xff]   ;;  %v4760_v30 = vld [vmem:[%s6481_s5 + $0x480] ss:$16 sps:$4 sm:$0xff]  }
 0x129   :  { %2682 = vmatpush1.bf16.msra.mxu0 %v4676_v31  ;;  %2887 = vmatpush1.bf16.msra.mxu1 %v4679_v32  ;;  %v4763_v31 = vld [vmem:[%s6481_s5 + $0x488] ss:$16 sps:$4 sm:$0xff]   ;;  %v4768_v32 = vld [vmem:[%s6481_s5 + $0x4a4] ss:$16 sps:$4 sm:$0xff]  }
 0x12a   :  { %2683 = vmatprep.subr.bf16.mxu0 %v4684_v33  ;;  %2888 = vmatprep.subr.bf16.mxu1 %v4687_v34  ;;  %v4771_v33 = vld [vmem:[%s6481_s5 + $0x4ac] ss:$16 sps:$4 sm:$0xff]   ;;  %v4766_v34 = vld [vmem:[%s6481_s5 + $0x4a0] ss:$16 sps:$4 sm:$0xff]  }
 0x12d   :  { %2684 = vmatpush1.bf16.msra.mxu0 %v4682_v35  ;;  %2889 = vmatpush1.bf16.msra.mxu1 %v4685_v36  ;;  %v4769_v35 = vld [vmem:[%s6481_s5 + $0x4a8] ss:$16 sps:$4 sm:$0xff]   ;;  %v4774_v36 = vld [vmem:[%s6481_s5 + $0x4c4] ss:$16 sps:$4 sm:$0xff]  }
 0x12e   :  { %2685 = vmatprep.subr.bf16.mxu0 %v4690_v37  ;;  %2890 = vmatprep.subr.bf16.mxu1 %v4693_v38  ;;  %v4777_v37 = vld [vmem:[%s6481_s5 + $0x4cc] ss:$16 sps:$4 sm:$0xff]   ;;  %v4772_v38 = vld [vmem:[%s6481_s5 + $0x4c0] ss:$16 sps:$4 sm:$0xff]  }
 0x131   :  { %2686 = vmatpush1.bf16.msra.mxu0 %v4688_v39  ;;  %2891 = vmatpush1.bf16.msra.mxu1 %v4691_v40  ;;  %v4775_v39 = vld [vmem:[%s6481_s5 + $0x4c8] ss:$16 sps:$4 sm:$0xff]   ;;  %v4780_v40 = vld [vmem:[%s6481_s5 + $0x4e4] ss:$16 sps:$4 sm:$0xff]  }
 0x132   :  { %2687 = vmatprep.subr.bf16.mxu0 %v4696_v41  ;;  %2892 = vmatprep.subr.bf16.mxu1 %v4699_v42  ;;  %v4783_v41 = vld [vmem:[%s6481_s5 + $0x4ec] ss:$16 sps:$4 sm:$0xff]   ;;  %v4778_v42 = vld [vmem:[%s6481_s5 + $0x4e0] ss:$16 sps:$4 sm:$0xff]  }
 0x135   :  { %2688 = vmatpush1.bf16.msra.mxu0 %v4694_v43  ;;  %2893 = vmatpush1.bf16.msra.mxu1 %v4697_v44  ;;  %v4781_v43 = vld [vmem:[%s6481_s5 + $0x4e8] ss:$16 sps:$4 sm:$0xff]   ;;  %v4786_v44 = vld [vmem:[%s6481_s5 + $0x504] ss:$16 sps:$4 sm:$0xff]  }
 0x136   :  { %2689 = vmatprep.subr.bf16.mxu0 %v4702_v45  ;;  %2894 = vmatprep.subr.bf16.mxu1 %v4705_v46  ;;  %v4789_v45 = vld [vmem:[%s6481_s5 + $0x50c] ss:$16 sps:$4 sm:$0xff]   ;;  %v4784_v46 = vld [vmem:[%s6481_s5 + $0x500] ss:$16 sps:$4 sm:$0xff]  }
 0x139   :  { %2690 = vmatpush1.bf16.msra.mxu0 %v4700_v47  ;;  %2895 = vmatpush1.bf16.msra.mxu1 %v4703_v48  ;;  %v4787_v47 = vld [vmem:[%s6481_s5 + $0x508] ss:$16 sps:$4 sm:$0xff]   ;;  %v4792_v48 = vld [vmem:[%s6481_s5 + $0x524] ss:$16 sps:$4 sm:$0xff]  }
 0x13a   :  { %2691 = vmatprep.subr.bf16.mxu0 %v4708_v49  ;;  %2896 = vmatprep.subr.bf16.mxu1 %v4711_v50  ;;  %v4795_v49 = vld [vmem:[%s6481_s5 + $0x52c] ss:$16 sps:$4 sm:$0xff]   ;;  %v4790_v50 = vld [vmem:[%s6481_s5 + $0x520] ss:$16 sps:$4 sm:$0xff]  }
 0x13d   :  { %2692 = vmatpush1.bf16.msra.mxu0 %v4706_v51  ;;  %2897 = vmatpush1.bf16.msra.mxu1 %v4709_v52  ;;  %v4793_v51 = vld [vmem:[%s6481_s5 + $0x528] ss:$16 sps:$4 sm:$0xff]   ;;  %v4798_v52 = vld [vmem:[%s6481_s5 + $0x544] ss:$16 sps:$4 sm:$0xff]  }
 0x13e   :  { %2693 = vmatprep.subr.bf16.mxu0 %v4714_v53  ;;  %2898 = vmatprep.subr.bf16.mxu1 %v4717_v54  ;;  %v4801_v53 = vld [vmem:[%s6481_s5 + $0x54c] ss:$16 sps:$4 sm:$0xff]   ;;  %v4796_v54 = vld [vmem:[%s6481_s5 + $0x540] ss:$16 sps:$4 sm:$0xff]  }
 0x141   :  { %2694 = vmatpush1.bf16.msra.mxu0 %v4712_v55  ;;  %2899 = vmatpush1.bf16.msra.mxu1 %v4715_v58  ;;  %v4799_v55 = vld [vmem:[%s6481_s5 + $0x548] ss:$16 sps:$4 sm:$0xff]   ;;  %v4804_v58 = vld [vmem:[%s6481_s5 + $0x564] ss:$16 sps:$4 sm:$0xff]  }
 0x142   :  { %2695 = vmatprep.subr.bf16.mxu0 %v4720_v59  ;;  %2900 = vmatprep.subr.bf16.mxu1 %v4723_v60  ;;  %v4807_v59 = vld [vmem:[%s6481_s5 + $0x56c] ss:$16 sps:$4 sm:$0xff]   ;;  %v4802_v60 = vld [vmem:[%s6481_s5 + $0x560] ss:$16 sps:$4 sm:$0xff]  }
 0x145   :  { %2696 = vmatpush1.bf16.msra.mxu0 %v4718_v62  ;;  %2901 = vmatpush1.bf16.msra.mxu1 %v4721_v63  ;;  %v4805_v62 = vld [vmem:[%s6481_s5 + $0x568] ss:$16 sps:$4 sm:$0xff]   ;;  %v4810_v63 = vld [vmem:[%s6481_s5 + $0x584] ss:$16 sps:$4 sm:$0xff]  }
 0x146   :  { %2697 = vmatprep.subr.bf16.mxu0 %v4726_v0  ;;  %2902 = vmatprep.subr.bf16.mxu1 %v4729_v2  ;;  %v4813_v0 = vld [vmem:[%s6481_s5 + $0x58c] ss:$16 sps:$4 sm:$0xff]   ;;  %v4808_v2 = vld [vmem:[%s6481_s5 + $0x580] ss:$16 sps:$4 sm:$0xff]  }
 0x149   :  { %2698 = vmatpush1.bf16.msra.mxu0 %v4724_v3  ;;  %2903 = vmatpush1.bf16.msra.mxu1 %v4727_v4  ;;  %v4811_v3 = vld [vmem:[%s6481_s5 + $0x588] ss:$16 sps:$4 sm:$0xff]   ;;  %v4816_v4 = vld [vmem:[%s6481_s5 + $0x5a4] ss:$16 sps:$4 sm:$0xff]  }
 0x14a   :  { %2699 = vmatprep.subr.bf16.mxu0 %v4732_v5  ;;  %2904 = vmatprep.subr.bf16.mxu1 %v4735_v6  ;;  %v4819_v5 = vld [vmem:[%s6481_s5 + $0x5ac] ss:$16 sps:$4 sm:$0xff]   ;;  %v4814_v6 = vld [vmem:[%s6481_s5 + $0x5a0] ss:$16 sps:$4 sm:$0xff]  }
 0x14d   :  { %2700 = vmatpush1.bf16.msra.mxu0 %v4730_v7  ;;  %2905 = vmatpush1.bf16.msra.mxu1 %v4733_v8  ;;  %v4817_v7 = vld [vmem:[%s6481_s5 + $0x5a8] ss:$16 sps:$4 sm:$0xff]   ;;  %v4822_v8 = vld [vmem:[%s6481_s5 + $0x5c4] ss:$16 sps:$4 sm:$0xff]  }
 0x14e   :  { %2710 = vmatprep.subr.bf16.mxu0 %v4738_v9  ;;  %2915 = vmatprep.subr.bf16.mxu1 %v4741_v11  ;;  %v4825_v9 = vld [vmem:[%s6481_s5 + $0x5cc] ss:$16 sps:$4 sm:$0xff]   ;;  %v4820_v11 = vld [vmem:[%s6481_s5 + $0x5c0] ss:$16 sps:$4 sm:$0xff]  }
 0x150   :  { %2702 = vmatmul.mubr.bf16.vlgmr.msra.gmra.mrb[20].mxu0 %v678_v15  ;;  %2907 = vmatmul.mubr.bf16.vlgmr.msra.gmra.mrb[12].mxu1 %v678_v15  ;;  %v4828_v15 = vld [vmem:[%s6481_s5 + $0x5e4] ss:$16 sps:$4 sm:$0xff]  }
 0x151   :  { %2711 = vmatpush1.bf16.msra.mxu0 %v4736_v12  ;;  %2742 = vmatprep.mubr.bf16.mxu0 %v681_v17  ;;  %v4823_v12 = vld [vmem:[%s6481_s5 + $0x5c8] ss:$16 sps:$4 sm:$0xff]  }
 0x152   :  { %2916 = vmatpush1.bf16.msra.mxu1 %v4739_v16  ;;  %2947 = vmatprep.mubr.bf16.mxu1 %v681_v17  ;;  %v4831_v16 = vld [vmem:[%s6481_s5 + $0x5ec] ss:$16 sps:$4 sm:$0xff]   ;;  %v4826_v17 = vld [vmem:[%s6481_s5 + $0x5e0] ss:$16 sps:$4 sm:$0xff]  }
 0x153   :  { %2712 = vmatprep.subr.bf16.mxu0 %v4744_v18  ;;  %2917 = vmatprep.subr.bf16.mxu1 %v4747_v19  ;;  %v4829_v18 = vld [vmem:[%s6481_s5 + $0x5e8] ss:$16 sps:$4 sm:$0xff]   ;;  %v4834_v19 = vld [vmem:[%s6481_s5 + $0x604] ss:$16 sps:$4 sm:$0xff]  }
 0x155   :  { %2713 = vmatpush1.bf16.msra.mxu0 %v4742_v56  ;;  %v4837_v56 = vld [vmem:[%s6481_s5 + $0x60c] ss:$16 sps:$4 sm:$0xff]  }
 0x156   :  { %2918 = vmatpush1.bf16.msra.mxu1 %v4745_v61  ;;  %2714 = vmatprep.subr.bf16.mxu0 %v4750_v20  ;;  %v4832_v61 = vld [vmem:[%s6481_s5 + $0x600] ss:$16 sps:$4 sm:$0xff]   ;;  %v680_v20 = vpack.c.bf16 %v5495_v57, %v5495_v57 }
 0x157   :  { %2919 = vmatprep.subr.bf16.mxu1 %v4753_v21  ;;  %v4835_v21 = vld [vmem:[%s6481_s5 + $0x608] ss:$16 sps:$4 sm:$0xff]   ;;  %v4838_v57 = vld [vmem:[%s6481_s5 + $0x620] ss:$16 sps:$4 sm:$0xff]  }
 0x159   :  { %2715 = vmatpush1.bf16.msra.mxu0 %v4748_v22  ;;  %v4840_v22 = vld [vmem:[%s6481_s5 + $0x624] ss:$16 sps:$4 sm:$0xff]  }
 0x15a   :  { %2920 = vmatpush1.bf16.msra.mxu1 %v4751_v23  ;;  %2716 = vmatprep.subr.bf16.mxu0 %v4756_v24  ;;  %v683_v23 = vpack.c.bf16 %v5508_v1, %v5508_v1  ;;  %v4843_v24 = vld [vmem:[%s6481_s5 + $0x62c] ss:$16 sps:$4 sm:$0xff]   ;;  %v4846_v1 = vld [vmem:[%s6481_s5 + $0x644] ss:$16 sps:$4 sm:$0xff]  }
 0x15b   :  { %2921 = vmatprep.subr.bf16.mxu1 %v4759_v25  ;;  %v4841_v25 = vld [vmem:[%s6481_s5 + $0x628] ss:$16 sps:$4 sm:$0xff]  }
 0x15d   :  { %2717 = vmatpush1.bf16.msra.mxu0 %v4754_v26  ;;  %v4849_v26 = vld [vmem:[%s6481_s5 + $0x64c] ss:$16 sps:$4 sm:$0xff]  }
 0x15e   :  { %2922 = vmatpush1.bf16.msra.mxu1 %v4757_v27  ;;  %2718 = vmatprep.subr.bf16.mxu0 %v4762_v28  ;;  %v4844_v27 = vld [vmem:[%s6481_s5 + $0x640] ss:$16 sps:$4 sm:$0xff]   ;;  %v4847_v28 = vld [vmem:[%s6481_s5 + $0x648] ss:$16 sps:$4 sm:$0xff]  }
 0x15f   :  { %2923 = vmatprep.subr.bf16.mxu1 %v4765_v29  ;;  %v4852_v29 = vld [vmem:[%s6481_s5 + $0x664] ss:$16 sps:$4 sm:$0xff]  }
 0x161   :  { %2719 = vmatpush1.bf16.msra.mxu0 %v4760_v30  ;;  %v4855_v30 = vld [vmem:[%s6481_s5 + $0x66c] ss:$16 sps:$4 sm:$0xff]  }
 0x162   :  { %2924 = vmatpush1.bf16.msra.mxu1 %v4763_v31  ;;  %2720 = vmatprep.subr.bf16.mxu0 %v4768_v32  ;;  %v4850_v31 = vld [vmem:[%s6481_s5 + $0x660] ss:$16 sps:$4 sm:$0xff]   ;;  %v4853_v32 = vld [vmem:[%s6481_s5 + $0x668] ss:$16 sps:$4 sm:$0xff]  }
 0x163   :  { %2925 = vmatprep.subr.bf16.mxu1 %v4771_v33  ;;  %v4858_v33 = vld [vmem:[%s6481_s5 + $0x684] ss:$16 sps:$4 sm:$0xff]  }
 0x165   :  { %2721 = vmatpush1.bf16.msra.mxu0 %v4766_v34  ;;  %v4856_v34 = vld [vmem:[%s6481_s5 + $0x680] ss:$16 sps:$4 sm:$0xff]  }
 0x166   :  { %2926 = vmatpush1.bf16.msra.mxu1 %v4769_v35  ;;  %2722 = vmatprep.subr.bf16.mxu0 %v4774_v36  ;;  %v4861_v35 = vld [vmem:[%s6481_s5 + $0x68c] ss:$16 sps:$4 sm:$0xff]   ;;  %v4859_v36 = vld [vmem:[%s6481_s5 + $0x688] ss:$16 sps:$4 sm:$0xff]  }
 0x167   :  { %2927 = vmatprep.subr.bf16.mxu1 %v4777_v37  ;;  %v4864_v37 = vld [vmem:[%s6481_s5 + $0x6a4] ss:$16 sps:$4 sm:$0xff]  }
 0x169   :  { %2723 = vmatpush1.bf16.msra.mxu0 %v4772_v38  ;;  %v4867_v38 = vld [vmem:[%s6481_s5 + $0x6ac] ss:$16 sps:$4 sm:$0xff]  }
 0x16a   :  { %2928 = vmatpush1.bf16.msra.mxu1 %v4775_v39  ;;  %2724 = vmatprep.subr.bf16.mxu0 %v4780_v40  ;;  %v4862_v39 = vld [vmem:[%s6481_s5 + $0x6a0] ss:$16 sps:$4 sm:$0xff]   ;;  %v4865_v40 = vld [vmem:[%s6481_s5 + $0x6a8] ss:$16 sps:$4 sm:$0xff]  }
 0x16b   :  { %2929 = vmatprep.subr.bf16.mxu1 %v4783_v41  ;;  %v4870_v41 = vld [vmem:[%s6481_s5 + $0x6c4] ss:$16 sps:$4 sm:$0xff]  }
 0x16d   :  { %2725 = vmatpush1.bf16.msra.mxu0 %v4778_v42  ;;  %v4873_v42 = vld [vmem:[%s6481_s5 + $0x6cc] ss:$16 sps:$4 sm:$0xff]  }
 0x16e   :  { %2930 = vmatpush1.bf16.msra.mxu1 %v4781_v43  ;;  %2726 = vmatprep.subr.bf16.mxu0 %v4786_v44  ;;  %v4868_v43 = vld [vmem:[%s6481_s5 + $0x6c0] ss:$16 sps:$4 sm:$0xff]   ;;  %v4871_v44 = vld [vmem:[%s6481_s5 + $0x6c8] ss:$16 sps:$4 sm:$0xff]  }
 0x16f   :  { %2931 = vmatprep.subr.bf16.mxu1 %v4789_v45  ;;  %v4876_v45 = vld [vmem:[%s6481_s5 + $0x6e4] ss:$16 sps:$4 sm:$0xff]  }
 0x171   :  { %2727 = vmatpush1.bf16.msra.mxu0 %v4784_v46  ;;  %v4879_v46 = vld [vmem:[%s6481_s5 + $0x6ec] ss:$16 sps:$4 sm:$0xff]  }
 0x172   :  { %2932 = vmatpush1.bf16.msra.mxu1 %v4787_v47  ;;  %2728 = vmatprep.subr.bf16.mxu0 %v4792_v48  ;;  %v4874_v47 = vld [vmem:[%s6481_s5 + $0x6e0] ss:$16 sps:$4 sm:$0xff]   ;;  %v4877_v48 = vld [vmem:[%s6481_s5 + $0x6e8] ss:$16 sps:$4 sm:$0xff]  }
 0x173   :  { %2933 = vmatprep.subr.bf16.mxu1 %v4795_v49  ;;  %v4882_v49 = vld [vmem:[%s6481_s5 + $0x704] ss:$16 sps:$4 sm:$0xff]  }
 0x175   :  { %2729 = vmatpush1.bf16.msra.mxu0 %v4790_v50  ;;  %v4885_v50 = vld [vmem:[%s6481_s5 + $0x70c] ss:$16 sps:$4 sm:$0xff]  }
 0x176   :  { %2934 = vmatpush1.bf16.msra.mxu1 %v4793_v51  ;;  %2730 = vmatprep.subr.bf16.mxu0 %v4798_v52  ;;  %v4880_v51 = vld [vmem:[%s6481_s5 + $0x700] ss:$16 sps:$4 sm:$0xff]   ;;  %v4883_v52 = vld [vmem:[%s6481_s5 + $0x708] ss:$16 sps:$4 sm:$0xff]  }
 0x177   :  { %2935 = vmatprep.subr.bf16.mxu1 %v4801_v53  ;;  %v4888_v53 = vld [vmem:[%s6481_s5 + $0x724] ss:$16 sps:$4 sm:$0xff]  }
 0x179   :  { %2731 = vmatpush1.bf16.msra.mxu0 %v4796_v54  ;;  %v4891_v54 = vld [vmem:[%s6481_s5 + $0x72c] ss:$16 sps:$4 sm:$0xff]  }
 0x17a   :  { %2936 = vmatpush1.bf16.msra.mxu1 %v4799_v55  ;;  %2732 = vmatprep.subr.bf16.mxu0 %v4804_v58  ;;  %v4886_v55 = vld [vmem:[%s6481_s5 + $0x720] ss:$16 sps:$4 sm:$0xff]   ;;  %v4889_v58 = vld [vmem:[%s6481_s5 + $0x728] ss:$16 sps:$4 sm:$0xff]  }
 0x17b   :  { %2937 = vmatprep.subr.bf16.mxu1 %v4807_v59  ;;  %v4894_v59 = vld [vmem:[%s6481_s5 + $0x744] ss:$16 sps:$4 sm:$0xff]  }
 0x17d   :  { %2733 = vmatpush1.bf16.msra.mxu0 %v4802_v60  ;;  %v4897_v60 = vld [vmem:[%s6481_s5 + $0x74c] ss:$16 sps:$4 sm:$0xff]  }
 0x17e   :  { %2938 = vmatpush1.bf16.msra.mxu1 %v4805_v62  ;;  %2734 = vmatprep.subr.bf16.mxu0 %v4810_v63  ;;  %v4892_v62 = vld [vmem:[%s6481_s5 + $0x740] ss:$16 sps:$4 sm:$0xff]   ;;  %v4895_v63 = vld [vmem:[%s6481_s5 + $0x748] ss:$16 sps:$4 sm:$0xff]  }
 0x17f   :  { %2939 = vmatprep.subr.bf16.mxu1 %v4813_v0  ;;  %v4900_v0 = vld [vmem:[%s6481_s5 + $0x764] ss:$16 sps:$4 sm:$0xff]  }
 0x181   :  { %2735 = vmatpush1.bf16.msra.mxu0 %v4808_v2  ;;  %v4903_v2 = vld [vmem:[%s6481_s5 + $0x76c] ss:$16 sps:$4 sm:$0xff]  }
 0x182   :  { %2940 = vmatpush1.bf16.msra.mxu1 %v4811_v3  ;;  %2736 = vmatprep.subr.bf16.mxu0 %v4816_v4  ;;  %v4898_v3 = vld [vmem:[%s6481_s5 + $0x760] ss:$16 sps:$4 sm:$0xff]   ;;  %v4901_v4 = vld [vmem:[%s6481_s5 + $0x768] ss:$16 sps:$4 sm:$0xff]  }
 0x183   :  { %2941 = vmatprep.subr.bf16.mxu1 %v4819_v5  ;;  %v4906_v5 = vld [vmem:[%s6481_s5 + $0x784] ss:$16 sps:$4 sm:$0xff]  }
 0x185   :  { %2737 = vmatpush1.bf16.msra.mxu0 %v4814_v6  ;;  %v4909_v6 = vld [vmem:[%s6481_s5 + $0x78c] ss:$16 sps:$4 sm:$0xff]  }
 0x186   :  { %2942 = vmatpush1.bf16.msra.mxu1 %v4817_v7  ;;  %2738 = vmatprep.subr.bf16.mxu0 %v4822_v8  ;;  %v4904_v7 = vld [vmem:[%s6481_s5 + $0x780] ss:$16 sps:$4 sm:$0xff]   ;;  %v4907_v8 = vld [vmem:[%s6481_s5 + $0x788] ss:$16 sps:$4 sm:$0xff]  }
 0x187   :  { %2943 = vmatprep.subr.bf16.mxu1 %v4825_v9  ;;  %v4912_v9 = vld [vmem:[%s6481_s5 + $0x7a4] ss:$16 sps:$4 sm:$0xff]  }
 0x189   :  { %2739 = vmatpush1.bf16.msra.mxu0 %v4820_v11  ;;  %v4915_v11 = vld [vmem:[%s6481_s5 + $0x7ac] ss:$16 sps:$4 sm:$0xff]  }
 0x18a   :  { %2944 = vmatpush1.bf16.msra.mxu1 %v4823_v12  ;;  %2740 = vmatprep.subr.bf16.mxu0 %v4828_v15  ;;  %v4910_v12 = vld [vmem:[%s6481_s5 + $0x7a0] ss:$16 sps:$4 sm:$0xff]   ;;  %v4913_v15 = vld [vmem:[%s6481_s5 + $0x7a8] ss:$16 sps:$4 sm:$0xff]  }
 0x18b   :  { %2945 = vmatprep.subr.bf16.mxu1 %v4831_v16  ;;  %v4918_v16 = vld [vmem:[%s6481_s5 + $0x7c4] ss:$16 sps:$4 sm:$0xff]  }
 0x18d   :  { %2741 = vmatpush1.bf16.msra.mxu0 %v4826_v17  ;;  %v4921_v17 = vld [vmem:[%s6481_s5 + $0x7cc] ss:$16 sps:$4 sm:$0xff]  }
 0x18e   :  { %2946 = vmatpush1.bf16.msra.mxu1 %v4829_v18  ;;  %2751 = vmatprep.subr.bf16.mxu0 %v4834_v19  ;;  %v4916_v18 = vld [vmem:[%s6481_s5 + $0x7c0] ss:$16 sps:$4 sm:$0xff]   ;;  %v4919_v19 = vld [vmem:[%s6481_s5 + $0x7c8] ss:$16 sps:$4 sm:$0xff]  }
 0x18f   :  { %2956 = vmatprep.subr.bf16.mxu1 %v4837_v56  ;;  %v4924_v56 = vld [vmem:[%s6481_s5 + $0x7e4] ss:$16 sps:$4 sm:$0xff]  }
 0x190   :  { %2743 = vmatmul.mubr.bf16.vlgmr.msra.gmra.mrb[20].mxu0 %v680_v20 }
 0x191   :  { %2948 = vmatmul.mubr.bf16.vlgmr.msra.gmra.mrb[12].mxu1 %v680_v20  ;;  %2752 = vmatpush1.bf16.msra.mxu0 %v4832_v61  ;;  %v4927_v61 = vld [vmem:[%s6481_s5 + $0x7ec] ss:$16 sps:$4 sm:$0xff]   ;;  %v4922_v20 = vld [vmem:[%s6481_s5 + $0x7e0] ss:$16 sps:$4 sm:$0xff]  }
 0x192   :  { %2783 = vmatprep.mubr.bf16.mxu0 %v683_v23  ;;  %2957 = vmatpush1.bf16.msra.mxu1 %v4835_v21  ;;  %v4925_v21 = vld [vmem:[%s6481_s5 + $0x7e8] ss:$16 sps:$4 sm:$0xff]  }
 0x193   :  { %2988 = vmatprep.mubr.bf16.mxu1 %v683_v23  ;;  %2753 = vmatprep.subr.bf16.mxu0 %v4840_v22  ;;  %v4930_v22 = vld [vmem:[%s6481_s5 + $0x804] ss:$16 sps:$4 sm:$0xff]   ;;  %v4933_v23 = vld [vmem:[%s6481_s5 + $0x80c] ss:$16 sps:$4 sm:$0xff]  }
 0x194   :  { %2958 = vmatprep.subr.bf16.mxu1 %v4843_v24  ;;  %v4928_v24 = vld [vmem:[%s6481_s5 + $0x800] ss:$16 sps:$4 sm:$0xff]  }
 0x195   :  { %2754 = vmatpush1.bf16.msra.mxu0 %v4838_v57  ;;  %v682_v57 = vpack.c.bf16 %v5517_v10, %v5517_v10  ;;  %v4934_v10 = vld [vmem:[%s6481_s5 + $0x820] ss:$16 sps:$4 sm:$0xff]  }
 0x196   :  { %2959 = vmatpush1.bf16.msra.mxu1 %v4841_v25  ;;  %2755 = vmatprep.subr.bf16.mxu0 %v4846_v1  ;;  %v4931_v25 = vld [vmem:[%s6481_s5 + $0x808] ss:$16 sps:$4 sm:$0xff]   ;;  %v4936_v1 = vld [vmem:[%s6481_s5 + $0x824] ss:$16 sps:$4 sm:$0xff]  }
 0x197   :  { %2960 = vmatprep.subr.bf16.mxu1 %v4849_v26  ;;  %v685_v26 = vpack.c.bf16 %v5526_v13, %v5526_v13  ;;  %v4942_v13 = vld [vmem:[%s6481_s5 + $0x844] ss:$16 sps:$4 sm:$0xff]  }
 0x199   :  { %2756 = vmatpush1.bf16.msra.mxu0 %v4844_v27  ;;  %v4939_v27 = vld [vmem:[%s6481_s5 + $0x82c] ss:$16 sps:$4 sm:$0xff]  }
 0x19a   :  { %2961 = vmatpush1.bf16.msra.mxu1 %v4847_v28  ;;  %2757 = vmatprep.subr.bf16.mxu0 %v4852_v29  ;;  %v4937_v28 = vld [vmem:[%s6481_s5 + $0x828] ss:$16 sps:$4 sm:$0xff]   ;;  %v4945_v29 = vld [vmem:[%s6481_s5 + $0x84c] ss:$16 sps:$4 sm:$0xff]  }
 0x19b   :  { %2962 = vmatprep.subr.bf16.mxu1 %v4855_v30  ;;  %v4940_v30 = vld [vmem:[%s6481_s5 + $0x840] ss:$16 sps:$4 sm:$0xff]  }
 0x19d   :  { %2758 = vmatpush1.bf16.msra.mxu0 %v4850_v31  ;;  %v4943_v31 = vld [vmem:[%s6481_s5 + $0x848] ss:$16 sps:$4 sm:$0xff]  }
 0x19e   :  { %2963 = vmatpush1.bf16.msra.mxu1 %v4853_v32  ;;  %2759 = vmatprep.subr.bf16.mxu0 %v4858_v33  ;;  %v4948_v32 = vld [vmem:[%s6481_s5 + $0x864] ss:$16 sps:$4 sm:$0xff]   ;;  %v4951_v33 = vld [vmem:[%s6481_s5 + $0x86c] ss:$16 sps:$4 sm:$0xff]  }
 0x19f   :  { %2964 = vmatprep.subr.bf16.mxu1 %v4861_v35  ;;  %v4949_v35 = vld [vmem:[%s6481_s5 + $0x868] ss:$16 sps:$4 sm:$0xff]  }
 0x1a1   :  { %2760 = vmatpush1.bf16.msra.mxu0 %v4856_v34  ;;  %v4946_v34 = vld [vmem:[%s6481_s5 + $0x860] ss:$16 sps:$4 sm:$0xff]  }
 0x1a2   :  { %2965 = vmatpush1.bf16.msra.mxu1 %v4859_v36  ;;  %2761 = vmatprep.subr.bf16.mxu0 %v4864_v37  ;;  %v4954_v36 = vld [vmem:[%s6481_s5 + $0x884] ss:$16 sps:$4 sm:$0xff]   ;;  %v4957_v37 = vld [vmem:[%s6481_s5 + $0x88c] ss:$16 sps:$4 sm:$0xff]  }
 0x1a3   :  { %2966 = vmatprep.subr.bf16.mxu1 %v4867_v38  ;;  %v4952_v38 = vld [vmem:[%s6481_s5 + $0x880] ss:$16 sps:$4 sm:$0xff]  }
 0x1a5   :  { %2762 = vmatpush1.bf16.msra.mxu0 %v4862_v39  ;;  %v4955_v39 = vld [vmem:[%s6481_s5 + $0x888] ss:$16 sps:$4 sm:$0xff]  }
 0x1a6   :  { %2967 = vmatpush1.bf16.msra.mxu1 %v4865_v40  ;;  %2763 = vmatprep.subr.bf16.mxu0 %v4870_v41  ;;  %v4960_v40 = vld [vmem:[%s6481_s5 + $0x8a4] ss:$16 sps:$4 sm:$0xff]   ;;  %v4963_v41 = vld [vmem:[%s6481_s5 + $0x8ac] ss:$16 sps:$4 sm:$0xff]  }
 0x1a7   :  { %2968 = vmatprep.subr.bf16.mxu1 %v4873_v42  ;;  %v4958_v42 = vld [vmem:[%s6481_s5 + $0x8a0] ss:$16 sps:$4 sm:$0xff]  }
 0x1a9   :  { %2764 = vmatpush1.bf16.msra.mxu0 %v4868_v43  ;;  %v4961_v43 = vld [vmem:[%s6481_s5 + $0x8a8] ss:$16 sps:$4 sm:$0xff]  }
 0x1aa   :  { %2969 = vmatpush1.bf16.msra.mxu1 %v4871_v44  ;;  %2765 = vmatprep.subr.bf16.mxu0 %v4876_v45  ;;  %v4966_v44 = vld [vmem:[%s6481_s5 + $0x8c4] ss:$16 sps:$4 sm:$0xff]   ;;  %v4969_v45 = vld [vmem:[%s6481_s5 + $0x8cc] ss:$16 sps:$4 sm:$0xff]  }
 0x1ab   :  { %2970 = vmatprep.subr.bf16.mxu1 %v4879_v46  ;;  %v4964_v46 = vld [vmem:[%s6481_s5 + $0x8c0] ss:$16 sps:$4 sm:$0xff]  }
 0x1ad   :  { %2766 = vmatpush1.bf16.msra.mxu0 %v4874_v47  ;;  %v4967_v47 = vld [vmem:[%s6481_s5 + $0x8c8] ss:$16 sps:$4 sm:$0xff]  }
 0x1ae   :  { %2971 = vmatpush1.bf16.msra.mxu1 %v4877_v48  ;;  %2767 = vmatprep.subr.bf16.mxu0 %v4882_v49  ;;  %v4972_v48 = vld [vmem:[%s6481_s5 + $0x8e4] ss:$16 sps:$4 sm:$0xff]   ;;  %v4975_v49 = vld [vmem:[%s6481_s5 + $0x8ec] ss:$16 sps:$4 sm:$0xff]  }
 0x1af   :  { %2972 = vmatprep.subr.bf16.mxu1 %v4885_v50  ;;  %v4970_v50 = vld [vmem:[%s6481_s5 + $0x8e0] ss:$16 sps:$4 sm:$0xff]  }
 0x1b1   :  { %2768 = vmatpush1.bf16.msra.mxu0 %v4880_v51  ;;  %v4973_v51 = vld [vmem:[%s6481_s5 + $0x8e8] ss:$16 sps:$4 sm:$0xff]  }
 0x1b2   :  { %2973 = vmatpush1.bf16.msra.mxu1 %v4883_v52  ;;  %2769 = vmatprep.subr.bf16.mxu0 %v4888_v53  ;;  %v4978_v52 = vld [vmem:[%s6481_s5 + $0x904] ss:$16 sps:$4 sm:$0xff]   ;;  %v4981_v53 = vld [vmem:[%s6481_s5 + $0x90c] ss:$16 sps:$4 sm:$0xff]  }
 0x1b3   :  { %2974 = vmatprep.subr.bf16.mxu1 %v4891_v54  ;;  %v4976_v54 = vld [vmem:[%s6481_s5 + $0x900] ss:$16 sps:$4 sm:$0xff]  }
 0x1b5   :  { %2770 = vmatpush1.bf16.msra.mxu0 %v4886_v55  ;;  %v4979_v55 = vld [vmem:[%s6481_s5 + $0x908] ss:$16 sps:$4 sm:$0xff]  }
 0x1b6   :  { %2975 = vmatpush1.bf16.msra.mxu1 %v4889_v58  ;;  %2771 = vmatprep.subr.bf16.mxu0 %v4894_v59  ;;  %v4984_v58 = vld [vmem:[%s6481_s5 + $0x924] ss:$16 sps:$4 sm:$0xff]   ;;  %v4987_v59 = vld [vmem:[%s6481_s5 + $0x92c] ss:$16 sps:$4 sm:$0xff]  }
 0x1b7   :  { %2976 = vmatprep.subr.bf16.mxu1 %v4897_v60  ;;  %v4982_v60 = vld [vmem:[%s6481_s5 + $0x920] ss:$16 sps:$4 sm:$0xff]  }
 0x1b9   :  { %2772 = vmatpush1.bf16.msra.mxu0 %v4892_v62  ;;  %v4985_v62 = vld [vmem:[%s6481_s5 + $0x928] ss:$16 sps:$4 sm:$0xff]  }
 0x1ba   :  { %2977 = vmatpush1.bf16.msra.mxu1 %v4895_v63  ;;  %2773 = vmatprep.subr.bf16.mxu0 %v4900_v0  ;;  %v4990_v63 = vld [vmem:[%s6481_s5 + $0x944] ss:$16 sps:$4 sm:$0xff]   ;;  %v4993_v0 = vld [vmem:[%s6481_s5 + $0x94c] ss:$16 sps:$4 sm:$0xff]  }
 0x1bb   :  { %2978 = vmatprep.subr.bf16.mxu1 %v4903_v2  ;;  %v4988_v2 = vld [vmem:[%s6481_s5 + $0x940] ss:$16 sps:$4 sm:$0xff]  }
 0x1bd   :  { %2774 = vmatpush1.bf16.msra.mxu0 %v4898_v3  ;;  %v4991_v3 = vld [vmem:[%s6481_s5 + $0x948] ss:$16 sps:$4 sm:$0xff]  }
 0x1be   :  { %2979 = vmatpush1.bf16.msra.mxu1 %v4901_v4  ;;  %2775 = vmatprep.subr.bf16.mxu0 %v4906_v5  ;;  %v4996_v4 = vld [vmem:[%s6481_s5 + $0x964] ss:$16 sps:$4 sm:$0xff]   ;;  %v4999_v5 = vld [vmem:[%s6481_s5 + $0x96c] ss:$16 sps:$4 sm:$0xff]  }
 0x1bf   :  { %2980 = vmatprep.subr.bf16.mxu1 %v4909_v6  ;;  %v4994_v6 = vld [vmem:[%s6481_s5 + $0x960] ss:$16 sps:$4 sm:$0xff]  }
 0x1c1   :  { %2776 = vmatpush1.bf16.msra.mxu0 %v4904_v7  ;;  %v4997_v7 = vld [vmem:[%s6481_s5 + $0x968] ss:$16 sps:$4 sm:$0xff]  }
 0x1c2   :  { %2981 = vmatpush1.bf16.msra.mxu1 %v4907_v8  ;;  %2777 = vmatprep.subr.bf16.mxu0 %v4912_v9  ;;  %v5002_v8 = vld [vmem:[%s6481_s5 + $0x984] ss:$16 sps:$4 sm:$0xff]   ;;  %v5005_v9 = vld [vmem:[%s6481_s5 + $0x98c] ss:$16 sps:$4 sm:$0xff]  }
 0x1c3   :  { %2982 = vmatprep.subr.bf16.mxu1 %v4915_v11  ;;  %v5000_v11 = vld [vmem:[%s6481_s5 + $0x980] ss:$16 sps:$4 sm:$0xff]  }
 0x1c5   :  { %2778 = vmatpush1.bf16.msra.mxu0 %v4910_v12  ;;  %v5003_v12 = vld [vmem:[%s6481_s5 + $0x988] ss:$16 sps:$4 sm:$0xff]  }
 0x1c6   :  { %2983 = vmatpush1.bf16.msra.mxu1 %v4913_v15  ;;  %2779 = vmatprep.subr.bf16.mxu0 %v4918_v16  ;;  %v5008_v15 = vld [vmem:[%s6481_s5 + $0x9a4] ss:$16 sps:$4 sm:$0xff]   ;;  %v5011_v16 = vld [vmem:[%s6481_s5 + $0x9ac] ss:$16 sps:$4 sm:$0xff]  }
 0x1c7   :  { %2984 = vmatprep.subr.bf16.mxu1 %v4921_v17  ;;  %v5006_v17 = vld [vmem:[%s6481_s5 + $0x9a0] ss:$16 sps:$4 sm:$0xff]  }
 0x1c9   :  { %2780 = vmatpush1.bf16.msra.mxu0 %v4916_v18  ;;  %v5009_v18 = vld [vmem:[%s6481_s5 + $0x9a8] ss:$16 sps:$4 sm:$0xff]  }
 0x1ca   :  { %2985 = vmatpush1.bf16.msra.mxu1 %v4919_v19  ;;  %2781 = vmatprep.subr.bf16.mxu0 %v4924_v56  ;;  %v5014_v19 = vld [vmem:[%s6481_s5 + $0x9c4] ss:$16 sps:$4 sm:$0xff]   ;;  %v5017_v56 = vld [vmem:[%s6481_s5 + $0x9cc] ss:$16 sps:$4 sm:$0xff]  }
 0x1cb   :  { %2986 = vmatprep.subr.bf16.mxu1 %v4927_v61  ;;  %v5012_v61 = vld [vmem:[%s6481_s5 + $0x9c0] ss:$16 sps:$4 sm:$0xff]  }
 0x1cd   :  { %2782 = vmatpush1.bf16.msra.mxu0 %v4922_v20  ;;  %v5015_v20 = vld [vmem:[%s6481_s5 + $0x9c8] ss:$16 sps:$4 sm:$0xff]  }
 0x1ce   :  { %2987 = vmatpush1.bf16.msra.mxu1 %v4925_v21  ;;  %2792 = vmatprep.subr.bf16.mxu0 %v4930_v22  ;;  %v5020_v21 = vld [vmem:[%s6481_s5 + $0x9e4] ss:$16 sps:$4 sm:$0xff]   ;;  %v5023_v22 = vld [vmem:[%s6481_s5 + $0x9ec] ss:$16 sps:$4 sm:$0xff]  }
 0x1cf   :  { %2997 = vmatprep.subr.bf16.mxu1 %v4933_v23  ;;  %v5018_v23 = vld [vmem:[%s6481_s5 + $0x9e0] ss:$16 sps:$4 sm:$0xff]  }
 0x1d0   :  { %2784 = vmatmul.mubr.bf16.vlgmr.msra.gmra.mrb[20].mxu0 %v682_v57 }
 0x1d1   :  { %2989 = vmatmul.mubr.bf16.vlgmr.msra.gmra.mrb[12].mxu1 %v682_v57  ;;  %2793 = vmatpush1.bf16.msra.mxu0 %v4928_v24  ;;  %v5021_v24 = vld [vmem:[%s6481_s5 + $0x9e8] ss:$16 sps:$4 sm:$0xff]   ;;  %v5024_v57 = vld [vmem:[%s6482_s7 + $0x40] sm:$0xff]  }
 0x1d2   :  { %2824 = vmatprep.mubr.bf16.mxu0 %v685_v26  ;;  %2998 = vmatpush1.bf16.msra.mxu1 %v4931_v25  ;;  %v5026_v25 = vld [vmem:[%s6482_s7 + $0xc0] sm:$0xff]  }
 0x1d3   :  { %3029 = vmatprep.mubr.bf16.mxu1 %v685_v26  ;;  %2794 = vmatprep.subr.bf16.mxu0 %v4936_v1  ;;  %v5025_v1 = vld [vmem:[%s6482_s7] sm:$0xff]   ;;  %v684_v26 = vpack.c.bf16 %v5529_v14, %v5529_v14  ;;  %v5029_v14 = vld [vmem:[%s6482_s7 + $0x8] sm:$0xff]  }
 0x1d4   :  { %2999 = vmatprep.subr.bf16.mxu1 %v4939_v27  ;;  %v5027_v27 = vld [vmem:[%s6482_s7 + $0x80] sm:$0xff]  }
 0x1d5   :  { %2795 = vmatpush1.bf16.msra.mxu0 %v4934_v10  ;;  %v5028_v10 = vld [vmem:[%s6482_s7 + $0x48] sm:$0xff]  }
 0x1d6   :  { %3000 = vmatpush1.bf16.msra.mxu1 %v4937_v28  ;;  %2796 = vmatprep.subr.bf16.mxu0 %v4942_v13  ;;  %v5030_v28 = vld [vmem:[%s6482_s7 + $0xc8] sm:$0xff]  }
 0x1d7   :  { %3001 = vmatprep.subr.bf16.mxu1 %v4945_v29  ;;  %v5031_v13 = vld [vmem:[%s6482_s7 + $0x88] sm:$0xff]   ;;  %v5032_v29 = vld [vmem:[%s6482_s7 + $0x50] sm:$0xff]  }
 0x1d9   :  { %2797 = vmatpush1.bf16.msra.mxu0 %v4940_v30  ;;  %v5033_v30 = vld [vmem:[%s6482_s7 + $0x10] sm:$0xff]  }
 0x1da   :  { %3002 = vmatpush1.bf16.msra.mxu1 %v4943_v31  ;;  %2798 = vmatprep.subr.bf16.mxu0 %v4948_v32  ;;  %v5034_v31 = vld [vmem:[%s6482_s7 + $0xd0] sm:$0xff]  }
 0x1db   :  { %3003 = vmatprep.subr.bf16.mxu1 %v4951_v33  ;;  %v5035_v32 = vld [vmem:[%s6482_s7 + $0x90] sm:$0xff]   ;;  %v5036_v33 = vld [vmem:[%s6482_s7 + $0x58] sm:$0xff]  }
 0x1dd   :  { %2799 = vmatpush1.bf16.msra.mxu0 %v4946_v34  ;;  %v5037_v34 = vld [vmem:[%s6482_s7 + $0x18] sm:$0xff]  }
 0x1de   :  { %3004 = vmatpush1.bf16.msra.mxu1 %v4949_v35  ;;  %2800 = vmatprep.subr.bf16.mxu0 %v4954_v36  ;;  %v5038_v35 = vld [vmem:[%s6482_s7 + $0xd8] sm:$0xff]  }
 0x1df   :  { %3005 = vmatprep.subr.bf16.mxu1 %v4957_v37  ;;  %v5039_v36 = vld [vmem:[%s6482_s7 + $0x98] sm:$0xff]   ;;  %v5040_v37 = vld [vmem:[%s6482_s7 + $0x60] sm:$0xff]  }
 0x1e1   :  { %2801 = vmatpush1.bf16.msra.mxu0 %v4952_v38  ;;  %v5041_v38 = vld [vmem:[%s6482_s7 + $0x20] sm:$0xff]  }
 0x1e2   :  { %3006 = vmatpush1.bf16.msra.mxu1 %v4955_v39  ;;  %2802 = vmatprep.subr.bf16.mxu0 %v4960_v40  ;;  %v5042_v39 = vld [vmem:[%s6482_s7 + $0xe0] sm:$0xff]  }
 0x1e3   :  { %3007 = vmatprep.subr.bf16.mxu1 %v4963_v41  ;;  %v5043_v40 = vld [vmem:[%s6482_s7 + $0xa0] sm:$0xff]   ;;  %v5044_v41 = vld [vmem:[%s6482_s7 + $0x68] sm:$0xff]  }
 0x1e5   :  { %2803 = vmatpush1.bf16.msra.mxu0 %v4958_v42  ;;  %v5045_v42 = vld [vmem:[%s6482_s7 + $0x28] sm:$0xff]  }
 0x1e6   :  { %3008 = vmatpush1.bf16.msra.mxu1 %v4961_v43  ;;  %2804 = vmatprep.subr.bf16.mxu0 %v4966_v44  ;;  %v5046_v43 = vld [vmem:[%s6482_s7 + $0xe8] sm:$0xff]  }
 0x1e7   :  { %3009 = vmatprep.subr.bf16.mxu1 %v4969_v45  ;;  %v5047_v44 = vld [vmem:[%s6482_s7 + $0xa8] sm:$0xff]   ;;  %v5048_v45 = vld [vmem:[%s6482_s7 + $0x70] sm:$0xff]  }
 0x1e9   :  { %2805 = vmatpush1.bf16.msra.mxu0 %v4964_v46  ;;  %v5050_v46 = vld [vmem:[%s6482_s7 + $0xf0] sm:$0xff]  }
 0x1ea   :  { %3010 = vmatpush1.bf16.msra.mxu1 %v4967_v47  ;;  %2806 = vmatprep.subr.bf16.mxu0 %v4972_v48  ;;  %v5049_v47 = vld [vmem:[%s6482_s7 + $0x30] sm:$0xff]   ;;  %v5052_v48 = vld [vmem:[%s6482_s7 + $0x78] sm:$0xff]  }
 0x1eb   :  { %3011 = vmatprep.subr.bf16.mxu1 %v4975_v49  ;;  %v5051_v49 = vld [vmem:[%s6482_s7 + $0xb0] sm:$0xff]  }
 0x1ed   :  { %2807 = vmatpush1.bf16.msra.mxu0 %v4970_v50  ;;  %v5054_v50 = vld [vmem:[%s6482_s7 + $0xf8] sm:$0xff]  }
 0x1ee   :  { %3012 = vmatpush1.bf16.msra.mxu1 %v4973_v51  ;;  %2808 = vmatprep.subr.bf16.mxu0 %v4978_v52  ;;  %v5053_v51 = vld [vmem:[%s6482_s7 + $0x38] sm:$0xff]  }
 0x1ef   :  { %3013 = vmatprep.subr.bf16.mxu1 %v4981_v53  ;;  %v5055_v52 = vld [vmem:[%s6482_s7 + $0xb8] sm:$0xff]   ;;  %v5065_v53 = vmov 0.0  }
 0x1f1   :  { %2809 = vmatpush1.bf16.msra.mxu0 %v4976_v54  ;;  %v1008_v54 = vlaneseq }
 0x1f2   :  { %3014 = vmatpush1.bf16.msra.mxu1 %v4979_v55  ;;  %2810 = vmatprep.subr.bf16.mxu0 %v4984_v58 }
 0x1f3   :  { %3015 = vmatprep.subr.bf16.mxu1 %v4987_v59  ;;  %v1009_v55 = vshrl.u32 %v1008_v54, 7  ;;  %v1006_v59 = vld [vmem:[%s6484_s6] sm:$0xf] }
 0x1f5   :  { %2811 = vmatpush1.bf16.msra.mxu0 %v4982_v60  ;;  %v1010_v58 = vsub.s32 0, %v1009_v55  ;;  %v1018_v60 = vsub.s32 2, %v1009_v55 }
 0x1f6   :  { %3016 = vmatpush1.bf16.msra.mxu1 %v4985_v62  ;;  %2812 = vmatprep.subr.bf16.mxu0 %v4990_v63  ;;  %v1014_v62 = vsub.s32 1, %v1009_v55  ;;  %v1022_v63 = vsub.s32 3, %v1009_v55 }
 0x1f7   :  { %3017 = vmatprep.subr.bf16.mxu1 %v4993_v0  ;;  %v1011_v0 = vrot.slane %v1006_v59, %v1010_v58 }
 0x1f9   :  { %2813 = vmatpush1.bf16.msra.mxu0 %v4988_v2  ;;  %v1019_v2 = vrot.slane %v1006_v59, %v1018_v60 }
 0x1fa   :  { %3018 = vmatpush1.bf16.msra.mxu1 %v4991_v3  ;;  %2814 = vmatprep.subr.bf16.mxu0 %v4996_v4  ;;  %v1015_v3 = vrot.slane %v1006_v59, %v1014_v62  ;;  %v5066_v4 = vmov 1983009808  }
 0x1fb   :  { %3019 = vmatprep.subr.bf16.mxu1 %v4999_v5  ;;  %v3055_v5 = vunpack.c.l.s4 %v5066_v4 }
 0x1fd   :  { %2815 = vmatpush1.bf16.msra.mxu0 %v4994_v6  ;;  %v1023_v6 = vrot.slane %v1006_v59, %v1022_v63  ;;  %v4289_v59 = vld [vmem:[%s6489_s8] ss:$0 sm:$0xff] }
 0x1fe   :  { %3020 = vmatpush1.bf16.msra.mxu1 %v4997_v7  ;;  %2816 = vmatprep.subr.bf16.mxu0 %v5002_v8 }
 0x1ff   :  { %3021 = vmatprep.subr.bf16.mxu1 %v5005_v9 }
 0x201   :  { %2817 = vmatpush1.bf16.msra.mxu0 %v5000_v11 }
 0x202   :  { %3022 = vmatpush1.bf16.msra.mxu1 %v5003_v12  ;;  %2818 = vmatprep.subr.bf16.mxu0 %v5008_v15 }
 0x203   :  { %3023 = vmatprep.subr.bf16.mxu1 %v5011_v16  ;;  %v3056_v16 = vunpack.c.0.s8 %v3055_v5 }
 0x205   :  { %2819 = vmatpush1.bf16.msra.mxu0 %v5006_v17 }
 0x206   :  { %3024 = vmatpush1.bf16.msra.mxu1 %v5009_v18  ;;  %2820 = vmatprep.subr.bf16.mxu0 %v5014_v19 }
 0x207   :  { %3025 = vmatprep.subr.bf16.mxu1 %v5017_v56 }
 0x209   :  { %2821 = vmatpush1.bf16.msra.mxu0 %v5012_v61 }
 0x20a   :  { %3026 = vmatpush1.bf16.msra.mxu1 %v5015_v20  ;;  %2822 = vmatprep.subr.bf16.mxu0 %v5020_v21 }
 0x20b   :  { %3027 = vmatprep.subr.bf16.mxu1 %v5023_v22 }
 0x20d   :  { %2823 = vmatpush1.bf16.msra.mxu0 %v5018_v23 }
 0x20e   :  { %3028 = vmatpush1.bf16.msra.mxu1 %v5021_v24  ;;  %4340 = vmatprep.subr.bf16.mxu0 %v5024_v57 }
 0x20f   :  { %4362 = vmatprep.subr.bf16.mxu1 %v5026_v25 }
 0x210   :  { %2825 = vmatmul.mubr.bf16.vlgmr.msra.gmra.mrb[20].mxu0 %v684_v26 }
 0x211   :  { %3030 = vmatmul.mubr.bf16.vlgmr.msra.gmra.mrb[12].mxu1 %v684_v26  ;;  %4341 = vmatpush3.bf16.msra.mxu0 %v5025_v1  ;;  %v3059_v26 = vsub.s32 %v3056_v16, %v1009_v55  ;;  %v5068_v55 = vmov 0.0|0.0  }
 0x212   :  { %4363 = vmatpush3.bf16.msra.mxu1 %v5027_v27  ;;  %4342 = vmatprep.subr.bf16.mxu0 %v5028_v10 }
 0x213   :  { %4364 = vmatprep.subr.bf16.mxu1 %v5030_v28 }
 0x215   :  { %4343 = vmatpush3.bf16.msra.mxu0 %v5029_v14  ;;  %v3042_v14 = vld [vmem:[%s6485_s2] sm:$0xff] }
 0x216   :  { %4365 = vmatpush3.bf16.msra.mxu1 %v5031_v13  ;;  %4344 = vmatprep.subr.bf16.mxu0 %v5032_v29  ;;  %vm3043_vm3 = vcmp.ge.f32.partialorder %v3042_v14, 0.3  ;;  %v23_v14 = vstv %s6494_s17 }
 0x217   :  { %4366 = vmatprep.subr.bf16.mxu1 %v5034_v31  ;;  %24 = vst [vmem:[#allocation2] sm:$0x1] %v23_v14 }
 0x219   :  { %4345 = vmatpush3.bf16.msra.mxu0 %v5033_v30 }
 0x21a   :  { %4367 = vmatpush3.bf16.msra.mxu1 %v5035_v32  ;;  %4346 = vmatprep.subr.bf16.mxu0 %v5036_v33 }
 0x21b   :  { %4368 = vmatprep.subr.bf16.mxu1 %v5038_v35 }
 0x21d   :  { %4347 = vmatpush3.bf16.msra.mxu0 %v5037_v34 }
 0x21e   :  { %4369 = vmatpush3.bf16.msra.mxu1 %v5039_v36  ;;  %4348 = vmatprep.subr.bf16.mxu0 %v5040_v37 }
 0x21f   :  { %4370 = vmatprep.subr.bf16.mxu1 %v5042_v39  ;;  %v3442_v39 = vld [vmem:[%s6486_s9] sm:$0xf] }
 0x221   :  { %4349 = vmatpush3.bf16.msra.mxu0 %v5041_v38 }
 0x222   :  { %4371 = vmatpush3.bf16.msra.mxu1 %v5043_v40  ;;  %4350 = vmatprep.subr.bf16.mxu0 %v5044_v41  ;;  %v5056_v41 = vld [vmem:[%s6483_s13] sm:$0xff]  }
 0x223   :  { %4372 = vmatprep.subr.bf16.mxu1 %v5046_v43  ;;  %v5057_v43 = vld [vmem:[%s6483_s13 + $0x8] sm:$0xff]  }
 0x225   :  { %4351 = vmatpush3.bf16.msra.mxu0 %v5045_v42 }
 0x226   :  { %4352 = vmatprep.subr.bf16.mxu0 %v5048_v45  ;;  %4373 = vmatpush3.bf16.msra.mxu1 %v5047_v44  ;;  %v3441_v44 = vld [vmem:[%s6487_s1] sm:$0x3]  ;;  %v5058_v45 = vld [vmem:[%s6483_s13 + $0x10] sm:$0xff]  }
 0x227   :  { %4374 = vmatprep.subr.bf16.mxu1 %v5050_v46  ;;  %v5059_v46 = vld [vmem:[%s6483_s13 + $0x18] sm:$0xff]  }
 0x229   :  { %4353 = vmatpush3.bf16.msra.mxu0 %v5049_v47  ;;  %v5060_v47 = vld [vmem:[%s6483_s13 + $0x20] sm:$0xff]  }
 0x22a   :  { %4354 = vmatprep.subr.bf16.mxu0 %v5052_v48  ;;  %4375 = vmatpush3.bf16.msra.mxu1 %v5051_v49  ;;  %v5061_v48 = vld [vmem:[%s6483_s13 + $0x28] sm:$0xff]   ;;  %v5062_v49 = vld [vmem:[%s6483_s13 + $0x30] sm:$0xff]  }
 0x22b   :  { %4376 = vmatprep.subr.bf16.mxu1 %v5054_v50  ;;  %v5063_v50 = vld [vmem:[%s6483_s13 + $0x38] sm:$0xff]  }
 0x22d   :  { %4355 = vmatpush3.bf16.msra.mxu0 %v5053_v51  ;;  %v3529_v51 = vld [vmem:[%s6488_s11] sm:$0xff] }
 0x22e   :  { %4405 = vmatprep.subr.mxu0 %v5065_v53  ;;  %4377 = vmatpush3.bf16.msra.mxu1 %v5055_v52  ;;  %v3530_v52 = vld [vmem:[%s6488_s11 + $0x8] sm:$0xff] }
 0x22f   :  { %4422 = vmatprep.subr.bf16.mxu1 %v5065_v53  ;;  %v4454_v54 = vpack.c.bf16 %v3530_v52, %v3529_v51 }
 0x2e3   :  { %v2826_v7 = vpop.f32.mrb[20].mxu0 }
 0x2e4   :  { %v4462_v8 = vadd.f32 %v2826_v7, %v1011_v0  ;;  %v3031_v9 = vpop.f32.mrb[12].mxu1  ;;  %v2828_v11 = vpop.f32.mrb[21].mxu0 }
 0x2e5   :  { %v4464_v12 = vadd.f32 %v3031_v9, %v1019_v2  ;;  %v4463_v15 = vadd.f32 %v2828_v11, %v1015_v3  ;;  %v3033_v17 = vpop.f32.mrb[13].mxu1  ;;  %v2830_v18 = vpop.f32.mrb[22].mxu0  ;;  %v4322_v9 = vld [vmem:[%s6490_s10] ss:$0 sm:$0xff] }
 0x2e6   :  { %v3038_v19 = vmax.f32 %v4462_v8, 0.0  ;;  %v4465_v56 = vadd.f32 %v3033_v17, %v1023_v6  ;;  %v3035_v61 = vpop.f32.mrb[14].mxu1  ;;  %v2831_v20 = vpop.f32.mrb[23].mxu0 }
 0x2e7   :  { %v3040_v21 = vmax.f32 %v4464_v12, 0.0  ;;  %v3039_v22 = vmax.f32 %v4463_v15, 0.0  ;;  %v3036_v23 = vpop.f32.mrb[15].mxu1 }
 0x2e8   :  { %v3044_v24 = vmul.f32 1.4285715, %v3038_v19  ;;  %v3041_v57 = vmax.f32 %v4465_v56, 0.0  ;;  %v3630_v19 = vld [vmem:[%s6491_s14] sm:$0xf] }
 0x2e9   :  { %v3046_v25 = vmul.f32 1.4285715, %v3040_v21  ;;  %v3045_v1 = vmul.f32 1.4285715, %v3039_v22  ;;  %v4325_v56 = vld [vmem:[%s6492_s12] ss:$0 sm:$0xff] }
 0x2ea   :  { %v3047_v27 = vmul.f32 1.4285715, %v3041_v57 }
 0x2eb   :  { %v3052_v10 = vcombine.low %v3044_v24, %v3045_v1  ;;  %v3804_v1 = vld [vmem:[%s6493_s16] sm:$0xff] }
 0x2ec   :  { %v3053_v28 = vcombine.low %v3046_v25, %v3047_v27 }
 0x2ed   :  { %v3060_v13 = vrot.slane %v3052_v10, %v3059_v26  ;;  %v3806_v10 = vld [vmem:[%s6493_s16 + $0x10] sm:$0xff] }
 0x2ee   :  { %v3067_v29 = vrot.slane %v3053_v28, %v3059_v26  ;;  %v3807_v28 = vld [vmem:[%s6493_s16 + $0x18] sm:$0xff] }
 0x2f0   :  { %v3068_v30 = vcombine.low %v3060_v13, %v3067_v29  ;;  %v4337_v29 = vld [vmem:[%s6495_s15] ss:$0 sm:$0xff] }
 0x2f2   :  { %v3070_v31 = vsel %vm3043_vm3, %v3068_v30, 0.0 }
 0x2f3   :  { %v3079_v32 = vrot.slane %v3070_v31, %v3059_v26  ;;  %v3072_v33 = vcombine.high %v3070_v31, %v3070_v31 }
 0x2f5   :  { %v3087_v34 = vcombine.high %v3079_v32, %v3079_v32  ;;  %v3086_v35 = vrot.slane %v3072_v33, %v3059_v26  ;;  %v3093_v38 = vpack.c.bf16 %v3079_v32, %v3079_v32  ;;  %v3805_v26 = vld [vmem:[%s6493_s16 + $0x8] sm:$0xff] }
 0x2f6   :  { %v4457_v27 = vpack.c.bf16 %v3805_v26, %v3804_v1 }
 0x2f7   :  { %v3094_v36 = vpack.c.bf16 %v3087_v34, %v3087_v34  ;;  %v3088_v37 = vcombine.high %v3086_v35, %v3086_v35  ;;  %v3095_v42 = vpack.c.bf16 %v3086_v35, %v3086_v35  ;;  %v4338_v34 = vld [vmem:[#allocation2] ss:$0 sm:$0xff] }
 0x2f9   :  { %3392 = vmatprep.mubr.bf16.mxu0 %v3094_v36  ;;  %v3096_v40 = vpack.c.bf16 %v3088_v37, %v3088_v37 }
 0x2fa   :  { %3393 = vmatmul.mubr.bf16.vlgmr.msra.gmra.mrb[24].mxu0 %v3093_v38 }
 0x2fb   :  { %3432 = vmatprep.mubr.bf16.mxu1 %v3096_v40  ;;  %4406 = vmatpush3.msk.msra.mxu0 %vm3454_vm4, %v3442_v39 }
 0x2fc   :  { %3433 = vmatmul.mubr.bf16.vlgmr.msra.gmra.mrb[16].mxu1 %v3095_v42  ;;  %4407 = vmatprep.mubr.msk.f32.mxu0 %vm5067_vm5, %v5065_v53 }
 0x2fd   :  { %4423 = vmatpush3.bf16.msra.mxu1 %v5056_v41  ;;  %4438 = vmatprep.mubr.msk.bf16.mxu1 %vm5067_vm5, %v5065_v53 }
 0x2fe   :  { %4424 = vmatprep.subr.bf16.mxu1 %v5065_v53  ;;  %4453 = vmatprep.subr.bf16.mxu0 %v5068_v55 }
 0x301   :  { %4425 = vmatpush3.bf16.msra.mxu1 %v5057_v43 }
 0x302   :  { %4408 = vmatmul.mubr.msk.f32.vlgmr.msra.gmra.mrb[28].mxu0 %vm3450_vm6, %v3441_v44  ;;  %4426 = vmatprep.subr.bf16.mxu1 %v5065_v53 }
 0x303   :  { %4414 = vmatprep.mubr.msk.f32.mxu0 %vm5067_vm5, %v5065_v53  ;;  %4455 = vmatpush3.bf16.msra.mxu0 %v4454_v54 }
 0x304   :  { %4417 = vmatprep.subr.mxu0 %v5065_v53 }
 0x305   :  { %4427 = vmatpush3.bf16.msra.mxu1 %v5058_v45 }
 0x306   :  { %4428 = vmatprep.subr.bf16.mxu1 %v5065_v53 }
 0x309   :  { %4429 = vmatpush3.bf16.msra.mxu1 %v5059_v46 }
 0x30a   :  { %4430 = vmatprep.subr.bf16.mxu1 %v5065_v53 }
 0x30d   :  { %4431 = vmatpush3.bf16.msra.mxu1 %v5060_v47 }
 0x30e   :  { %4432 = vmatprep.subr.bf16.mxu1 %v5065_v53 }
 0x311   :  { %4433 = vmatpush3.bf16.msra.mxu1 %v5061_v48 }
 0x312   :  { %4434 = vmatprep.subr.bf16.mxu1 %v5065_v53 }
 0x315   :  { %4435 = vmatpush3.bf16.msra.mxu1 %v5062_v49 }
 0x316   :  { %4436 = vmatprep.subr.bf16.mxu1 %v5065_v53 }
 0x319   :  { %4437 = vmatpush3.bf16.msra.mxu1 %v5063_v50 }
 0x3cd   :  { %v4356_v58 = vpop.f32.mrb[24].mxu0 }
 0x3ce   :  { %v4357_v60 = vpop.f32.mrb[25].mxu0 }
 0x3cf   :  { %v4358_v62 = vadd.f32 %v4357_v60, %v4356_v58  ;;  %v4359_v63 = vpop.f32.mrb[26].mxu0  ;;  %v4378_v0 = vpop.f32.mrb[16].mxu1 }
 0x3d0   :  { %v4360_v2 = vpop.f32.mrb[27].mxu0  ;;  %v4379_v3 = vpop.f32.mrb[17].mxu1 }
 0x3d1   :  { %v3395_v4 = vadd.f32 %v4358_v62, %v4289_v59  ;;  %v4380_v5 = vadd.f32 %v4379_v3, %v4378_v0  ;;  %v4381_v6 = vpop.f32.mrb[18].mxu1 }
 0x3d2   :  { %v4382_v7 = vpop.f32.mrb[19].mxu1 }
 0x3d3   :  { %v3435_v8 = vadd.f32 %v4380_v5, %v3395_v4 }
 0x3d5   :  { %v3440_v11 = vmax.f32 %v3435_v8, 0.0  ;;  %v3524_v12 = vpop.f32.mrb[28].mxu0 }
 0x3d6   :  { %v3525_v15 = vadd.f32 %v4322_v9, %v3524_v12  ;;  %v4409_v16 = vpop.f32.mrb[29].mxu0 }
 0x3d7   :  { %v3613_v17 = vpack.c.bf16 %v3440_v11, %v3440_v11 }
 0x3d8   :  { %v3528_v18 = vmax.f32 %v3525_v15, 0.0 }
 0x3d9   :  { %4439 = vmatmul.mubr.bf16.vlgmr.msra.gmra.mrb[20].mxu1 %v3613_v17 }
 0x3da   :  { %4415 = vmatmul.mubr.msk.f32.vlgmr.msra.gmra.mrb[30].mxu0 %vm3538_vm7, %v3528_v18 }
 0x3db   :  { %4419 = vmatprep.mubr.msk.f32.mxu0 %vm5067_vm5, %v5065_v53  ;;  %4418 = vmatpush3.msk.msra.mxu0 %vm3454_vm4, %v3630_v19 }
 0x3dc   :  { %4456 = vmatprep.subr.bf16.mxu0 %v5068_v55 }
 0x4ac   :  { %v3789_v61 = vpop.f32.mrb[20].mxu1 }
 0x4ad   :  { %v3608_v20 = vpop.f32.mrb[30].mxu0  ;;  %v4440_v21 = vpop.f32.mrb[21].mxu1 }
 0x4ae   :  { %v3609_v22 = vadd.f32 %v4325_v56, %v3608_v20  ;;  %v4416_v23 = vpop.f32.mrb[31].mxu0  ;;  %v3792_v24 = vpop.f32.mrb[22].mxu1 }
 0x4af   :  { %v4441_v57 = vpop.f32.mrb[23].mxu1 }
 0x4b0   :  { %v3612_v25 = vmax.f32 %v3609_v22, 0.0 }
 0x4b2   :  { %4420 = vmatmul.mubr.msk.f32.vlgmr.msra.gmra.mrb[32].mxu0 %vm3450_vm6, %v3612_v25 }
 0x4b3   :  { %4450 = vmatprep.mubr.msk.f32.mxu0 %vm5067_vm5, %v5065_v53  ;;  %4458 = vmatpush3.bf16.msra.mxu0 %v4457_v27  ;;  %v4460_v53 = vpack.c.bf16 %v3807_v28, %v3806_v10 }
 0x4b4   :  { %4459 = vmatprep.subr.bf16.mxu0 %v5068_v55 }
 0x4b7   :  { %4461 = vmatpush3.bf16.msra.mxu0 %v4460_v53 }
 0x585   :  { %v3703_v13 = vpop.f32.mrb[32].mxu0 }
 0x586   :  { %v3790_v30 = vadd.f32 %v3789_v61, %v3703_v13  ;;  %v4421_v31 = vpop.f32.mrb[33].mxu0 }
 0x588   :  { %v3802_v32 = vadd.f32 %v4337_v29, %v3790_v30 }
 0x58a   :  { %v3803_v33 = vmax.f32 %v3802_v32, 0.0 }
 0x58c   :  { %4451 = vmatmul.mubr.msk.f32.vlgmr.msra.gmra.mrb[34].mxu0 %vm3815_vm8, %v3803_v33 }
 0x65f   :  { %v3885_v35 = vpop.f32.mrb[34].mxu0 }
 0x660   :  { %v3886_v36 = vadd.f32 %v4338_v34, %v3885_v35  ;;  %v4452_v37 = vpop.f32.mrb[35].mxu0 }
 0x662   :  { %3890 = vst.msk [vmem:[%s6496_s18] sm:$0x3] %vm3889_vm9, %v3886_v36 }

</bundles_post_ra>
